<compile_context>
chip_gen: v5e
topology: v5e:2x2
jax: 0.10.0
libtpu: 0.0.40
codegen_flags: <defaults>
</compile_context>

<pallas_src>
import functools
import math

import jax
import jax.numpy as jnp
from jax import lax
from jax.experimental import pallas as pl
from jax.experimental.pallas import tpu as pltpu


OUT_LANES = 128  # lane-dense output width (real logits live in the first output_dim lanes)


# ----------------------------- in-kernel helpers -----------------------------

def _layernorm(y, g, b, eps=1e-12):
    mu = jnp.mean(y, axis=-1, keepdims=True)
    var = jnp.mean((y - mu) ** 2, axis=-1, keepdims=True)
    return (y - mu) * lax.rsqrt(var + eps) * g + b


def _gelu(y):
    # exact (erf-based) GELU as used by BERT
    return 0.5 * y * (1.0 + lax.erf(y * 0.7071067811865475))


def _bf16(y):
    return y.astype(jnp.bfloat16)


# q @ k^T without materializing a transpose (contract last dims of both operands)
_TRANS_B_DIMS = (((1,), (1,)), ((), ()))


# ------------------------------ fused kernel --------------------------------

def _fused_bert_kernel(*refs, B, S, H, nh, L, n_cls):
    n_in = 19 + 2 * (n_cls + 1)
    (ids_ref, mask_ref, wemb_ref, pemb_ref, temb_ref, emb_g_ref, emb_b_ref,
     wqkv_ref, bqkv_ref, wo_ref, bo_ref, ln1g_ref, ln1b_ref,
     w1_ref, b1_ref, w2_ref, b2_ref, ln2g_ref, ln2b_ref) = refs[:19]
    cls_refs = refs[19:n_in]
    o_ref = refs[n_in]

    dh = H // nh
    scale = 1.0 / math.sqrt(dh)
    V = wemb_ref.shape[0]

    # --- fused embedding lookup: exact one-hot gather via one small f32 matmul ---
    ids = ids_ref[...]                                                   # [B*S, 1] int32
    onehot = (lax.broadcasted_iota(jnp.int32, (B * S, V), 1) == ids).astype(jnp.float32)
    word = jnp.dot(onehot, wemb_ref[...], preferred_element_type=jnp.float32)      # [B*S, H]
    pos = jnp.concatenate([pemb_ref[...][0:S, :]] * B, axis=0)           # [B*S, H]
    typ = temb_ref[...][0:1, :]                                          # [1, H] (token_type 0)
    x = _layernorm(word + pos + typ, emb_g_ref[...], emb_b_ref[...])     # [B*S, H]

    # --- additive attention mask, kept as [B, S] and broadcast per batch row ---
    neg = (1.0 - mask_ref[...]) * -1e9                                   # [B, S]

    # --- encoder layers (L is static; fully unrolled) ---
    for l in range(L):
        # fused Q|K|V projection: bf16 operands (MXU-native), f32 accumulate
        qkv = jnp.dot(_bf16(x), _bf16(wqkv_ref[l]),
                      preferred_element_type=jnp.float32) + bqkv_ref[l]  # [B*S, 3H]
        q_all = _bf16(qkv[:, :H])
        k_all = _bf16(qkv[:, H:2 * H])
        v_all = _bf16(qkv[:, 2 * H:3 * H])

        head_ctx = []
        for h in range(nh):
            c0 = h * dh
            # per-head lane slices hoisted out of the batch loop
            q_h = q_all[:, c0:c0 + dh]                                   # [B*S, dh]
            k_h = k_all[:, c0:c0 + dh]
            v_h = v_all[:, c0:c0 + dh]
            ctx_b = []
            for b in range(B):
                r0 = b * S
                s = lax.dot_general(q_h[r0:r0 + S], k_h[r0:r0 + S], _TRANS_B_DIMS,
                                    preferred_element_type=jnp.float32) * scale
                s = s + neg[b:b + 1, :]                                  # [S, S]
                s = s - jnp.max(s, axis=-1, keepdims=True)
                p = jnp.exp(s)
                p = p * pl.reciprocal(jnp.sum(p, axis=-1, keepdims=True), approx=True)
                ctx_b.append(jnp.dot(_bf16(p), v_h[r0:r0 + S],
                                     preferred_element_type=jnp.float32))        # [S, dh]
            head_ctx.append(jnp.concatenate(ctx_b, axis=0))              # [B*S, dh]
        ctx = jnp.concatenate(head_ctx, axis=1)                          # [B*S, H] lane concat

        # single per-layer output projection (was B*nh small matmuls + accumulation chain)
        attn_out = jnp.dot(_bf16(ctx), _bf16(wo_ref[l]),
                           preferred_element_type=jnp.float32) + bo_ref[l]
        x = _layernorm(x + attn_out, ln1g_ref[l], ln1b_ref[l])

        if l == L - 1:
            # only CLS rows feed the classifier: pool before the last FFN (= [:, 0] per sequence)
            x = jnp.concatenate([x[b * S:b * S + 1, :] for b in range(B)], axis=0)  # [B, H]

        # FFN: up-proj + GELU + down-proj, intermediate stays in vregs
        ff = _gelu(jnp.dot(_bf16(x), _bf16(w1_ref[l]),
                           preferred_element_type=jnp.float32) + b1_ref[l])
        ff = jnp.dot(_bf16(ff), _bf16(w2_ref[l]),
                     preferred_element_type=jnp.float32) + b2_ref[l]
        x = _layernorm(x + ff, ln2g_ref[l], ln2b_ref[l])

    # --- classifier head: (Dropout[=identity] -> Linear -> ReLU)* -> Linear -> Softmax ---
    h = x                                                                # [B, H] pooled CLS
    for i in range(n_cls):
        w = cls_refs[2 * i][...]
        bias = cls_refs[2 * i + 1][...]
        h = jnp.maximum(jnp.dot(_bf16(h), _bf16(w),
                                preferred_element_type=jnp.float32) + bias, 0.0)
    w_out = cls_refs[2 * n_cls][...]                                     # [last, 128] lane-padded
    b_out = cls_refs[2 * n_cls + 1][...]                                 # [1, 128], pad bias -1e30
    logits = jnp.dot(_bf16(h), _bf16(w_out),
                     preferred_element_type=jnp.float32) + b_out         # [B, 128]
    logits = logits - jnp.max(logits, axis=-1, keepdims=True)
    e = jnp.exp(logits)                                                  # pad lanes underflow to 0
    o_ref[...] = (e / jnp.sum(e, axis=-1, keepdims=True)).astype(o_ref.dtype)


# --------------------------- model configuration ----------------------------

CFG = dict(
    vocab_size=50,
    max_position=32,
    type_vocab_size=2,
    hidden=32,
    heads=4,
    layers=2,
    intermediate=64,
    classifier_layers=[16],   # config.classifier_layers
    output_dim=2,             # config.output_dim
)


def init_params(key, cfg):
    """Deterministic synthetic parameters (stand-in for the checkpoint load),
    stored directly in the fused layout the kernel consumes."""
    H, I, L = cfg["hidden"], cfg["intermediate"], cfg["layers"]

    def nrm(k, shape, scale=0.02):
        return (scale * jax.random.normal(k, shape)).astype(jnp.float32)

    keys = iter(jax.random.split(key, 64))
    p = {}
    p["word_emb"] = nrm(next(keys), (cfg["vocab_size"], H))
    p["pos_emb"] = nrm(next(keys), (cfg["max_position"], H))
    p["type_emb"] = nrm(next(keys), (cfg["type_vocab_size"], H))
    p["emb_ln_g"] = jnp.ones((1, H), jnp.float32)
    p["emb_ln_b"] = jnp.zeros((1, H), jnp.float32)

    # stacked per-layer encoder weights; Q|K|V fused along the output (lane) axis
    p["wqkv"] = nrm(next(keys), (L, H, 3 * H))
    p["bqkv"] = jnp.zeros((L, 1, 3 * H), jnp.float32)
    p["wo"] = nrm(next(keys), (L, H, H))
    p["bo"] = jnp.zeros((L, 1, H), jnp.float32)
    p["ln1_g"] = jnp.ones((L, 1, H), jnp.float32)
    p["ln1_b"] = jnp.zeros((L, 1, H), jnp.float32)
    p["w1"] = nrm(next(keys), (L, H, I))
    p["b1"] = jnp.zeros((L, 1, I), jnp.float32)
    p["w2"] = nrm(next(keys), (L, I, H))
    p["b2"] = jnp.zeros((L, 1, H), jnp.float32)
    p["ln2_g"] = jnp.ones((L, 1, H), jnp.float32)
    p["ln2_b"] = jnp.zeros((L, 1, H), jnp.float32)

    # classifier head: [Dropout, Linear, ReLU]* + Linear + Softmax
    p["cls"] = []
    last = H
    for n in cfg["classifier_layers"]:
        p["cls"].append((nrm(next(keys), (last, n)), jnp.zeros((1, n), jnp.float32)))
        last = n

    # final Linear is stored lane-padded to 128 so the kernel output store is lane-dense;
    # pad-lane bias = -1e30 makes the softmax over pad lanes exactly 0.
    out_dim = cfg["output_dim"]
    w_out = nrm(next(keys), (last, out_dim))
    b_out = jnp.zeros((1, out_dim), jnp.float32)
    w_pad = jnp.zeros((last, OUT_LANES), jnp.float32).at[:, :out_dim].set(w_out)
    b_pad = jnp.full((1, OUT_LANES), -1e30, jnp.float32).at[:, :out_dim].set(b_out)
    p["cls_out"] = (w_pad, b_pad)
    return p


# ------------------------------ forward pass --------------------------------

def binary_bert_forward(params, input_ids, attention_mask, cfg):
    B, S = input_ids.shape
    H, nh, L = cfg["hidden"], cfg["heads"], cfg["layers"]
    n_cls = len(cfg["classifier_layers"])

    ids = input_ids.reshape(B * S, 1).astype(jnp.int32)      # column layout for in-kernel one-hot
    mask = attention_mask.astype(jnp.float32)                 # [B, S]

    inputs = [ids, mask,
              params["word_emb"], params["pos_emb"], params["type_emb"],
              params["emb_ln_g"], params["emb_ln_b"],
              params["wqkv"], params["bqkv"], params["wo"], params["bo"],
              params["ln1_g"], params["ln1_b"],
              params["w1"], params["b1"], params["w2"], params["b2"],
              params["ln2_g"], params["ln2_b"]]
    for w, b in params["cls"]:
        inputs.extend([w, b])
    inputs.extend(list(params["cls_out"]))

    kernel = functools.partial(_fused_bert_kernel,
                               B=B, S=S, H=H, nh=nh, L=L, n_cls=n_cls)

    # NOTE(v7x): total resident data is ~100 KiB so no VMEM budgeting is needed; if H/S/B grow,
    # size against v7x's 64 MiB physical VMEM and add a "parallel" batch grid axis for the 2nd TC.
    out_pad = pl.pallas_call(
        kernel,
        out_shape=jax.ShapeDtypeStruct((B, OUT_LANES), jnp.float32),
        in_specs=[pl.BlockSpec(memory_space=pltpu.MemorySpace.VMEM)] * len(inputs),
        out_specs=pl.BlockSpec(memory_space=pltpu.MemorySpace.VMEM),
    )(*inputs)
    return out_pad[:, :cfg["output_dim"]]


# ---------------------------------- main -------------------------------------

if __name__ == "__main__":
    key = jax.random.PRNGKey(0)
    pkey, ikey = jax.random.split(key)

    B, S = 2, 8
    params = init_params(pkey, CFG)

    input_ids = jax.random.randint(ikey, (B, S), 0, CFG["vocab_size"], dtype=jnp.int32)
    attention_mask = jnp.ones((B, S), jnp.float32).at[1, 6:].set(0.0)  # pad last 2 of batch 1

    fwd = jax.jit(functools.partial(binary_bert_forward, cfg=CFG))
    out = fwd(params, input_ids, attention_mask)
    out = jax.block_until_ready(out)

    assert out.shape == (B, CFG["output_dim"])
    # softmax rows sum to 1
    assert bool(jnp.all(jnp.abs(jnp.sum(out, axis=-1) - 1.0) < 1e-5))
    print("KERNEL_OK")
</pallas_src>

<mosaic_0001>
module attributes {stable_mosaic.version = 11 : i64} {
  func.func @_fused_bert_kernel(%arg0: memref<16x1xi32, #tpu.memory_space<vmem>>, %arg1: memref<2x8xf32, #tpu.memory_space<vmem>>, %arg2: memref<50x32xf32, #tpu.memory_space<vmem>>, %arg3: memref<32x32xf32, #tpu.memory_space<vmem>>, %arg4: memref<2x32xf32, #tpu.memory_space<vmem>>, %arg5: memref<1x32xf32, #tpu.memory_space<vmem>>, %arg6: memref<1x32xf32, #tpu.memory_space<vmem>>, %arg7: memref<2x32x96xf32, #tpu.memory_space<vmem>>, %arg8: memref<2x1x96xf32, #tpu.memory_space<vmem>>, %arg9: memref<2x32x32xf32, #tpu.memory_space<vmem>>, %arg10: memref<2x1x32xf32, #tpu.memory_space<vmem>>, %arg11: memref<2x1x32xf32, #tpu.memory_space<vmem>>, %arg12: memref<2x1x32xf32, #tpu.memory_space<vmem>>, %arg13: memref<2x32x64xf32, #tpu.memory_space<vmem>>, %arg14: memref<2x1x64xf32, #tpu.memory_space<vmem>>, %arg15: memref<2x64x32xf32, #tpu.memory_space<vmem>>, %arg16: memref<2x1x32xf32, #tpu.memory_space<vmem>>, %arg17: memref<2x1x32xf32, #tpu.memory_space<vmem>>, %arg18: memref<2x1x32xf32, #tpu.memory_space<vmem>>, %arg19: memref<32x16xf32, #tpu.memory_space<vmem>>, %arg20: memref<1x16xf32, #tpu.memory_space<vmem>>, %arg21: memref<16x128xf32, #tpu.memory_space<vmem>>, %arg22: memref<1x128xf32, #tpu.memory_space<vmem>>, %arg23: memref<2x128xf32, #tpu.memory_space<vmem>>) attributes {dimension_semantics = [], scalar_prefetch = 0 : i64, scratch_operands = 0 : i64, tpu.core_type = #tpu.core_type<tc>} {
    %c0 = arith.constant 0 : index
    %c0_0 = arith.constant 0 : index
    %0 = vector.load %arg0[%c0, %c0_0] : memref<16x1xi32, #tpu.memory_space<vmem>>, vector<16x1xi32>
    %1 = tpu.iota {dimensions = array<i32: 1>} : vector<16x50xi32>
    %2 = vector.broadcast %0 : vector<16x1xi32> to vector<16x50xi32>
    %3 = arith.cmpi eq, %1, %2 : vector<16x50xi32>
    %4 = arith.extui %3 : vector<16x50xi1> to vector<16x50xi32>
    %5 = arith.sitofp %4 : vector<16x50xi32> to vector<16x50xf32>
    %c0_1 = arith.constant 0 : index
    %c0_2 = arith.constant 0 : index
    %6 = vector.load %arg2[%c0_1, %c0_2] : memref<50x32xf32, #tpu.memory_space<vmem>>, vector<50x32xf32>
    %cst = arith.constant dense<0.000000e+00> : vector<16x32xf32>
    %7 = tpu.matmul %5, %6, %cst {dimension_numbers = #tpu.dot_dimension_numbers<[1], [0], [0], [1], [0, 0, 1, 1], [], []>} : vector<16x50xf32>, vector<50x32xf32>, vector<16x32xf32> -> vector<16x32xf32>
    %c0_3 = arith.constant 0 : index
    %c0_4 = arith.constant 0 : index
    %8 = vector.load %arg3[%c0_3, %c0_4] : memref<32x32xf32, #tpu.memory_space<vmem>>, vector<32x32xf32>
    %9 = vector.extract_strided_slice %8 {offsets = [0, 0], sizes = [8, 32], strides = [1, 1]} : vector<32x32xf32> to vector<8x32xf32>
    %10 = tpu.concatenate %9, %9 in 0 : vector<8x32xf32>, vector<8x32xf32> -> vector<16x32xf32>
    %c0_5 = arith.constant 0 : index
    %c0_6 = arith.constant 0 : index
    %11 = vector.load %arg4[%c0_5, %c0_6] : memref<2x32xf32, #tpu.memory_space<vmem>>, vector<2x32xf32>
    %12 = vector.extract_strided_slice %11 {offsets = [0, 0], sizes = [1, 32], strides = [1, 1]} : vector<2x32xf32> to vector<1x32xf32>
    %13 = arith.addf %7, %10 : vector<16x32xf32>
    %14 = vector.broadcast %12 : vector<1x32xf32> to vector<16x32xf32>
    %15 = arith.addf %13, %14 : vector<16x32xf32>
    %c0_7 = arith.constant 0 : index
    %c0_8 = arith.constant 0 : index
    %16 = vector.load %arg5[%c0_7, %c0_8] : memref<1x32xf32, #tpu.memory_space<vmem>>, vector<1x32xf32>
    %c0_9 = arith.constant 0 : index
    %c0_10 = arith.constant 0 : index
    %17 = vector.load %arg6[%c0_9, %c0_10] : memref<1x32xf32, #tpu.memory_space<vmem>>, vector<1x32xf32>
    %cst_11 = arith.constant dense<0.000000e+00> : vector<16xf32>
    %18 = vector.multi_reduction <add>, %15, %cst_11 [1] : vector<16x32xf32> to vector<16xf32>
    %19 = vector.shape_cast %18 : vector<16xf32> to vector<16x1xf32>
    %cst_12 = arith.constant 3.200000e+01 : f32
    %20 = vector.broadcast %cst_12 : f32 to vector<16x1xf32>
    %21 = arith.divf %19, %20 : vector<16x1xf32>
    %22 = vector.broadcast %21 : vector<16x1xf32> to vector<16x32xf32>
    %23 = arith.subf %15, %22 : vector<16x32xf32>
    %24 = arith.mulf %23, %23 : vector<16x32xf32>
    %cst_13 = arith.constant dense<0.000000e+00> : vector<16xf32>
    %25 = vector.multi_reduction <add>, %24, %cst_13 [1] : vector<16x32xf32> to vector<16xf32>
    %26 = vector.shape_cast %25 : vector<16xf32> to vector<16x1xf32>
    %cst_14 = arith.constant 3.200000e+01 : f32
    %27 = vector.broadcast %cst_14 : f32 to vector<16x1xf32>
    %28 = arith.divf %26, %27 : vector<16x1xf32>
    %29 = vector.broadcast %21 : vector<16x1xf32> to vector<16x32xf32>
    %30 = arith.subf %15, %29 : vector<16x32xf32>
    %cst_15 = arith.constant 9.99999996E-13 : f32
    %31 = vector.broadcast %cst_15 : f32 to vector<16x1xf32>
    %32 = arith.addf %28, %31 : vector<16x1xf32>
    %33 = math.rsqrt %32 : vector<16x1xf32>
    %34 = vector.broadcast %33 : vector<16x1xf32> to vector<16x32xf32>
    %35 = arith.mulf %30, %34 : vector<16x32xf32>
    %36 = vector.broadcast %16 : vector<1x32xf32> to vector<16x32xf32>
    %37 = arith.mulf %35, %36 : vector<16x32xf32>
    %38 = vector.broadcast %17 : vector<1x32xf32> to vector<16x32xf32>
    %39 = arith.addf %37, %38 : vector<16x32xf32>
    %c0_16 = arith.constant 0 : index
    %c0_17 = arith.constant 0 : index
    %40 = vector.load %arg1[%c0_16, %c0_17] : memref<2x8xf32, #tpu.memory_space<vmem>>, vector<2x8xf32>
    %cst_18 = arith.constant 1.000000e+00 : f32
    %41 = vector.broadcast %cst_18 : f32 to vector<2x8xf32>
    %42 = arith.subf %41, %40 : vector<2x8xf32>
    %cst_19 = arith.constant -1.000000e+09 : f32
    %43 = vector.broadcast %cst_19 : f32 to vector<2x8xf32>
    %44 = arith.mulf %42, %43 : vector<2x8xf32>
    %45 = arith.truncf %39 : vector<16x32xf32> to vector<16x32xbf16>
    %c0_20 = arith.constant 0 : index
    %c0_21 = arith.constant 0 : index
    %c0_22 = arith.constant 0 : index
    %46 = vector.load %arg7[%c0_20, %c0_21, %c0_22] : memref<2x32x96xf32, #tpu.memory_space<vmem>>, vector<1x32x96xf32>
    %47 = vector.shape_cast %46 : vector<1x32x96xf32> to vector<32x96xf32>
    %48 = arith.truncf %47 : vector<32x96xf32> to vector<32x96xbf16>
    %cst_23 = arith.constant dense<0.000000e+00> : vector<16x96xf32>
    %49 = tpu.matmul %45, %48, %cst_23 {dimension_numbers = #tpu.dot_dimension_numbers<[1], [0], [0], [1], [0, 0, 1, 1], [], []>} : vector<16x32xbf16>, vector<32x96xbf16>, vector<16x96xf32> -> vector<16x96xf32>
    %c0_24 = arith.constant 0 : index
    %c0_25 = arith.constant 0 : index
    %c0_26 = arith.constant 0 : index
    %50 = vector.load %arg8[%c0_24, %c0_25, %c0_26] : memref<2x1x96xf32, #tpu.memory_space<vmem>>, vector<1x1x96xf32>
    %51 = vector.shape_cast %50 : vector<1x1x96xf32> to vector<1x96xf32>
    %52 = vector.broadcast %51 : vector<1x96xf32> to vector<16x96xf32>
    %53 = arith.addf %49, %52 : vector<16x96xf32>
    %54 = vector.extract_strided_slice %53 {offsets = [0, 0], sizes = [16, 32], strides = [1, 1]} : vector<16x96xf32> to vector<16x32xf32>
    %55 = arith.truncf %54 : vector<16x32xf32> to vector<16x32xbf16>
    %56 = vector.extract_strided_slice %53 {offsets = [0, 32], sizes = [16, 32], strides = [1, 1]} : vector<16x96xf32> to vector<16x32xf32>
    %57 = arith.truncf %56 : vector<16x32xf32> to vector<16x32xbf16>
    %58 = vector.extract_strided_slice %53 {offsets = [0, 64], sizes = [16, 32], strides = [1, 1]} : vector<16x96xf32> to vector<16x32xf32>
    %59 = arith.truncf %58 : vector<16x32xf32> to vector<16x32xbf16>
    %60 = vector.extract_strided_slice %55 {offsets = [0, 0], sizes = [16, 8], strides = [1, 1]} : vector<16x32xbf16> to vector<16x8xbf16>
    %61 = vector.extract_strided_slice %57 {offsets = [0, 0], sizes = [16, 8], strides = [1, 1]} : vector<16x32xbf16> to vector<16x8xbf16>
    %62 = vector.extract_strided_slice %59 {offsets = [0, 0], sizes = [16, 8], strides = [1, 1]} : vector<16x32xbf16> to vector<16x8xbf16>
    %63 = vector.extract_strided_slice %60 {offsets = [0, 0], sizes = [8, 8], strides = [1, 1]} : vector<16x8xbf16> to vector<8x8xbf16>
    %64 = vector.extract_strided_slice %61 {offsets = [0, 0], sizes = [8, 8], strides = [1, 1]} : vector<16x8xbf16> to vector<8x8xbf16>
    %cst_27 = arith.constant dense<0.000000e+00> : vector<8x8xf32>
    %65 = tpu.matmul %63, %64, %cst_27 {dimension_numbers = #tpu.dot_dimension_numbers<[1], [1], [0], [0], [0, 0, 1, 0], [], []>} : vector<8x8xbf16>, vector<8x8xbf16>, vector<8x8xf32> -> vector<8x8xf32>
    %cst_28 = arith.constant 0.353553385 : f32
    %66 = vector.broadcast %cst_28 : f32 to vector<8x8xf32>
    %67 = arith.mulf %65, %66 : vector<8x8xf32>
    %68 = vector.extract_strided_slice %44 {offsets = [0, 0], sizes = [1, 8], strides = [1, 1]} : vector<2x8xf32> to vector<1x8xf32>
    %69 = vector.broadcast %68 : vector<1x8xf32> to vector<8x8xf32>
    %70 = arith.addf %67, %69 : vector<8x8xf32>
    %cst_29 = arith.constant dense<0xFF800000> : vector<8xf32>
    %71 = vector.multi_reduction <maximumf>, %70, %cst_29 [1] : vector<8x8xf32> to vector<8xf32>
    %72 = vector.shape_cast %71 : vector<8xf32> to vector<8x1xf32>
    %73 = vector.broadcast %72 : vector<8x1xf32> to vector<8x8xf32>
    %74 = arith.subf %70, %73 : vector<8x8xf32>
    %75 = math.exp %74 : vector<8x8xf32>
    %cst_30 = arith.constant dense<0.000000e+00> : vector<8xf32>
    %76 = vector.multi_reduction <add>, %75, %cst_30 [1] : vector<8x8xf32> to vector<8xf32>
    %77 = vector.shape_cast %76 : vector<8xf32> to vector<8x1xf32>
    %78 = tpu.reciprocal %77 {approx = true} : vector<8x1xf32> -> vector<8x1xf32>
    %79 = vector.broadcast %78 : vector<8x1xf32> to vector<8x8xf32>
    %80 = arith.mulf %75, %79 : vector<8x8xf32>
    %81 = arith.truncf %80 : vector<8x8xf32> to vector<8x8xbf16>
    %82 = vector.extract_strided_slice %62 {offsets = [0, 0], sizes = [8, 8], strides = [1, 1]} : vector<16x8xbf16> to vector<8x8xbf16>
    %cst_31 = arith.constant dense<0.000000e+00> : vector<8x8xf32>
    %83 = tpu.matmul %81, %82, %cst_31 {dimension_numbers = #tpu.dot_dimension_numbers<[1], [0], [0], [1], [0, 0, 1, 1], [], []>} : vector<8x8xbf16>, vector<8x8xbf16>, vector<8x8xf32> -> vector<8x8xf32>
    %84 = vector.extract_strided_slice %60 {offsets = [8, 0], sizes = [8, 8], strides = [1, 1]} : vector<16x8xbf16> to vector<8x8xbf16>
    %85 = vector.extract_strided_slice %61 {offsets = [8, 0], sizes = [8, 8], strides = [1, 1]} : vector<16x8xbf16> to vector<8x8xbf16>
    %cst_32 = arith.constant dense<0.000000e+00> : vector<8x8xf32>
    %86 = tpu.matmul %84, %85, %cst_32 {dimension_numbers = #tpu.dot_dimension_numbers<[1], [1], [0], [0], [0, 0, 1, 0], [], []>} : vector<8x8xbf16>, vector<8x8xbf16>, vector<8x8xf32> -> vector<8x8xf32>
    %cst_33 = arith.constant 0.353553385 : f32
    %87 = vector.broadcast %cst_33 : f32 to vector<8x8xf32>
    %88 = arith.mulf %86, %87 : vector<8x8xf32>
    %89 = vector.extract_strided_slice %44 {offsets = [1, 0], sizes = [1, 8], strides = [1, 1]} : vector<2x8xf32> to vector<1x8xf32>
    %90 = vector.broadcast %89 : vector<1x8xf32> to vector<8x8xf32>
    %91 = arith.addf %88, %90 : vector<8x8xf32>
    %cst_34 = arith.constant dense<0xFF800000> : vector<8xf32>
    %92 = vector.multi_reduction <maximumf>, %91, %cst_34 [1] : vector<8x8xf32> to vector<8xf32>
    %93 = vector.shape_cast %92 : vector<8xf32> to vector<8x1xf32>
    %94 = vector.broadcast %93 : vector<8x1xf32> to vector<8x8xf32>
    %95 = arith.subf %91, %94 : vector<8x8xf32>
    %96 = math.exp %95 : vector<8x8xf32>
    %cst_35 = arith.constant dense<0.000000e+00> : vector<8xf32>
    %97 = vector.multi_reduction <add>, %96, %cst_35 [1] : vector<8x8xf32> to vector<8xf32>
    %98 = vector.shape_cast %97 : vector<8xf32> to vector<8x1xf32>
    %99 = tpu.reciprocal %98 {approx = true} : vector<8x1xf32> -> vector<8x1xf32>
    %100 = vector.broadcast %99 : vector<8x1xf32> to vector<8x8xf32>
    %101 = arith.mulf %96, %100 : vector<8x8xf32>
    %102 = arith.truncf %101 : vector<8x8xf32> to vector<8x8xbf16>
    %103 = vector.extract_strided_slice %62 {offsets = [8, 0], sizes = [8, 8], strides = [1, 1]} : vector<16x8xbf16> to vector<8x8xbf16>
    %cst_36 = arith.constant dense<0.000000e+00> : vector<8x8xf32>
    %104 = tpu.matmul %102, %103, %cst_36 {dimension_numbers = #tpu.dot_dimension_numbers<[1], [0], [0], [1], [0, 0, 1, 1], [], []>} : vector<8x8xbf16>, vector<8x8xbf16>, vector<8x8xf32> -> vector<8x8xf32>
    %105 = tpu.concatenate %83, %104 in 0 : vector<8x8xf32>, vector<8x8xf32> -> vector<16x8xf32>
    %106 = vector.extract_strided_slice %55 {offsets = [0, 8], sizes = [16, 8], strides = [1, 1]} : vector<16x32xbf16> to vector<16x8xbf16>
    %107 = vector.extract_strided_slice %57 {offsets = [0, 8], sizes = [16, 8], strides = [1, 1]} : vector<16x32xbf16> to vector<16x8xbf16>
    %108 = vector.extract_strided_slice %59 {offsets = [0, 8], sizes = [16, 8], strides = [1, 1]} : vector<16x32xbf16> to vector<16x8xbf16>
    %109 = vector.extract_strided_slice %106 {offsets = [0, 0], sizes = [8, 8], strides = [1, 1]} : vector<16x8xbf16> to vector<8x8xbf16>
    %110 = vector.extract_strided_slice %107 {offsets = [0, 0], sizes = [8, 8], strides = [1, 1]} : vector<16x8xbf16> to vector<8x8xbf16>
    %cst_37 = arith.constant dense<0.000000e+00> : vector<8x8xf32>
    %111 = tpu.matmul %109, %110, %cst_37 {dimension_numbers = #tpu.dot_dimension_numbers<[1], [1], [0], [0], [0, 0, 1, 0], [], []>} : vector<8x8xbf16>, vector<8x8xbf16>, vector<8x8xf32> -> vector<8x8xf32>
    %cst_38 = arith.constant 0.353553385 : f32
    %112 = vector.broadcast %cst_38 : f32 to vector<8x8xf32>
    %113 = arith.mulf %111, %112 : vector<8x8xf32>
    %114 = vector.extract_strided_slice %44 {offsets = [0, 0], sizes = [1, 8], strides = [1, 1]} : vector<2x8xf32> to vector<1x8xf32>
    %115 = vector.broadcast %114 : vector<1x8xf32> to vector<8x8xf32>
    %116 = arith.addf %113, %115 : vector<8x8xf32>
    %cst_39 = arith.constant dense<0xFF800000> : vector<8xf32>
    %117 = vector.multi_reduction <maximumf>, %116, %cst_39 [1] : vector<8x8xf32> to vector<8xf32>
    %118 = vector.shape_cast %117 : vector<8xf32> to vector<8x1xf32>
    %119 = vector.broadcast %118 : vector<8x1xf32> to vector<8x8xf32>
    %120 = arith.subf %116, %119 : vector<8x8xf32>
    %121 = math.exp %120 : vector<8x8xf32>
    %cst_40 = arith.constant dense<0.000000e+00> : vector<8xf32>
    %122 = vector.multi_reduction <add>, %121, %cst_40 [1] : vector<8x8xf32> to vector<8xf32>
    %123 = vector.shape_cast %122 : vector<8xf32> to vector<8x1xf32>
    %124 = tpu.reciprocal %123 {approx = true} : vector<8x1xf32> -> vector<8x1xf32>
    %125 = vector.broadcast %124 : vector<8x1xf32> to vector<8x8xf32>
    %126 = arith.mulf %121, %125 : vector<8x8xf32>
    %127 = arith.truncf %126 : vector<8x8xf32> to vector<8x8xbf16>
    %128 = vector.extract_strided_slice %108 {offsets = [0, 0], sizes = [8, 8], strides = [1, 1]} : vector<16x8xbf16> to vector<8x8xbf16>
    %cst_41 = arith.constant dense<0.000000e+00> : vector<8x8xf32>
    %129 = tpu.matmul %127, %128, %cst_41 {dimension_numbers = #tpu.dot_dimension_numbers<[1], [0], [0], [1], [0, 0, 1, 1], [], []>} : vector<8x8xbf16>, vector<8x8xbf16>, vector<8x8xf32> -> vector<8x8xf32>
    %130 = vector.extract_strided_slice %106 {offsets = [8, 0], sizes = [8, 8], strides = [1, 1]} : vector<16x8xbf16> to vector<8x8xbf16>
    %131 = vector.extract_strided_slice %107 {offsets = [8, 0], sizes = [8, 8], strides = [1, 1]} : vector<16x8xbf16> to vector<8x8xbf16>
    %cst_42 = arith.constant dense<0.000000e+00> : vector<8x8xf32>
    %132 = tpu.matmul %130, %131, %cst_42 {dimension_numbers = #tpu.dot_dimension_numbers<[1], [1], [0], [0], [0, 0, 1, 0], [], []>} : vector<8x8xbf16>, vector<8x8xbf16>, vector<8x8xf32> -> vector<8x8xf32>
    %cst_43 = arith.constant 0.353553385 : f32
    %133 = vector.broadcast %cst_43 : f32 to vector<8x8xf32>
    %134 = arith.mulf %132, %133 : vector<8x8xf32>
    %135 = vector.extract_strided_slice %44 {offsets = [1, 0], sizes = [1, 8], strides = [1, 1]} : vector<2x8xf32> to vector<1x8xf32>
    %136 = vector.broadcast %135 : vector<1x8xf32> to vector<8x8xf32>
    %137 = arith.addf %134, %136 : vector<8x8xf32>
    %cst_44 = arith.constant dense<0xFF800000> : vector<8xf32>
    %138 = vector.multi_reduction <maximumf>, %137, %cst_44 [1] : vector<8x8xf32> to vector<8xf32>
    %139 = vector.shape_cast %138 : vector<8xf32> to vector<8x1xf32>
    %140 = vector.broadcast %139 : vector<8x1xf32> to vector<8x8xf32>
    %141 = arith.subf %137, %140 : vector<8x8xf32>
    %142 = math.exp %141 : vector<8x8xf32>
    %cst_45 = arith.constant dense<0.000000e+00> : vector<8xf32>
    %143 = vector.multi_reduction <add>, %142, %cst_45 [1] : vector<8x8xf32> to vector<8xf32>
    %144 = vector.shape_cast %143 : vector<8xf32> to vector<8x1xf32>
    %145 = tpu.reciprocal %144 {approx = true} : vector<8x1xf32> -> vector<8x1xf32>
    %146 = vector.broadcast %145 : vector<8x1xf32> to vector<8x8xf32>
    %147 = arith.mulf %142, %146 : vector<8x8xf32>
    %148 = arith.truncf %147 : vector<8x8xf32> to vector<8x8xbf16>
    %149 = vector.extract_strided_slice %108 {offsets = [8, 0], sizes = [8, 8], strides = [1, 1]} : vector<16x8xbf16> to vector<8x8xbf16>
    %cst_46 = arith.constant dense<0.000000e+00> : vector<8x8xf32>
    %150 = tpu.matmul %148, %149, %cst_46 {dimension_numbers = #tpu.dot_dimension_numbers<[1], [0], [0], [1], [0, 0, 1, 1], [], []>} : vector<8x8xbf16>, vector<8x8xbf16>, vector<8x8xf32> -> vector<8x8xf32>
    %151 = tpu.concatenate %129, %150 in 0 : vector<8x8xf32>, vector<8x8xf32> -> vector<16x8xf32>
    %152 = vector.extract_strided_slice %55 {offsets = [0, 16], sizes = [16, 8], strides = [1, 1]} : vector<16x32xbf16> to vector<16x8xbf16>
    %153 = vector.extract_strided_slice %57 {offsets = [0, 16], sizes = [16, 8], strides = [1, 1]} : vector<16x32xbf16> to vector<16x8xbf16>
    %154 = vector.extract_strided_slice %59 {offsets = [0, 16], sizes = [16, 8], strides = [1, 1]} : vector<16x32xbf16> to vector<16x8xbf16>
    %155 = vector.extract_strided_slice %152 {offsets = [0, 0], sizes = [8, 8], strides = [1, 1]} : vector<16x8xbf16> to vector<8x8xbf16>
    %156 = vector.extract_strided_slice %153 {offsets = [0, 0], sizes = [8, 8], strides = [1, 1]} : vector<16x8xbf16> to vector<8x8xbf16>
    %cst_47 = arith.constant dense<0.000000e+00> : vector<8x8xf32>
    %157 = tpu.matmul %155, %156, %cst_47 {dimension_numbers = #tpu.dot_dimension_numbers<[1], [1], [0], [0], [0, 0, 1, 0], [], []>} : vector<8x8xbf16>, vector<8x8xbf16>, vector<8x8xf32> -> vector<8x8xf32>
    %cst_48 = arith.constant 0.353553385 : f32
    %158 = vector.broadcast %cst_48 : f32 to vector<8x8xf32>
    %159 = arith.mulf %157, %158 : vector<8x8xf32>
    %160 = vector.extract_strided_slice %44 {offsets = [0, 0], sizes = [1, 8], strides = [1, 1]} : vector<2x8xf32> to vector<1x8xf32>
    %161 = vector.broadcast %160 : vector<1x8xf32> to vector<8x8xf32>
    %162 = arith.addf %159, %161 : vector<8x8xf32>
    %cst_49 = arith.constant dense<0xFF800000> : vector<8xf32>
    %163 = vector.multi_reduction <maximumf>, %162, %cst_49 [1] : vector<8x8xf32> to vector<8xf32>
    %164 = vector.shape_cast %163 : vector<8xf32> to vector<8x1xf32>
    %165 = vector.broadcast %164 : vector<8x1xf32> to vector<8x8xf32>
    %166 = arith.subf %162, %165 : vector<8x8xf32>
    %167 = math.exp %166 : vector<8x8xf32>
    %cst_50 = arith.constant dense<0.000000e+00> : vector<8xf32>
    %168 = vector.multi_reduction <add>, %167, %cst_50 [1] : vector<8x8xf32> to vector<8xf32>
    %169 = vector.shape_cast %168 : vector<8xf32> to vector<8x1xf32>
    %170 = tpu.reciprocal %169 {approx = true} : vector<8x1xf32> -> vector<8x1xf32>
    %171 = vector.broadcast %170 : vector<8x1xf32> to vector<8x8xf32>
    %172 = arith.mulf %167, %171 : vector<8x8xf32>
    %173 = arith.truncf %172 : vector<8x8xf32> to vector<8x8xbf16>
    %174 = vector.extract_strided_slice %154 {offsets = [0, 0], sizes = [8, 8], strides = [1, 1]} : vector<16x8xbf16> to vector<8x8xbf16>
    %cst_51 = arith.constant dense<0.000000e+00> : vector<8x8xf32>
    %175 = tpu.matmul %173, %174, %cst_51 {dimension_numbers = #tpu.dot_dimension_numbers<[1], [0], [0], [1], [0, 0, 1, 1], [], []>} : vector<8x8xbf16>, vector<8x8xbf16>, vector<8x8xf32> -> vector<8x8xf32>
    %176 = vector.extract_strided_slice %152 {offsets = [8, 0], sizes = [8, 8], strides = [1, 1]} : vector<16x8xbf16> to vector<8x8xbf16>
    %177 = vector.extract_strided_slice %153 {offsets = [8, 0], sizes = [8, 8], strides = [1, 1]} : vector<16x8xbf16> to vector<8x8xbf16>
    %cst_52 = arith.constant dense<0.000000e+00> : vector<8x8xf32>
    %178 = tpu.matmul %176, %177, %cst_52 {dimension_numbers = #tpu.dot_dimension_numbers<[1], [1], [0], [0], [0, 0, 1, 0], [], []>} : vector<8x8xbf16>, vector<8x8xbf16>, vector<8x8xf32> -> vector<8x8xf32>
    %cst_53 = arith.constant 0.353553385 : f32
    %179 = vector.broadcast %cst_53 : f32 to vector<8x8xf32>
    %180 = arith.mulf %178, %179 : vector<8x8xf32>
    %181 = vector.extract_strided_slice %44 {offsets = [1, 0], sizes = [1, 8], strides = [1, 1]} : vector<2x8xf32> to vector<1x8xf32>
    %182 = vector.broadcast %181 : vector<1x8xf32> to vector<8x8xf32>
    %183 = arith.addf %180, %182 : vector<8x8xf32>
    %cst_54 = arith.constant dense<0xFF800000> : vector<8xf32>
    %184 = vector.multi_reduction <maximumf>, %183, %cst_54 [1] : vector<8x8xf32> to vector<8xf32>
    %185 = vector.shape_cast %184 : vector<8xf32> to vector<8x1xf32>
    %186 = vector.broadcast %185 : vector<8x1xf32> to vector<8x8xf32>
    %187 = arith.subf %183, %186 : vector<8x8xf32>
    %188 = math.exp %187 : vector<8x8xf32>
    %cst_55 = arith.constant dense<0.000000e+00> : vector<8xf32>
    %189 = vector.multi_reduction <add>, %188, %cst_55 [1] : vector<8x8xf32> to vector<8xf32>
    %190 = vector.shape_cast %189 : vector<8xf32> to vector<8x1xf32>
    %191 = tpu.reciprocal %190 {approx = true} : vector<8x1xf32> -> vector<8x1xf32>
    %192 = vector.broadcast %191 : vector<8x1xf32> to vector<8x8xf32>
    %193 = arith.mulf %188, %192 : vector<8x8xf32>
    %194 = arith.truncf %193 : vector<8x8xf32> to vector<8x8xbf16>
    %195 = vector.extract_strided_slice %154 {offsets = [8, 0], sizes = [8, 8], strides = [1, 1]} : vector<16x8xbf16> to vector<8x8xbf16>
    %cst_56 = arith.constant dense<0.000000e+00> : vector<8x8xf32>
    %196 = tpu.matmul %194, %195, %cst_56 {dimension_numbers = #tpu.dot_dimension_numbers<[1], [0], [0], [1], [0, 0, 1, 1], [], []>} : vector<8x8xbf16>, vector<8x8xbf16>, vector<8x8xf32> -> vector<8x8xf32>
    %197 = tpu.concatenate %175, %196 in 0 : vector<8x8xf32>, vector<8x8xf32> -> vector<16x8xf32>
    %198 = vector.extract_strided_slice %55 {offsets = [0, 24], sizes = [16, 8], strides = [1, 1]} : vector<16x32xbf16> to vector<16x8xbf16>
    %199 = vector.extract_strided_slice %57 {offsets = [0, 24], sizes = [16, 8], strides = [1, 1]} : vector<16x32xbf16> to vector<16x8xbf16>
    %200 = vector.extract_strided_slice %59 {offsets = [0, 24], sizes = [16, 8], strides = [1, 1]} : vector<16x32xbf16> to vector<16x8xbf16>
    %201 = vector.extract_strided_slice %198 {offsets = [0, 0], sizes = [8, 8], strides = [1, 1]} : vector<16x8xbf16> to vector<8x8xbf16>
    %202 = vector.extract_strided_slice %199 {offsets = [0, 0], sizes = [8, 8], strides = [1, 1]} : vector<16x8xbf16> to vector<8x8xbf16>
    %cst_57 = arith.constant dense<0.000000e+00> : vector<8x8xf32>
    %203 = tpu.matmul %201, %202, %cst_57 {dimension_numbers = #tpu.dot_dimension_numbers<[1], [1], [0], [0], [0, 0, 1, 0], [], []>} : vector<8x8xbf16>, vector<8x8xbf16>, vector<8x8xf32> -> vector<8x8xf32>
    %cst_58 = arith.constant 0.353553385 : f32
    %204 = vector.broadcast %cst_58 : f32 to vector<8x8xf32>
    %205 = arith.mulf %203, %204 : vector<8x8xf32>
    %206 = vector.extract_strided_slice %44 {offsets = [0, 0], sizes = [1, 8], strides = [1, 1]} : vector<2x8xf32> to vector<1x8xf32>
    %207 = vector.broadcast %206 : vector<1x8xf32> to vector<8x8xf32>
    %208 = arith.addf %205, %207 : vector<8x8xf32>
    %cst_59 = arith.constant dense<0xFF800000> : vector<8xf32>
    %209 = vector.multi_reduction <maximumf>, %208, %cst_59 [1] : vector<8x8xf32> to vector<8xf32>
    %210 = vector.shape_cast %209 : vector<8xf32> to vector<8x1xf32>
    %211 = vector.broadcast %210 : vector<8x1xf32> to vector<8x8xf32>
    %212 = arith.subf %208, %211 : vector<8x8xf32>
    %213 = math.exp %212 : vector<8x8xf32>
    %cst_60 = arith.constant dense<0.000000e+00> : vector<8xf32>
    %214 = vector.multi_reduction <add>, %213, %cst_60 [1] : vector<8x8xf32> to vector<8xf32>
    %215 = vector.shape_cast %214 : vector<8xf32> to vector<8x1xf32>
    %216 = tpu.reciprocal %215 {approx = true} : vector<8x1xf32> -> vector<8x1xf32>
    %217 = vector.broadcast %216 : vector<8x1xf32> to vector<8x8xf32>
    %218 = arith.mulf %213, %217 : vector<8x8xf32>
    %219 = arith.truncf %218 : vector<8x8xf32> to vector<8x8xbf16>
    %220 = vector.extract_strided_slice %200 {offsets = [0, 0], sizes = [8, 8], strides = [1, 1]} : vector<16x8xbf16> to vector<8x8xbf16>
    %cst_61 = arith.constant dense<0.000000e+00> : vector<8x8xf32>
    %221 = tpu.matmul %219, %220, %cst_61 {dimension_numbers = #tpu.dot_dimension_numbers<[1], [0], [0], [1], [0, 0, 1, 1], [], []>} : vector<8x8xbf16>, vector<8x8xbf16>, vector<8x8xf32> -> vector<8x8xf32>
    %222 = vector.extract_strided_slice %198 {offsets = [8, 0], sizes = [8, 8], strides = [1, 1]} : vector<16x8xbf16> to vector<8x8xbf16>
    %223 = vector.extract_strided_slice %199 {offsets = [8, 0], sizes = [8, 8], strides = [1, 1]} : vector<16x8xbf16> to vector<8x8xbf16>
    %cst_62 = arith.constant dense<0.000000e+00> : vector<8x8xf32>
    %224 = tpu.matmul %222, %223, %cst_62 {dimension_numbers = #tpu.dot_dimension_numbers<[1], [1], [0], [0], [0, 0, 1, 0], [], []>} : vector<8x8xbf16>, vector<8x8xbf16>, vector<8x8xf32> -> vector<8x8xf32>
    %cst_63 = arith.constant 0.353553385 : f32
    %225 = vector.broadcast %cst_63 : f32 to vector<8x8xf32>
    %226 = arith.mulf %224, %225 : vector<8x8xf32>
    %227 = vector.extract_strided_slice %44 {offsets = [1, 0], sizes = [1, 8], strides = [1, 1]} : vector<2x8xf32> to vector<1x8xf32>
    %228 = vector.broadcast %227 : vector<1x8xf32> to vector<8x8xf32>
    %229 = arith.addf %226, %228 : vector<8x8xf32>
    %cst_64 = arith.constant dense<0xFF800000> : vector<8xf32>
    %230 = vector.multi_reduction <maximumf>, %229, %cst_64 [1] : vector<8x8xf32> to vector<8xf32>
    %231 = vector.shape_cast %230 : vector<8xf32> to vector<8x1xf32>
    %232 = vector.broadcast %231 : vector<8x1xf32> to vector<8x8xf32>
    %233 = arith.subf %229, %232 : vector<8x8xf32>
    %234 = math.exp %233 : vector<8x8xf32>
    %cst_65 = arith.constant dense<0.000000e+00> : vector<8xf32>
    %235 = vector.multi_reduction <add>, %234, %cst_65 [1] : vector<8x8xf32> to vector<8xf32>
    %236 = vector.shape_cast %235 : vector<8xf32> to vector<8x1xf32>
    %237 = tpu.reciprocal %236 {approx = true} : vector<8x1xf32> -> vector<8x1xf32>
    %238 = vector.broadcast %237 : vector<8x1xf32> to vector<8x8xf32>
    %239 = arith.mulf %234, %238 : vector<8x8xf32>
    %240 = arith.truncf %239 : vector<8x8xf32> to vector<8x8xbf16>
    %241 = vector.extract_strided_slice %200 {offsets = [8, 0], sizes = [8, 8], strides = [1, 1]} : vector<16x8xbf16> to vector<8x8xbf16>
    %cst_66 = arith.constant dense<0.000000e+00> : vector<8x8xf32>
    %242 = tpu.matmul %240, %241, %cst_66 {dimension_numbers = #tpu.dot_dimension_numbers<[1], [0], [0], [1], [0, 0, 1, 1], [], []>} : vector<8x8xbf16>, vector<8x8xbf16>, vector<8x8xf32> -> vector<8x8xf32>
    %243 = tpu.concatenate %221, %242 in 0 : vector<8x8xf32>, vector<8x8xf32> -> vector<16x8xf32>
    %244 = tpu.concatenate %105, %151, %197, %243 in 1 : vector<16x8xf32>, vector<16x8xf32>, vector<16x8xf32>, vector<16x8xf32> -> vector<16x32xf32>
    %245 = arith.truncf %244 : vector<16x32xf32> to vector<16x32xbf16>
    %c0_67 = arith.constant 0 : index
    %c0_68 = arith.constant 0 : index
    %c0_69 = arith.constant 0 : index
    %246 = vector.load %arg9[%c0_67, %c0_68, %c0_69] : memref<2x32x32xf32, #tpu.memory_space<vmem>>, vector<1x32x32xf32>
    %247 = vector.shape_cast %246 : vector<1x32x32xf32> to vector<32x32xf32>
    %248 = arith.truncf %247 : vector<32x32xf32> to vector<32x32xbf16>
    %cst_70 = arith.constant dense<0.000000e+00> : vector<16x32xf32>
    %249 = tpu.matmul %245, %248, %cst_70 {dimension_numbers = #tpu.dot_dimension_numbers<[1], [0], [0], [1], [0, 0, 1, 1], [], []>} : vector<16x32xbf16>, vector<32x32xbf16>, vector<16x32xf32> -> vector<16x32xf32>
    %c0_71 = arith.constant 0 : index
    %c0_72 = arith.constant 0 : index
    %c0_73 = arith.constant 0 : index
    %250 = vector.load %arg10[%c0_71, %c0_72, %c0_73] : memref<2x1x32xf32, #tpu.memory_space<vmem>>, vector<1x1x32xf32>
    %251 = vector.shape_cast %250 : vector<1x1x32xf32> to vector<1x32xf32>
    %252 = vector.broadcast %251 : vector<1x32xf32> to vector<16x32xf32>
    %253 = arith.addf %249, %252 : vector<16x32xf32>
    %254 = arith.addf %39, %253 : vector<16x32xf32>
    %c0_74 = arith.constant 0 : index
    %c0_75 = arith.constant 0 : index
    %c0_76 = arith.constant 0 : index
    %255 = vector.load %arg11[%c0_74, %c0_75, %c0_76] : memref<2x1x32xf32, #tpu.memory_space<vmem>>, vector<1x1x32xf32>
    %256 = vector.shape_cast %255 : vector<1x1x32xf32> to vector<1x32xf32>
    %c0_77 = arith.constant 0 : index
    %c0_78 = arith.constant 0 : index
    %c0_79 = arith.constant 0 : index
    %257 = vector.load %arg12[%c0_77, %c0_78, %c0_79] : memref<2x1x32xf32, #tpu.memory_space<vmem>>, vector<1x1x32xf32>
    %258 = vector.shape_cast %257 : vector<1x1x32xf32> to vector<1x32xf32>
    %cst_80 = arith.constant dense<0.000000e+00> : vector<16xf32>
    %259 = vector.multi_reduction <add>, %254, %cst_80 [1] : vector<16x32xf32> to vector<16xf32>
    %260 = vector.shape_cast %259 : vector<16xf32> to vector<16x1xf32>
    %cst_81 = arith.constant 3.200000e+01 : f32
    %261 = vector.broadcast %cst_81 : f32 to vector<16x1xf32>
    %262 = arith.divf %260, %261 : vector<16x1xf32>
    %263 = vector.broadcast %262 : vector<16x1xf32> to vector<16x32xf32>
    %264 = arith.subf %254, %263 : vector<16x32xf32>
    %265 = arith.mulf %264, %264 : vector<16x32xf32>
    %cst_82 = arith.constant dense<0.000000e+00> : vector<16xf32>
    %266 = vector.multi_reduction <add>, %265, %cst_82 [1] : vector<16x32xf32> to vector<16xf32>
    %267 = vector.shape_cast %266 : vector<16xf32> to vector<16x1xf32>
    %cst_83 = arith.constant 3.200000e+01 : f32
    %268 = vector.broadcast %cst_83 : f32 to vector<16x1xf32>
    %269 = arith.divf %267, %268 : vector<16x1xf32>
    %270 = vector.broadcast %262 : vector<16x1xf32> to vector<16x32xf32>
    %271 = arith.subf %254, %270 : vector<16x32xf32>
    %cst_84 = arith.constant 9.99999996E-13 : f32
    %272 = vector.broadcast %cst_84 : f32 to vector<16x1xf32>
    %273 = arith.addf %269, %272 : vector<16x1xf32>
    %274 = math.rsqrt %273 : vector<16x1xf32>
    %275 = vector.broadcast %274 : vector<16x1xf32> to vector<16x32xf32>
    %276 = arith.mulf %271, %275 : vector<16x32xf32>
    %277 = vector.broadcast %256 : vector<1x32xf32> to vector<16x32xf32>
    %278 = arith.mulf %276, %277 : vector<16x32xf32>
    %279 = vector.broadcast %258 : vector<1x32xf32> to vector<16x32xf32>
    %280 = arith.addf %278, %279 : vector<16x32xf32>
    %281 = arith.truncf %280 : vector<16x32xf32> to vector<16x32xbf16>
    %c0_85 = arith.constant 0 : index
    %c0_86 = arith.constant 0 : index
    %c0_87 = arith.constant 0 : index
    %282 = vector.load %arg13[%c0_85, %c0_86, %c0_87] : memref<2x32x64xf32, #tpu.memory_space<vmem>>, vector<1x32x64xf32>
    %283 = vector.shape_cast %282 : vector<1x32x64xf32> to vector<32x64xf32>
    %284 = arith.truncf %283 : vector<32x64xf32> to vector<32x64xbf16>
    %cst_88 = arith.constant dense<0.000000e+00> : vector<16x64xf32>
    %285 = tpu.matmul %281, %284, %cst_88 {dimension_numbers = #tpu.dot_dimension_numbers<[1], [0], [0], [1], [0, 0, 1, 1], [], []>} : vector<16x32xbf16>, vector<32x64xbf16>, vector<16x64xf32> -> vector<16x64xf32>
    %c0_89 = arith.constant 0 : index
    %c0_90 = arith.constant 0 : index
    %c0_91 = arith.constant 0 : index
    %286 = vector.load %arg14[%c0_89, %c0_90, %c0_91] : memref<2x1x64xf32, #tpu.memory_space<vmem>>, vector<1x1x64xf32>
    %287 = vector.shape_cast %286 : vector<1x1x64xf32> to vector<1x64xf32>
    %288 = vector.broadcast %287 : vector<1x64xf32> to vector<16x64xf32>
    %289 = arith.addf %285, %288 : vector<16x64xf32>
    %cst_92 = arith.constant 5.000000e-01 : f32
    %290 = vector.broadcast %cst_92 : f32 to vector<16x64xf32>
    %291 = arith.mulf %290, %289 : vector<16x64xf32>
    %cst_93 = arith.constant 0.707106769 : f32
    %292 = vector.broadcast %cst_93 : f32 to vector<16x64xf32>
    %293 = arith.mulf %289, %292 : vector<16x64xf32>
    %294 = math.erf %293 : vector<16x64xf32>
    %cst_94 = arith.constant 1.000000e+00 : f32
    %295 = vector.broadcast %cst_94 : f32 to vector<16x64xf32>
    %296 = arith.addf %295, %294 : vector<16x64xf32>
    %297 = arith.mulf %291, %296 : vector<16x64xf32>
    %298 = arith.truncf %297 : vector<16x64xf32> to vector<16x64xbf16>
    %c0_95 = arith.constant 0 : index
    %c0_96 = arith.constant 0 : index
    %c0_97 = arith.constant 0 : index
    %299 = vector.load %arg15[%c0_95, %c0_96, %c0_97] : memref<2x64x32xf32, #tpu.memory_space<vmem>>, vector<1x64x32xf32>
    %300 = vector.shape_cast %299 : vector<1x64x32xf32> to vector<64x32xf32>
    %301 = arith.truncf %300 : vector<64x32xf32> to vector<64x32xbf16>
    %cst_98 = arith.constant dense<0.000000e+00> : vector<16x32xf32>
    %302 = tpu.matmul %298, %301, %cst_98 {dimension_numbers = #tpu.dot_dimension_numbers<[1], [0], [0], [1], [0, 0, 1, 1], [], []>} : vector<16x64xbf16>, vector<64x32xbf16>, vector<16x32xf32> -> vector<16x32xf32>
    %c0_99 = arith.constant 0 : index
    %c0_100 = arith.constant 0 : index
    %c0_101 = arith.constant 0 : index
    %303 = vector.load %arg16[%c0_99, %c0_100, %c0_101] : memref<2x1x32xf32, #tpu.memory_space<vmem>>, vector<1x1x32xf32>
    %304 = vector.shape_cast %303 : vector<1x1x32xf32> to vector<1x32xf32>
    %305 = vector.broadcast %304 : vector<1x32xf32> to vector<16x32xf32>
    %306 = arith.addf %302, %305 : vector<16x32xf32>
    %307 = arith.addf %280, %306 : vector<16x32xf32>
    %c0_102 = arith.constant 0 : index
    %c0_103 = arith.constant 0 : index
    %c0_104 = arith.constant 0 : index
    %308 = vector.load %arg17[%c0_102, %c0_103, %c0_104] : memref<2x1x32xf32, #tpu.memory_space<vmem>>, vector<1x1x32xf32>
    %309 = vector.shape_cast %308 : vector<1x1x32xf32> to vector<1x32xf32>
    %c0_105 = arith.constant 0 : index
    %c0_106 = arith.constant 0 : index
    %c0_107 = arith.constant 0 : index
    %310 = vector.load %arg18[%c0_105, %c0_106, %c0_107] : memref<2x1x32xf32, #tpu.memory_space<vmem>>, vector<1x1x32xf32>
    %311 = vector.shape_cast %310 : vector<1x1x32xf32> to vector<1x32xf32>
    %cst_108 = arith.constant dense<0.000000e+00> : vector<16xf32>
    %312 = vector.multi_reduction <add>, %307, %cst_108 [1] : vector<16x32xf32> to vector<16xf32>
    %313 = vector.shape_cast %312 : vector<16xf32> to vector<16x1xf32>
    %cst_109 = arith.constant 3.200000e+01 : f32
    %314 = vector.broadcast %cst_109 : f32 to vector<16x1xf32>
    %315 = arith.divf %313, %314 : vector<16x1xf32>
    %316 = vector.broadcast %315 : vector<16x1xf32> to vector<16x32xf32>
    %317 = arith.subf %307, %316 : vector<16x32xf32>
    %318 = arith.mulf %317, %317 : vector<16x32xf32>
    %cst_110 = arith.constant dense<0.000000e+00> : vector<16xf32>
    %319 = vector.multi_reduction <add>, %318, %cst_110 [1] : vector<16x32xf32> to vector<16xf32>
    %320 = vector.shape_cast %319 : vector<16xf32> to vector<16x1xf32>
    %cst_111 = arith.constant 3.200000e+01 : f32
    %321 = vector.broadcast %cst_111 : f32 to vector<16x1xf32>
    %322 = arith.divf %320, %321 : vector<16x1xf32>
    %323 = vector.broadcast %315 : vector<16x1xf32> to vector<16x32xf32>
    %324 = arith.subf %307, %323 : vector<16x32xf32>
    %cst_112 = arith.constant 9.99999996E-13 : f32
    %325 = vector.broadcast %cst_112 : f32 to vector<16x1xf32>
    %326 = arith.addf %322, %325 : vector<16x1xf32>
    %327 = math.rsqrt %326 : vector<16x1xf32>
    %328 = vector.broadcast %327 : vector<16x1xf32> to vector<16x32xf32>
    %329 = arith.mulf %324, %328 : vector<16x32xf32>
    %330 = vector.broadcast %309 : vector<1x32xf32> to vector<16x32xf32>
    %331 = arith.mulf %329, %330 : vector<16x32xf32>
    %332 = vector.broadcast %311 : vector<1x32xf32> to vector<16x32xf32>
    %333 = arith.addf %331, %332 : vector<16x32xf32>
    %334 = arith.truncf %333 : vector<16x32xf32> to vector<16x32xbf16>
    %c1 = arith.constant 1 : index
    %c0_113 = arith.constant 0 : index
    %c0_114 = arith.constant 0 : index
    %335 = vector.load %arg7[%c1, %c0_113, %c0_114] : memref<2x32x96xf32, #tpu.memory_space<vmem>>, vector<1x32x96xf32>
    %336 = vector.shape_cast %335 : vector<1x32x96xf32> to vector<32x96xf32>
    %337 = arith.truncf %336 : vector<32x96xf32> to vector<32x96xbf16>
    %cst_115 = arith.constant dense<0.000000e+00> : vector<16x96xf32>
    %338 = tpu.matmul %334, %337, %cst_115 {dimension_numbers = #tpu.dot_dimension_numbers<[1], [0], [0], [1], [0, 0, 1, 1], [], []>} : vector<16x32xbf16>, vector<32x96xbf16>, vector<16x96xf32> -> vector<16x96xf32>
    %c1_116 = arith.constant 1 : index
    %c0_117 = arith.constant 0 : index
    %c0_118 = arith.constant 0 : index
    %339 = vector.load %arg8[%c1_116, %c0_117, %c0_118] : memref<2x1x96xf32, #tpu.memory_space<vmem>>, vector<1x1x96xf32>
    %340 = vector.shape_cast %339 : vector<1x1x96xf32> to vector<1x96xf32>
    %341 = vector.broadcast %340 : vector<1x96xf32> to vector<16x96xf32>
    %342 = arith.addf %338, %341 : vector<16x96xf32>
    %343 = vector.extract_strided_slice %342 {offsets = [0, 0], sizes = [16, 32], strides = [1, 1]} : vector<16x96xf32> to vector<16x32xf32>
    %344 = arith.truncf %343 : vector<16x32xf32> to vector<16x32xbf16>
    %345 = vector.extract_strided_slice %342 {offsets = [0, 32], sizes = [16, 32], strides = [1, 1]} : vector<16x96xf32> to vector<16x32xf32>
    %346 = arith.truncf %345 : vector<16x32xf32> to vector<16x32xbf16>
    %347 = vector.extract_strided_slice %342 {offsets = [0, 64], sizes = [16, 32], strides = [1, 1]} : vector<16x96xf32> to vector<16x32xf32>
    %348 = arith.truncf %347 : vector<16x32xf32> to vector<16x32xbf16>
    %349 = vector.extract_strided_slice %344 {offsets = [0, 0], sizes = [16, 8], strides = [1, 1]} : vector<16x32xbf16> to vector<16x8xbf16>
    %350 = vector.extract_strided_slice %346 {offsets = [0, 0], sizes = [16, 8], strides = [1, 1]} : vector<16x32xbf16> to vector<16x8xbf16>
    %351 = vector.extract_strided_slice %348 {offsets = [0, 0], sizes = [16, 8], strides = [1, 1]} : vector<16x32xbf16> to vector<16x8xbf16>
    %352 = vector.extract_strided_slice %349 {offsets = [0, 0], sizes = [8, 8], strides = [1, 1]} : vector<16x8xbf16> to vector<8x8xbf16>
    %353 = vector.extract_strided_slice %350 {offsets = [0, 0], sizes = [8, 8], strides = [1, 1]} : vector<16x8xbf16> to vector<8x8xbf16>
    %cst_119 = arith.constant dense<0.000000e+00> : vector<8x8xf32>
    %354 = tpu.matmul %352, %353, %cst_119 {dimension_numbers = #tpu.dot_dimension_numbers<[1], [1], [0], [0], [0, 0, 1, 0], [], []>} : vector<8x8xbf16>, vector<8x8xbf16>, vector<8x8xf32> -> vector<8x8xf32>
    %cst_120 = arith.constant 0.353553385 : f32
    %355 = vector.broadcast %cst_120 : f32 to vector<8x8xf32>
    %356 = arith.mulf %354, %355 : vector<8x8xf32>
    %357 = vector.extract_strided_slice %44 {offsets = [0, 0], sizes = [1, 8], strides = [1, 1]} : vector<2x8xf32> to vector<1x8xf32>
    %358 = vector.broadcast %357 : vector<1x8xf32> to vector<8x8xf32>
    %359 = arith.addf %356, %358 : vector<8x8xf32>
    %cst_121 = arith.constant dense<0xFF800000> : vector<8xf32>
    %360 = vector.multi_reduction <maximumf>, %359, %cst_121 [1] : vector<8x8xf32> to vector<8xf32>
    %361 = vector.shape_cast %360 : vector<8xf32> to vector<8x1xf32>
    %362 = vector.broadcast %361 : vector<8x1xf32> to vector<8x8xf32>
    %363 = arith.subf %359, %362 : vector<8x8xf32>
    %364 = math.exp %363 : vector<8x8xf32>
    %cst_122 = arith.constant dense<0.000000e+00> : vector<8xf32>
    %365 = vector.multi_reduction <add>, %364, %cst_122 [1] : vector<8x8xf32> to vector<8xf32>
    %366 = vector.shape_cast %365 : vector<8xf32> to vector<8x1xf32>
    %367 = tpu.reciprocal %366 {approx = true} : vector<8x1xf32> -> vector<8x1xf32>
    %368 = vector.broadcast %367 : vector<8x1xf32> to vector<8x8xf32>
    %369 = arith.mulf %364, %368 : vector<8x8xf32>
    %370 = arith.truncf %369 : vector<8x8xf32> to vector<8x8xbf16>
    %371 = vector.extract_strided_slice %351 {offsets = [0, 0], sizes = [8, 8], strides = [1, 1]} : vector<16x8xbf16> to vector<8x8xbf16>
    %cst_123 = arith.constant dense<0.000000e+00> : vector<8x8xf32>
    %372 = tpu.matmul %370, %371, %cst_123 {dimension_numbers = #tpu.dot_dimension_numbers<[1], [0], [0], [1], [0, 0, 1, 1], [], []>} : vector<8x8xbf16>, vector<8x8xbf16>, vector<8x8xf32> -> vector<8x8xf32>
    %373 = vector.extract_strided_slice %349 {offsets = [8, 0], sizes = [8, 8], strides = [1, 1]} : vector<16x8xbf16> to vector<8x8xbf16>
    %374 = vector.extract_strided_slice %350 {offsets = [8, 0], sizes = [8, 8], strides = [1, 1]} : vector<16x8xbf16> to vector<8x8xbf16>
    %cst_124 = arith.constant dense<0.000000e+00> : vector<8x8xf32>
    %375 = tpu.matmul %373, %374, %cst_124 {dimension_numbers = #tpu.dot_dimension_numbers<[1], [1], [0], [0], [0, 0, 1, 0], [], []>} : vector<8x8xbf16>, vector<8x8xbf16>, vector<8x8xf32> -> vector<8x8xf32>
    %cst_125 = arith.constant 0.353553385 : f32
    %376 = vector.broadcast %cst_125 : f32 to vector<8x8xf32>
    %377 = arith.mulf %375, %376 : vector<8x8xf32>
    %378 = vector.extract_strided_slice %44 {offsets = [1, 0], sizes = [1, 8], strides = [1, 1]} : vector<2x8xf32> to vector<1x8xf32>
    %379 = vector.broadcast %378 : vector<1x8xf32> to vector<8x8xf32>
    %380 = arith.addf %377, %379 : vector<8x8xf32>
    %cst_126 = arith.constant dense<0xFF800000> : vector<8xf32>
    %381 = vector.multi_reduction <maximumf>, %380, %cst_126 [1] : vector<8x8xf32> to vector<8xf32>
    %382 = vector.shape_cast %381 : vector<8xf32> to vector<8x1xf32>
    %383 = vector.broadcast %382 : vector<8x1xf32> to vector<8x8xf32>
    %384 = arith.subf %380, %383 : vector<8x8xf32>
    %385 = math.exp %384 : vector<8x8xf32>
    %cst_127 = arith.constant dense<0.000000e+00> : vector<8xf32>
    %386 = vector.multi_reduction <add>, %385, %cst_127 [1] : vector<8x8xf32> to vector<8xf32>
    %387 = vector.shape_cast %386 : vector<8xf32> to vector<8x1xf32>
    %388 = tpu.reciprocal %387 {approx = true} : vector<8x1xf32> -> vector<8x1xf32>
    %389 = vector.broadcast %388 : vector<8x1xf32> to vector<8x8xf32>
    %390 = arith.mulf %385, %389 : vector<8x8xf32>
    %391 = arith.truncf %390 : vector<8x8xf32> to vector<8x8xbf16>
    %392 = vector.extract_strided_slice %351 {offsets = [8, 0], sizes = [8, 8], strides = [1, 1]} : vector<16x8xbf16> to vector<8x8xbf16>
    %cst_128 = arith.constant dense<0.000000e+00> : vector<8x8xf32>
    %393 = tpu.matmul %391, %392, %cst_128 {dimension_numbers = #tpu.dot_dimension_numbers<[1], [0], [0], [1], [0, 0, 1, 1], [], []>} : vector<8x8xbf16>, vector<8x8xbf16>, vector<8x8xf32> -> vector<8x8xf32>
    %394 = tpu.concatenate %372, %393 in 0 : vector<8x8xf32>, vector<8x8xf32> -> vector<16x8xf32>
    %395 = vector.extract_strided_slice %344 {offsets = [0, 8], sizes = [16, 8], strides = [1, 1]} : vector<16x32xbf16> to vector<16x8xbf16>
    %396 = vector.extract_strided_slice %346 {offsets = [0, 8], sizes = [16, 8], strides = [1, 1]} : vector<16x32xbf16> to vector<16x8xbf16>
    %397 = vector.extract_strided_slice %348 {offsets = [0, 8], sizes = [16, 8], strides = [1, 1]} : vector<16x32xbf16> to vector<16x8xbf16>
    %398 = vector.extract_strided_slice %395 {offsets = [0, 0], sizes = [8, 8], strides = [1, 1]} : vector<16x8xbf16> to vector<8x8xbf16>
    %399 = vector.extract_strided_slice %396 {offsets = [0, 0], sizes = [8, 8], strides = [1, 1]} : vector<16x8xbf16> to vector<8x8xbf16>
    %cst_129 = arith.constant dense<0.000000e+00> : vector<8x8xf32>
    %400 = tpu.matmul %398, %399, %cst_129 {dimension_numbers = #tpu.dot_dimension_numbers<[1], [1], [0], [0], [0, 0, 1, 0], [], []>} : vector<8x8xbf16>, vector<8x8xbf16>, vector<8x8xf32> -> vector<8x8xf32>
    %cst_130 = arith.constant 0.353553385 : f32
    %401 = vector.broadcast %cst_130 : f32 to vector<8x8xf32>
    %402 = arith.mulf %400, %401 : vector<8x8xf32>
    %403 = vector.extract_strided_slice %44 {offsets = [0, 0], sizes = [1, 8], strides = [1, 1]} : vector<2x8xf32> to vector<1x8xf32>
    %404 = vector.broadcast %403 : vector<1x8xf32> to vector<8x8xf32>
    %405 = arith.addf %402, %404 : vector<8x8xf32>
    %cst_131 = arith.constant dense<0xFF800000> : vector<8xf32>
    %406 = vector.multi_reduction <maximumf>, %405, %cst_131 [1] : vector<8x8xf32> to vector<8xf32>
    %407 = vector.shape_cast %406 : vector<8xf32> to vector<8x1xf32>
    %408 = vector.broadcast %407 : vector<8x1xf32> to vector<8x8xf32>
    %409 = arith.subf %405, %408 : vector<8x8xf32>
    %410 = math.exp %409 : vector<8x8xf32>
    %cst_132 = arith.constant dense<0.000000e+00> : vector<8xf32>
    %411 = vector.multi_reduction <add>, %410, %cst_132 [1] : vector<8x8xf32> to vector<8xf32>
    %412 = vector.shape_cast %411 : vector<8xf32> to vector<8x1xf32>
    %413 = tpu.reciprocal %412 {approx = true} : vector<8x1xf32> -> vector<8x1xf32>
    %414 = vector.broadcast %413 : vector<8x1xf32> to vector<8x8xf32>
    %415 = arith.mulf %410, %414 : vector<8x8xf32>
    %416 = arith.truncf %415 : vector<8x8xf32> to vector<8x8xbf16>
    %417 = vector.extract_strided_slice %397 {offsets = [0, 0], sizes = [8, 8], strides = [1, 1]} : vector<16x8xbf16> to vector<8x8xbf16>
    %cst_133 = arith.constant dense<0.000000e+00> : vector<8x8xf32>
    %418 = tpu.matmul %416, %417, %cst_133 {dimension_numbers = #tpu.dot_dimension_numbers<[1], [0], [0], [1], [0, 0, 1, 1], [], []>} : vector<8x8xbf16>, vector<8x8xbf16>, vector<8x8xf32> -> vector<8x8xf32>
    %419 = vector.extract_strided_slice %395 {offsets = [8, 0], sizes = [8, 8], strides = [1, 1]} : vector<16x8xbf16> to vector<8x8xbf16>
    %420 = vector.extract_strided_slice %396 {offsets = [8, 0], sizes = [8, 8], strides = [1, 1]} : vector<16x8xbf16> to vector<8x8xbf16>
    %cst_134 = arith.constant dense<0.000000e+00> : vector<8x8xf32>
    %421 = tpu.matmul %419, %420, %cst_134 {dimension_numbers = #tpu.dot_dimension_numbers<[1], [1], [0], [0], [0, 0, 1, 0], [], []>} : vector<8x8xbf16>, vector<8x8xbf16>, vector<8x8xf32> -> vector<8x8xf32>
    %cst_135 = arith.constant 0.353553385 : f32
    %422 = vector.broadcast %cst_135 : f32 to vector<8x8xf32>
    %423 = arith.mulf %421, %422 : vector<8x8xf32>
    %424 = vector.extract_strided_slice %44 {offsets = [1, 0], sizes = [1, 8], strides = [1, 1]} : vector<2x8xf32> to vector<1x8xf32>
    %425 = vector.broadcast %424 : vector<1x8xf32> to vector<8x8xf32>
    %426 = arith.addf %423, %425 : vector<8x8xf32>
    %cst_136 = arith.constant dense<0xFF800000> : vector<8xf32>
    %427 = vector.multi_reduction <maximumf>, %426, %cst_136 [1] : vector<8x8xf32> to vector<8xf32>
    %428 = vector.shape_cast %427 : vector<8xf32> to vector<8x1xf32>
    %429 = vector.broadcast %428 : vector<8x1xf32> to vector<8x8xf32>
    %430 = arith.subf %426, %429 : vector<8x8xf32>
    %431 = math.exp %430 : vector<8x8xf32>
    %cst_137 = arith.constant dense<0.000000e+00> : vector<8xf32>
    %432 = vector.multi_reduction <add>, %431, %cst_137 [1] : vector<8x8xf32> to vector<8xf32>
    %433 = vector.shape_cast %432 : vector<8xf32> to vector<8x1xf32>
    %434 = tpu.reciprocal %433 {approx = true} : vector<8x1xf32> -> vector<8x1xf32>
    %435 = vector.broadcast %434 : vector<8x1xf32> to vector<8x8xf32>
    %436 = arith.mulf %431, %435 : vector<8x8xf32>
    %437 = arith.truncf %436 : vector<8x8xf32> to vector<8x8xbf16>
    %438 = vector.extract_strided_slice %397 {offsets = [8, 0], sizes = [8, 8], strides = [1, 1]} : vector<16x8xbf16> to vector<8x8xbf16>
    %cst_138 = arith.constant dense<0.000000e+00> : vector<8x8xf32>
    %439 = tpu.matmul %437, %438, %cst_138 {dimension_numbers = #tpu.dot_dimension_numbers<[1], [0], [0], [1], [0, 0, 1, 1], [], []>} : vector<8x8xbf16>, vector<8x8xbf16>, vector<8x8xf32> -> vector<8x8xf32>
    %440 = tpu.concatenate %418, %439 in 0 : vector<8x8xf32>, vector<8x8xf32> -> vector<16x8xf32>
    %441 = vector.extract_strided_slice %344 {offsets = [0, 16], sizes = [16, 8], strides = [1, 1]} : vector<16x32xbf16> to vector<16x8xbf16>
    %442 = vector.extract_strided_slice %346 {offsets = [0, 16], sizes = [16, 8], strides = [1, 1]} : vector<16x32xbf16> to vector<16x8xbf16>
    %443 = vector.extract_strided_slice %348 {offsets = [0, 16], sizes = [16, 8], strides = [1, 1]} : vector<16x32xbf16> to vector<16x8xbf16>
    %444 = vector.extract_strided_slice %441 {offsets = [0, 0], sizes = [8, 8], strides = [1, 1]} : vector<16x8xbf16> to vector<8x8xbf16>
    %445 = vector.extract_strided_slice %442 {offsets = [0, 0], sizes = [8, 8], strides = [1, 1]} : vector<16x8xbf16> to vector<8x8xbf16>
    %cst_139 = arith.constant dense<0.000000e+00> : vector<8x8xf32>
    %446 = tpu.matmul %444, %445, %cst_139 {dimension_numbers = #tpu.dot_dimension_numbers<[1], [1], [0], [0], [0, 0, 1, 0], [], []>} : vector<8x8xbf16>, vector<8x8xbf16>, vector<8x8xf32> -> vector<8x8xf32>
    %cst_140 = arith.constant 0.353553385 : f32
    %447 = vector.broadcast %cst_140 : f32 to vector<8x8xf32>
    %448 = arith.mulf %446, %447 : vector<8x8xf32>
    %449 = vector.extract_strided_slice %44 {offsets = [0, 0], sizes = [1, 8], strides = [1, 1]} : vector<2x8xf32> to vector<1x8xf32>
    %450 = vector.broadcast %449 : vector<1x8xf32> to vector<8x8xf32>
    %451 = arith.addf %448, %450 : vector<8x8xf32>
    %cst_141 = arith.constant dense<0xFF800000> : vector<8xf32>
    %452 = vector.multi_reduction <maximumf>, %451, %cst_141 [1] : vector<8x8xf32> to vector<8xf32>
    %453 = vector.shape_cast %452 : vector<8xf32> to vector<8x1xf32>
    %454 = vector.broadcast %453 : vector<8x1xf32> to vector<8x8xf32>
    %455 = arith.subf %451, %454 : vector<8x8xf32>
    %456 = math.exp %455 : vector<8x8xf32>
    %cst_142 = arith.constant dense<0.000000e+00> : vector<8xf32>
    %457 = vector.multi_reduction <add>, %456, %cst_142 [1] : vector<8x8xf32> to vector<8xf32>
    %458 = vector.shape_cast %457 : vector<8xf32> to vector<8x1xf32>
    %459 = tpu.reciprocal %458 {approx = true} : vector<8x1xf32> -> vector<8x1xf32>
    %460 = vector.broadcast %459 : vector<8x1xf32> to vector<8x8xf32>
    %461 = arith.mulf %456, %460 : vector<8x8xf32>
    %462 = arith.truncf %461 : vector<8x8xf32> to vector<8x8xbf16>
    %463 = vector.extract_strided_slice %443 {offsets = [0, 0], sizes = [8, 8], strides = [1, 1]} : vector<16x8xbf16> to vector<8x8xbf16>
    %cst_143 = arith.constant dense<0.000000e+00> : vector<8x8xf32>
    %464 = tpu.matmul %462, %463, %cst_143 {dimension_numbers = #tpu.dot_dimension_numbers<[1], [0], [0], [1], [0, 0, 1, 1], [], []>} : vector<8x8xbf16>, vector<8x8xbf16>, vector<8x8xf32> -> vector<8x8xf32>
    %465 = vector.extract_strided_slice %441 {offsets = [8, 0], sizes = [8, 8], strides = [1, 1]} : vector<16x8xbf16> to vector<8x8xbf16>
    %466 = vector.extract_strided_slice %442 {offsets = [8, 0], sizes = [8, 8], strides = [1, 1]} : vector<16x8xbf16> to vector<8x8xbf16>
    %cst_144 = arith.constant dense<0.000000e+00> : vector<8x8xf32>
    %467 = tpu.matmul %465, %466, %cst_144 {dimension_numbers = #tpu.dot_dimension_numbers<[1], [1], [0], [0], [0, 0, 1, 0], [], []>} : vector<8x8xbf16>, vector<8x8xbf16>, vector<8x8xf32> -> vector<8x8xf32>
    %cst_145 = arith.constant 0.353553385 : f32
    %468 = vector.broadcast %cst_145 : f32 to vector<8x8xf32>
    %469 = arith.mulf %467, %468 : vector<8x8xf32>
    %470 = vector.extract_strided_slice %44 {offsets = [1, 0], sizes = [1, 8], strides = [1, 1]} : vector<2x8xf32> to vector<1x8xf32>
    %471 = vector.broadcast %470 : vector<1x8xf32> to vector<8x8xf32>
    %472 = arith.addf %469, %471 : vector<8x8xf32>
    %cst_146 = arith.constant dense<0xFF800000> : vector<8xf32>
    %473 = vector.multi_reduction <maximumf>, %472, %cst_146 [1] : vector<8x8xf32> to vector<8xf32>
    %474 = vector.shape_cast %473 : vector<8xf32> to vector<8x1xf32>
    %475 = vector.broadcast %474 : vector<8x1xf32> to vector<8x8xf32>
    %476 = arith.subf %472, %475 : vector<8x8xf32>
    %477 = math.exp %476 : vector<8x8xf32>
    %cst_147 = arith.constant dense<0.000000e+00> : vector<8xf32>
    %478 = vector.multi_reduction <add>, %477, %cst_147 [1] : vector<8x8xf32> to vector<8xf32>
    %479 = vector.shape_cast %478 : vector<8xf32> to vector<8x1xf32>
    %480 = tpu.reciprocal %479 {approx = true} : vector<8x1xf32> -> vector<8x1xf32>
    %481 = vector.broadcast %480 : vector<8x1xf32> to vector<8x8xf32>
    %482 = arith.mulf %477, %481 : vector<8x8xf32>
    %483 = arith.truncf %482 : vector<8x8xf32> to vector<8x8xbf16>
    %484 = vector.extract_strided_slice %443 {offsets = [8, 0], sizes = [8, 8], strides = [1, 1]} : vector<16x8xbf16> to vector<8x8xbf16>
    %cst_148 = arith.constant dense<0.000000e+00> : vector<8x8xf32>
    %485 = tpu.matmul %483, %484, %cst_148 {dimension_numbers = #tpu.dot_dimension_numbers<[1], [0], [0], [1], [0, 0, 1, 1], [], []>} : vector<8x8xbf16>, vector<8x8xbf16>, vector<8x8xf32> -> vector<8x8xf32>
    %486 = tpu.concatenate %464, %485 in 0 : vector<8x8xf32>, vector<8x8xf32> -> vector<16x8xf32>
    %487 = vector.extract_strided_slice %344 {offsets = [0, 24], sizes = [16, 8], strides = [1, 1]} : vector<16x32xbf16> to vector<16x8xbf16>
    %488 = vector.extract_strided_slice %346 {offsets = [0, 24], sizes = [16, 8], strides = [1, 1]} : vector<16x32xbf16> to vector<16x8xbf16>
    %489 = vector.extract_strided_slice %348 {offsets = [0, 24], sizes = [16, 8], strides = [1, 1]} : vector<16x32xbf16> to vector<16x8xbf16>
    %490 = vector.extract_strided_slice %487 {offsets = [0, 0], sizes = [8, 8], strides = [1, 1]} : vector<16x8xbf16> to vector<8x8xbf16>
    %491 = vector.extract_strided_slice %488 {offsets = [0, 0], sizes = [8, 8], strides = [1, 1]} : vector<16x8xbf16> to vector<8x8xbf16>
    %cst_149 = arith.constant dense<0.000000e+00> : vector<8x8xf32>
    %492 = tpu.matmul %490, %491, %cst_149 {dimension_numbers = #tpu.dot_dimension_numbers<[1], [1], [0], [0], [0, 0, 1, 0], [], []>} : vector<8x8xbf16>, vector<8x8xbf16>, vector<8x8xf32> -> vector<8x8xf32>
    %cst_150 = arith.constant 0.353553385 : f32
    %493 = vector.broadcast %cst_150 : f32 to vector<8x8xf32>
    %494 = arith.mulf %492, %493 : vector<8x8xf32>
    %495 = vector.extract_strided_slice %44 {offsets = [0, 0], sizes = [1, 8], strides = [1, 1]} : vector<2x8xf32> to vector<1x8xf32>
    %496 = vector.broadcast %495 : vector<1x8xf32> to vector<8x8xf32>
    %497 = arith.addf %494, %496 : vector<8x8xf32>
    %cst_151 = arith.constant dense<0xFF800000> : vector<8xf32>
    %498 = vector.multi_reduction <maximumf>, %497, %cst_151 [1] : vector<8x8xf32> to vector<8xf32>
    %499 = vector.shape_cast %498 : vector<8xf32> to vector<8x1xf32>
    %500 = vector.broadcast %499 : vector<8x1xf32> to vector<8x8xf32>
    %501 = arith.subf %497, %500 : vector<8x8xf32>
    %502 = math.exp %501 : vector<8x8xf32>
    %cst_152 = arith.constant dense<0.000000e+00> : vector<8xf32>
    %503 = vector.multi_reduction <add>, %502, %cst_152 [1] : vector<8x8xf32> to vector<8xf32>
    %504 = vector.shape_cast %503 : vector<8xf32> to vector<8x1xf32>
    %505 = tpu.reciprocal %504 {approx = true} : vector<8x1xf32> -> vector<8x1xf32>
    %506 = vector.broadcast %505 : vector<8x1xf32> to vector<8x8xf32>
    %507 = arith.mulf %502, %506 : vector<8x8xf32>
    %508 = arith.truncf %507 : vector<8x8xf32> to vector<8x8xbf16>
    %509 = vector.extract_strided_slice %489 {offsets = [0, 0], sizes = [8, 8], strides = [1, 1]} : vector<16x8xbf16> to vector<8x8xbf16>
    %cst_153 = arith.constant dense<0.000000e+00> : vector<8x8xf32>
    %510 = tpu.matmul %508, %509, %cst_153 {dimension_numbers = #tpu.dot_dimension_numbers<[1], [0], [0], [1], [0, 0, 1, 1], [], []>} : vector<8x8xbf16>, vector<8x8xbf16>, vector<8x8xf32> -> vector<8x8xf32>
    %511 = vector.extract_strided_slice %487 {offsets = [8, 0], sizes = [8, 8], strides = [1, 1]} : vector<16x8xbf16> to vector<8x8xbf16>
    %512 = vector.extract_strided_slice %488 {offsets = [8, 0], sizes = [8, 8], strides = [1, 1]} : vector<16x8xbf16> to vector<8x8xbf16>
    %cst_154 = arith.constant dense<0.000000e+00> : vector<8x8xf32>
    %513 = tpu.matmul %511, %512, %cst_154 {dimension_numbers = #tpu.dot_dimension_numbers<[1], [1], [0], [0], [0, 0, 1, 0], [], []>} : vector<8x8xbf16>, vector<8x8xbf16>, vector<8x8xf32> -> vector<8x8xf32>
    %cst_155 = arith.constant 0.353553385 : f32
    %514 = vector.broadcast %cst_155 : f32 to vector<8x8xf32>
    %515 = arith.mulf %513, %514 : vector<8x8xf32>
    %516 = vector.extract_strided_slice %44 {offsets = [1, 0], sizes = [1, 8], strides = [1, 1]} : vector<2x8xf32> to vector<1x8xf32>
    %517 = vector.broadcast %516 : vector<1x8xf32> to vector<8x8xf32>
    %518 = arith.addf %515, %517 : vector<8x8xf32>
    %cst_156 = arith.constant dense<0xFF800000> : vector<8xf32>
    %519 = vector.multi_reduction <maximumf>, %518, %cst_156 [1] : vector<8x8xf32> to vector<8xf32>
    %520 = vector.shape_cast %519 : vector<8xf32> to vector<8x1xf32>
    %521 = vector.broadcast %520 : vector<8x1xf32> to vector<8x8xf32>
    %522 = arith.subf %518, %521 : vector<8x8xf32>
    %523 = math.exp %522 : vector<8x8xf32>
    %cst_157 = arith.constant dense<0.000000e+00> : vector<8xf32>
    %524 = vector.multi_reduction <add>, %523, %cst_157 [1] : vector<8x8xf32> to vector<8xf32>
    %525 = vector.shape_cast %524 : vector<8xf32> to vector<8x1xf32>
    %526 = tpu.reciprocal %525 {approx = true} : vector<8x1xf32> -> vector<8x1xf32>
    %527 = vector.broadcast %526 : vector<8x1xf32> to vector<8x8xf32>
    %528 = arith.mulf %523, %527 : vector<8x8xf32>
    %529 = arith.truncf %528 : vector<8x8xf32> to vector<8x8xbf16>
    %530 = vector.extract_strided_slice %489 {offsets = [8, 0], sizes = [8, 8], strides = [1, 1]} : vector<16x8xbf16> to vector<8x8xbf16>
    %cst_158 = arith.constant dense<0.000000e+00> : vector<8x8xf32>
    %531 = tpu.matmul %529, %530, %cst_158 {dimension_numbers = #tpu.dot_dimension_numbers<[1], [0], [0], [1], [0, 0, 1, 1], [], []>} : vector<8x8xbf16>, vector<8x8xbf16>, vector<8x8xf32> -> vector<8x8xf32>
    %532 = tpu.concatenate %510, %531 in 0 : vector<8x8xf32>, vector<8x8xf32> -> vector<16x8xf32>
    %533 = tpu.concatenate %394, %440, %486, %532 in 1 : vector<16x8xf32>, vector<16x8xf32>, vector<16x8xf32>, vector<16x8xf32> -> vector<16x32xf32>
    %534 = arith.truncf %533 : vector<16x32xf32> to vector<16x32xbf16>
    %c1_159 = arith.constant 1 : index
    %c0_160 = arith.constant 0 : index
    %c0_161 = arith.constant 0 : index
    %535 = vector.load %arg9[%c1_159, %c0_160, %c0_161] : memref<2x32x32xf32, #tpu.memory_space<vmem>>, vector<1x32x32xf32>
    %536 = vector.shape_cast %535 : vector<1x32x32xf32> to vector<32x32xf32>
    %537 = arith.truncf %536 : vector<32x32xf32> to vector<32x32xbf16>
    %cst_162 = arith.constant dense<0.000000e+00> : vector<16x32xf32>
    %538 = tpu.matmul %534, %537, %cst_162 {dimension_numbers = #tpu.dot_dimension_numbers<[1], [0], [0], [1], [0, 0, 1, 1], [], []>} : vector<16x32xbf16>, vector<32x32xbf16>, vector<16x32xf32> -> vector<16x32xf32>
    %c1_163 = arith.constant 1 : index
    %c0_164 = arith.constant 0 : index
    %c0_165 = arith.constant 0 : index
    %539 = vector.load %arg10[%c1_163, %c0_164, %c0_165] : memref<2x1x32xf32, #tpu.memory_space<vmem>>, vector<1x1x32xf32>
    %540 = vector.shape_cast %539 : vector<1x1x32xf32> to vector<1x32xf32>
    %541 = vector.broadcast %540 : vector<1x32xf32> to vector<16x32xf32>
    %542 = arith.addf %538, %541 : vector<16x32xf32>
    %543 = arith.addf %333, %542 : vector<16x32xf32>
    %c1_166 = arith.constant 1 : index
    %c0_167 = arith.constant 0 : index
    %c0_168 = arith.constant 0 : index
    %544 = vector.load %arg11[%c1_166, %c0_167, %c0_168] : memref<2x1x32xf32, #tpu.memory_space<vmem>>, vector<1x1x32xf32>
    %545 = vector.shape_cast %544 : vector<1x1x32xf32> to vector<1x32xf32>
    %c1_169 = arith.constant 1 : index
    %c0_170 = arith.constant 0 : index
    %c0_171 = arith.constant 0 : index
    %546 = vector.load %arg12[%c1_169, %c0_170, %c0_171] : memref<2x1x32xf32, #tpu.memory_space<vmem>>, vector<1x1x32xf32>
    %547 = vector.shape_cast %546 : vector<1x1x32xf32> to vector<1x32xf32>
    %cst_172 = arith.constant dense<0.000000e+00> : vector<16xf32>
    %548 = vector.multi_reduction <add>, %543, %cst_172 [1] : vector<16x32xf32> to vector<16xf32>
    %549 = vector.shape_cast %548 : vector<16xf32> to vector<16x1xf32>
    %cst_173 = arith.constant 3.200000e+01 : f32
    %550 = vector.broadcast %cst_173 : f32 to vector<16x1xf32>
    %551 = arith.divf %549, %550 : vector<16x1xf32>
    %552 = vector.broadcast %551 : vector<16x1xf32> to vector<16x32xf32>
    %553 = arith.subf %543, %552 : vector<16x32xf32>
    %554 = arith.mulf %553, %553 : vector<16x32xf32>
    %cst_174 = arith.constant dense<0.000000e+00> : vector<16xf32>
    %555 = vector.multi_reduction <add>, %554, %cst_174 [1] : vector<16x32xf32> to vector<16xf32>
    %556 = vector.shape_cast %555 : vector<16xf32> to vector<16x1xf32>
    %cst_175 = arith.constant 3.200000e+01 : f32
    %557 = vector.broadcast %cst_175 : f32 to vector<16x1xf32>
    %558 = arith.divf %556, %557 : vector<16x1xf32>
    %559 = vector.broadcast %551 : vector<16x1xf32> to vector<16x32xf32>
    %560 = arith.subf %543, %559 : vector<16x32xf32>
    %cst_176 = arith.constant 9.99999996E-13 : f32
    %561 = vector.broadcast %cst_176 : f32 to vector<16x1xf32>
    %562 = arith.addf %558, %561 : vector<16x1xf32>
    %563 = math.rsqrt %562 : vector<16x1xf32>
    %564 = vector.broadcast %563 : vector<16x1xf32> to vector<16x32xf32>
    %565 = arith.mulf %560, %564 : vector<16x32xf32>
    %566 = vector.broadcast %545 : vector<1x32xf32> to vector<16x32xf32>
    %567 = arith.mulf %565, %566 : vector<16x32xf32>
    %568 = vector.broadcast %547 : vector<1x32xf32> to vector<16x32xf32>
    %569 = arith.addf %567, %568 : vector<16x32xf32>
    %570 = vector.extract_strided_slice %569 {offsets = [0, 0], sizes = [1, 32], strides = [1, 1]} : vector<16x32xf32> to vector<1x32xf32>
    %571 = vector.extract_strided_slice %569 {offsets = [8, 0], sizes = [1, 32], strides = [1, 1]} : vector<16x32xf32> to vector<1x32xf32>
    %572 = tpu.concatenate %570, %571 in 0 : vector<1x32xf32>, vector<1x32xf32> -> vector<2x32xf32>
    %573 = arith.truncf %572 : vector<2x32xf32> to vector<2x32xbf16>
    %c1_177 = arith.constant 1 : index
    %c0_178 = arith.constant 0 : index
    %c0_179 = arith.constant 0 : index
    %574 = vector.load %arg13[%c1_177, %c0_178, %c0_179] : memref<2x32x64xf32, #tpu.memory_space<vmem>>, vector<1x32x64xf32>
    %575 = vector.shape_cast %574 : vector<1x32x64xf32> to vector<32x64xf32>
    %576 = arith.truncf %575 : vector<32x64xf32> to vector<32x64xbf16>
    %cst_180 = arith.constant dense<0.000000e+00> : vector<2x64xf32>
    %577 = tpu.matmul %573, %576, %cst_180 {dimension_numbers = #tpu.dot_dimension_numbers<[1], [0], [0], [1], [0, 0, 1, 1], [], []>} : vector<2x32xbf16>, vector<32x64xbf16>, vector<2x64xf32> -> vector<2x64xf32>
    %c1_181 = arith.constant 1 : index
    %c0_182 = arith.constant 0 : index
    %c0_183 = arith.constant 0 : index
    %578 = vector.load %arg14[%c1_181, %c0_182, %c0_183] : memref<2x1x64xf32, #tpu.memory_space<vmem>>, vector<1x1x64xf32>
    %579 = vector.shape_cast %578 : vector<1x1x64xf32> to vector<1x64xf32>
    %580 = vector.broadcast %579 : vector<1x64xf32> to vector<2x64xf32>
    %581 = arith.addf %577, %580 : vector<2x64xf32>
    %cst_184 = arith.constant 5.000000e-01 : f32
    %582 = vector.broadcast %cst_184 : f32 to vector<2x64xf32>
    %583 = arith.mulf %582, %581 : vector<2x64xf32>
    %cst_185 = arith.constant 0.707106769 : f32
    %584 = vector.broadcast %cst_185 : f32 to vector<2x64xf32>
    %585 = arith.mulf %581, %584 : vector<2x64xf32>
    %586 = math.erf %585 : vector<2x64xf32>
    %cst_186 = arith.constant 1.000000e+00 : f32
    %587 = vector.broadcast %cst_186 : f32 to vector<2x64xf32>
    %588 = arith.addf %587, %586 : vector<2x64xf32>
    %589 = arith.mulf %583, %588 : vector<2x64xf32>
    %590 = arith.truncf %589 : vector<2x64xf32> to vector<2x64xbf16>
    %c1_187 = arith.constant 1 : index
    %c0_188 = arith.constant 0 : index
    %c0_189 = arith.constant 0 : index
    %591 = vector.load %arg15[%c1_187, %c0_188, %c0_189] : memref<2x64x32xf32, #tpu.memory_space<vmem>>, vector<1x64x32xf32>
    %592 = vector.shape_cast %591 : vector<1x64x32xf32> to vector<64x32xf32>
    %593 = arith.truncf %592 : vector<64x32xf32> to vector<64x32xbf16>
    %cst_190 = arith.constant dense<0.000000e+00> : vector<2x32xf32>
    %594 = tpu.matmul %590, %593, %cst_190 {dimension_numbers = #tpu.dot_dimension_numbers<[1], [0], [0], [1], [0, 0, 1, 1], [], []>} : vector<2x64xbf16>, vector<64x32xbf16>, vector<2x32xf32> -> vector<2x32xf32>
    %c1_191 = arith.constant 1 : index
    %c0_192 = arith.constant 0 : index
    %c0_193 = arith.constant 0 : index
    %595 = vector.load %arg16[%c1_191, %c0_192, %c0_193] : memref<2x1x32xf32, #tpu.memory_space<vmem>>, vector<1x1x32xf32>
    %596 = vector.shape_cast %595 : vector<1x1x32xf32> to vector<1x32xf32>
    %597 = vector.broadcast %596 : vector<1x32xf32> to vector<2x32xf32>
    %598 = arith.addf %594, %597 : vector<2x32xf32>
    %599 = arith.addf %572, %598 : vector<2x32xf32>
    %c1_194 = arith.constant 1 : index
    %c0_195 = arith.constant 0 : index
    %c0_196 = arith.constant 0 : index
    %600 = vector.load %arg17[%c1_194, %c0_195, %c0_196] : memref<2x1x32xf32, #tpu.memory_space<vmem>>, vector<1x1x32xf32>
    %601 = vector.shape_cast %600 : vector<1x1x32xf32> to vector<1x32xf32>
    %c1_197 = arith.constant 1 : index
    %c0_198 = arith.constant 0 : index
    %c0_199 = arith.constant 0 : index
    %602 = vector.load %arg18[%c1_197, %c0_198, %c0_199] : memref<2x1x32xf32, #tpu.memory_space<vmem>>, vector<1x1x32xf32>
    %603 = vector.shape_cast %602 : vector<1x1x32xf32> to vector<1x32xf32>
    %cst_200 = arith.constant dense<0.000000e+00> : vector<2xf32>
    %604 = vector.multi_reduction <add>, %599, %cst_200 [1] : vector<2x32xf32> to vector<2xf32>
    %605 = vector.shape_cast %604 : vector<2xf32> to vector<2x1xf32>
    %cst_201 = arith.constant 3.200000e+01 : f32
    %606 = vector.broadcast %cst_201 : f32 to vector<2x1xf32>
    %607 = arith.divf %605, %606 : vector<2x1xf32>
    %608 = vector.broadcast %607 : vector<2x1xf32> to vector<2x32xf32>
    %609 = arith.subf %599, %608 : vector<2x32xf32>
    %610 = arith.mulf %609, %609 : vector<2x32xf32>
    %cst_202 = arith.constant dense<0.000000e+00> : vector<2xf32>
    %611 = vector.multi_reduction <add>, %610, %cst_202 [1] : vector<2x32xf32> to vector<2xf32>
    %612 = vector.shape_cast %611 : vector<2xf32> to vector<2x1xf32>
    %cst_203 = arith.constant 3.200000e+01 : f32
    %613 = vector.broadcast %cst_203 : f32 to vector<2x1xf32>
    %614 = arith.divf %612, %613 : vector<2x1xf32>
    %615 = vector.broadcast %607 : vector<2x1xf32> to vector<2x32xf32>
    %616 = arith.subf %599, %615 : vector<2x32xf32>
    %cst_204 = arith.constant 9.99999996E-13 : f32
    %617 = vector.broadcast %cst_204 : f32 to vector<2x1xf32>
    %618 = arith.addf %614, %617 : vector<2x1xf32>
    %619 = math.rsqrt %618 : vector<2x1xf32>
    %620 = vector.broadcast %619 : vector<2x1xf32> to vector<2x32xf32>
    %621 = arith.mulf %616, %620 : vector<2x32xf32>
    %622 = vector.broadcast %601 : vector<1x32xf32> to vector<2x32xf32>
    %623 = arith.mulf %621, %622 : vector<2x32xf32>
    %624 = vector.broadcast %603 : vector<1x32xf32> to vector<2x32xf32>
    %625 = arith.addf %623, %624 : vector<2x32xf32>
    %c0_205 = arith.constant 0 : index
    %c0_206 = arith.constant 0 : index
    %626 = vector.load %arg19[%c0_205, %c0_206] : memref<32x16xf32, #tpu.memory_space<vmem>>, vector<32x16xf32>
    %c0_207 = arith.constant 0 : index
    %c0_208 = arith.constant 0 : index
    %627 = vector.load %arg20[%c0_207, %c0_208] : memref<1x16xf32, #tpu.memory_space<vmem>>, vector<1x16xf32>
    %628 = arith.truncf %625 : vector<2x32xf32> to vector<2x32xbf16>
    %629 = arith.truncf %626 : vector<32x16xf32> to vector<32x16xbf16>
    %cst_209 = arith.constant dense<0.000000e+00> : vector<2x16xf32>
    %630 = tpu.matmul %628, %629, %cst_209 {dimension_numbers = #tpu.dot_dimension_numbers<[1], [0], [0], [1], [0, 0, 1, 1], [], []>} : vector<2x32xbf16>, vector<32x16xbf16>, vector<2x16xf32> -> vector<2x16xf32>
    %631 = vector.broadcast %627 : vector<1x16xf32> to vector<2x16xf32>
    %632 = arith.addf %630, %631 : vector<2x16xf32>
    %cst_210 = arith.constant 0.000000e+00 : f32
    %633 = vector.broadcast %cst_210 : f32 to vector<2x16xf32>
    %634 = arith.maximumf %632, %633 : vector<2x16xf32>
    %c0_211 = arith.constant 0 : index
    %c0_212 = arith.constant 0 : index
    %635 = vector.load %arg21[%c0_211, %c0_212] : memref<16x128xf32, #tpu.memory_space<vmem>>, vector<16x128xf32>
    %c0_213 = arith.constant 0 : index
    %c0_214 = arith.constant 0 : index
    %636 = vector.load %arg22[%c0_213, %c0_214] : memref<1x128xf32, #tpu.memory_space<vmem>>, vector<1x128xf32>
    %637 = arith.truncf %634 : vector<2x16xf32> to vector<2x16xbf16>
    %638 = arith.truncf %635 : vector<16x128xf32> to vector<16x128xbf16>
    %cst_215 = arith.constant dense<0.000000e+00> : vector<2x128xf32>
    %639 = tpu.matmul %637, %638, %cst_215 {dimension_numbers = #tpu.dot_dimension_numbers<[1], [0], [0], [1], [0, 0, 1, 1], [], []>} : vector<2x16xbf16>, vector<16x128xbf16>, vector<2x128xf32> -> vector<2x128xf32>
    %640 = vector.broadcast %636 : vector<1x128xf32> to vector<2x128xf32>
    %641 = arith.addf %639, %640 : vector<2x128xf32>
    %cst_216 = arith.constant dense<0xFF800000> : vector<2xf32>
    %642 = vector.multi_reduction <maximumf>, %641, %cst_216 [1] : vector<2x128xf32> to vector<2xf32>
    %643 = vector.shape_cast %642 : vector<2xf32> to vector<2x1xf32>
    %644 = vector.broadcast %643 : vector<2x1xf32> to vector<2x128xf32>
    %645 = arith.subf %641, %644 : vector<2x128xf32>
    %646 = math.exp %645 : vector<2x128xf32>
    %cst_217 = arith.constant dense<0.000000e+00> : vector<2xf32>
    %647 = vector.multi_reduction <add>, %646, %cst_217 [1] : vector<2x128xf32> to vector<2xf32>
    %648 = vector.shape_cast %647 : vector<2xf32> to vector<2x1xf32>
    %649 = vector.broadcast %648 : vector<2x1xf32> to vector<2x128xf32>
    %650 = arith.divf %646, %649 : vector<2x128xf32>
    %c0_218 = arith.constant 0 : index
    %c0_219 = arith.constant 0 : index
    %651 = vector.load %arg23[%c0_218, %c0_219] : memref<2x128xf32, #tpu.memory_space<vmem>>, vector<2x128xf32>
    tpu.vector_store %arg23[%c0_218, %c0_219], %650 {strides = array<i32>} : memref<2x128xf32, #tpu.memory_space<vmem>>, vector<2x128xf32>,
    return
  }
}

</mosaic_0001>

<bundles_post_ra>
// kernel: binary_bert_forward.1
= control target key start
LH: loop header
LB: loop body
LE: loop exit
PB: predicated region body
PF: predicated region fallthrough
CT: control target
= control target key end

     0   :  { %s3161_s0 = inlined_call_operand.vmem [shape: s32[16,1], index: 0, kind: input, shape index: {}]   ;;  %s3162_s1 = inlined_call_operand.vmem [shape: f32[2,8], index: 1, kind: input, shape index: {}]   ;;  %s3163_s2 = inlined_call_operand.vmem [shape: f32[50,32], index: 2, kind: input, shape index: {}]   ;;  %s3164_s3 = inlined_call_operand.vmem [shape: f32[32,32], index: 3, kind: input, shape index: {}]   ;;  %s3165_s4 = inlined_call_operand.vmem [shape: f32[2,32], index: 4, kind: input, shape index: {}]   ;;  %s3166_s5 = inlined_call_operand.vmem [shape: f32[1,32], index: 5, kind: input, shape index: {}]   ;;  %s3167_s6 = inlined_call_operand.hbm [shape: f32[1,32], index: 6, kind: input, shape index: {}]   ;;  %s3168_s7 = inlined_call_operand.vmem [shape: f32[2,32,96], index: 7, kind: input, shape index: {}]   ;;  %s3169_s8 = inlined_call_operand.vmem [shape: f32[2,1,96], index: 8, kind: input, shape index: {}]   ;;  %s3170_s9 = inlined_call_operand.vmem [shape: f32[2,32,32], index: 9, kind: input, shape index: {}]   ;;  %s3171_s10 = inlined_call_operand.vmem [shape: f32[2,1,32], index: 10, kind: input, shape index: {}]   ;;  %s3172_s11 = inlined_call_operand.vmem [shape: f32[2,1,32], index: 11, kind: input, shape index: {}]   ;;  %s3173_s12 = inlined_call_operand.vmem [shape: f32[2,1,32], index: 12, kind: input, shape index: {}]   ;;  %s3174_s13 = inlined_call_operand.vmem [shape: f32[2,32,64], index: 13, kind: input, shape index: {}]   ;;  %s3175_s14 = inlined_call_operand.hbm [shape: f32[2,1,64], index: 14, kind: input, shape index: {}]   ;;  %s3176_s15 = inlined_call_operand.vmem [shape: f32[2,64,32], index: 15, kind: input, shape index: {}]   ;;  %s3177_s16 = inlined_call_operand.hbm [shape: f32[2,1,32], index: 16, kind: input, shape index: {}]   ;;  %s3178_s17 = inlined_call_operand.vmem [shape: f32[2,1,32], index: 17, kind: input, shape index: {}]   ;;  %s3179_s18 = inlined_call_operand.vmem [shape: f32[2,1,32], index: 18, kind: input, shape index: {}]   ;;  %s3180_s19 = inlined_call_operand.vmem [shape: f32[32,16], index: 19, kind: input, shape index: {}]   ;;  %s3181_s20 = inlined_call_operand.hbm [shape: f32[1,16], index: 20, kind: input, shape index: {}]   ;;  %s3182_s21 = inlined_call_operand.hbm [shape: f32[16,128], index: 21, kind: input, shape index: {}]   ;;  %s3183_s22 = inlined_call_operand.hbm [shape: f32[1,128], index: 22, kind: input, shape index: {}]   ;;  %s3184_s23 = inlined_call_operand.hbm [shape: f32[2,128], index: 23, kind: output, shape index: {}]  }
   0x1   :  { %3194 = sst [smem:[#allocation19_spill]] %s3161_s0 }
   0x2   :  { %3195 = sst [smem:[#allocation20_spill]] %s3162_s1 }
   0x3   :  { %3196 = sst [smem:[#allocation21_spill]] %s3163_s2 }
   0x4   :  { %3197 = sst [smem:[#allocation22_spill]] %s3164_s3 }
   0x5   :  { %3198 = sst [smem:[#allocation23_spill]] %s3165_s4 }
   0x6   :  { %3199 = sst [smem:[#allocation24_spill]] %s3166_s5 }
   0x7   :  { %3200 = sst [smem:[#allocation25_spill]] %s3167_s6 }
   0x8   :  { %3201 = sst [smem:[#allocation26_spill]] %s3168_s7 }
   0x9   :  { %28 = vsyncpa [#allocation3], 0 }
   0xa   :  { %29 = vsyncpa [#allocation6], 0 }
   0xb   :  { %30 = vsyncpa [#allocation9], 0 }
   0xc   :  { %31 = vsyncpa [#allocation12], 0  ;;  %s74_s24 = sshll.u32 %s3175_s14, 4  ;;  %s75_s24 = int_to_ptr.hbm [resolvable:$true] %s74_s24 }
   0xd   :  { %32 = vsyncpa [#allocation4], 0  ;;  %s2409_s25 = smov [#allocation5]   ;;  %s109_s2 = sshll.u32 %s3181_s20, 4  ;;  %s110_s2 = int_to_ptr.hbm [resolvable:$true] %s109_s2 }
   0xe   :  { %s76_s5 = sshll.u32 %s2409_s25, 4  ;;  %s3188_s6 = smov 16   ;;  %s77_s5 = int_to_ptr.vmem [resolvable:$true] %s76_s5 }
   0xf   :  { %s2411_s27 = smov 1   ;;  %s2412_s7 = smov [#allocation8]  }
  0x10   :  { %82 = dma.hbm_to_vmem [thread:$0]  %s75_s24, 32, %s77_s5, [#allocation6], %s3188_s6, %s3188_s6, %s2411_s27  }
  0x11   :  { %s111_s28 = sshll.u32 %s2412_s7, 4  ;;  %s3202_s14 = sld [smem:[#allocation25_spill]]  ;;  %s112_s28 = int_to_ptr.vmem [resolvable:$true] %s111_s28 }
  0x12   :  { %114 = dma.hbm_to_vmem [thread:$0]  %s110_s2, 16, %s112_s28, [#allocation9]  }
  0x13   :  { %s89_s25 = sshll.u32 %s3177_s16, 4  ;;  %s2413_s20 = smov [#allocation2]   ;;  %s90_s25 = int_to_ptr.hbm [resolvable:$true] %s89_s25 }
  0x14   :  { %s52_s1 = sshll.u32 %s2413_s20, 4  ;;  %s2414_s24 = smov [#allocation7]   ;;  %s53_s1 = int_to_ptr.vmem [resolvable:$true] %s52_s1 }
  0x15   :  { %s91_s5 = sshll.u32 %s2414_s24, 4  ;;  %s119_s6 = sshll.u32 %s3182_s21, 4  ;;  %s92_s5 = int_to_ptr.vmem [resolvable:$true] %s91_s5  ;;  %s120_s6 = int_to_ptr.hbm [resolvable:$true] %s119_s6 }
  0x16   :  { %s3203_s29 = smov 16   ;;  %s2415_s2 = smov [#allocation10]  }
  0x17   :  { %s50_s0 = sshll.u32 %s3202_s14, 4  ;;  %s121_s28 = sshll.u32 %s2415_s2, 4  ;;  %s51_s0 = int_to_ptr.hbm [resolvable:$true] %s50_s0  ;;  %s122_s28 = int_to_ptr.vmem [resolvable:$true] %s121_s28 }
  0x18   :  { %55 = dma.hbm_to_vmem [thread:$0]  %s51_s0, 16, %s53_s1, [#allocation3]  }
  0x19   :  { %97 = dma.hbm_to_vmem [thread:$0]  %s90_s25, 32, %s92_s5, [#allocation6], %s3203_s29, %s3203_s29, %s2411_s27  }
  0x1a   :  { %s133_s14 = sshll.u32 %s3183_s22, 4  ;;  %s2416_s4 = smov 128   ;;  %s134_s14 = int_to_ptr.hbm [resolvable:$true] %s133_s14 }
  0x1b   :  { %s3190_s0 = smov 8   ;;  %s2418_s30 = smov [#allocation11]  }
  0x1c   :  { %127 = dma.hbm_to_vmem [thread:$0]  %s120_s6, 256, %s122_s28, [#allocation9], %s2416_s4, %s2416_s4, %s3190_s0  }
  0x1d   :  { %s135_s20 = sshll.u32 %s2418_s30, 4  ;;  %s136_s20 = int_to_ptr.vmem [resolvable:$true] %s135_s20 }
  0x1e   :  { %138 = dma.hbm_to_vmem [thread:$0]  %s134_s14, 16, %s136_s20, [#allocation12]  }
  0x1f   :  { %2399 = dma.done.wait [#allocation3], 16  }
  0x20   :  { %2400 = vsyncadd [#allocation3], 4294967280 }
  0x21   :  { %2401 = dma.done.wait [#allocation6], 64  }
  0x22   :  { %2402 = vsyncadd [#allocation6], 4294967232 }
  0x23   :  { %2403 = dma.done.wait [#allocation9], 272  }
  0x24   :  { %2404 = vsyncadd [#allocation9], 4294967024 }
  0x25   :  { %2405 = dma.done.wait [#allocation12], 16  }
  0x26   :  { %2406 = vsyncadd [#allocation12], 4294967280  ;;  %v2419_v0 = vmov 0   ;;  %vm196_vm0 = vcmask 1041408   ;;  %s3204_s27 = sld [smem:[#allocation19_spill]]  ;;  %v166_v10 = vlaneseq  ;;  %vm189_vm1 = vcmask 408576  }
  0x27   :  { %2086 = vset.pattern.permute.xlu0 %v2419_v0  ;;  %s3205_s1 = sld [smem:[#allocation21_spill]]  ;;  %v2420_v13 = vmov 0.0   ;;  %vm228_vm4 = vcmask 261120   ;;  %v2421_v28 = vmov 32.0   ;;  %s2423_s24 = smov 64   ;;  %vm328_vm12 = vcmask 64512  }
  0x28   :  { %v167_v11 = vand.u32 127, %v166_v10  ;;  %s3206_s25 = sld [smem:[#allocation23_spill]]  ;;  %2137 = vrcp.f32 %v2421_v28  ;;  %s2424_s5 = smov 88   ;;  %vm368_vm13 = vcmask 1043456   ;;  %vm819_vm14 = vcmask 130048  }
  0x29   :  { %s3208_s2 = sld [smem:[#allocation26_spill]]  ;;  %s2426_s26 = smov 112   ;;  %vm822_vm15 = vcmask 195584  }
  0x2a   :  { %s3209_s22 = sld [smem:[#allocation24_spill]]  ;;  %s2427_s7 = smov 72  }
  0x2b   :  { %s3210_s3 = sld [smem:[#allocation20_spill]]  ;;  %s2428_s14 = smov 80  }
  0x2c   :  { %v164_v1 = vld [vmem:[%s3204_s27] sm:$0xff]  ;;  %v165_v6 = vld [vmem:[%s3204_s27 + $0x8] sm:$0xff]  ;;  %s2429_s4 = smov 104   ;;  %s2430_s30 = smov 56  }
  0x2d   :  { %v186_v2 = vld [vmem:[%s3205_s1 + $0x30] sm:$0x3]  ;;  %169 = vperm.xlu0 %2086, %v164_v1   ;;  %v185_v3 = vld [vmem:[%s3205_s1 + $0x28] sm:$0xff]  ;;  %v184_v4 = vld [vmem:[%s3205_s1 + $0x20] sm:$0xff]  ;;  %s2431_s20 = smov 48   ;;  %s3192_s21 = smov 40  }
  0x2e   :  { %1986 = vmatpush.msk.msra.mxu0 %vm196_vm0, %v186_v2  ;;  %v183_v5 = vld [vmem:[%s3205_s1 + $0x18] sm:$0xff]  ;;  %v182_v7 = vld [vmem:[%s3205_s1 + $0x10] sm:$0xff]  ;;  %v181_v8 = vld [vmem:[%s3205_s1 + $0x8] sm:$0xff]  ;;  %v2138_v29 = vpop.eup %2137  ;;  %s3191_s16 = smov 24  }
  0x2f   :  { %v180_v9 = vld [vmem:[%s3205_s1] sm:$0xff]  ;;  %s3207_s1 = sld [smem:[#allocation22_spill]]  ;;  %v236_v30 = vmul.f32 32.0, %v2138_v29  ;;  %vm240_vm5 = vweird.f32 %v2138_v29  ;;  %v296_v45 = vld [vmem:[%s3208_s2 + $0x10] sm:$0xff]  ;;  %v297_v46 = vld [vmem:[%s3208_s2 + $0x18] sm:$0xff] }
  0x30   :  { %210 = vmatpush.msra.mxu0 %v185_v3  ;;  %v188_v17 = vld [vmem:[%s3206_s25] sm:$0x3]  ;;  %v299_v47 = vpack.c.bf16 %v297_v46, %v296_v45  ;;  %v295_v49 = vld [vmem:[%s3208_s2 + $0x8] sm:$0xff]  ;;  %s2422_s25 = smov 96  }
  0x31   :  { %v223_v19 = vperm.slane %v188_v17, 0  ;;  %v237_v31 = vsub.f32 1.0, %v236_v30  ;;  %v294_v48 = vld [vmem:[%s3208_s2] sm:$0xff] }
  0x32   :  { %211 = vmatpush.msra.mxu0 %v184_v4  ;;  %313 = vmatpush.bf16.msra.mxu1 %v299_v47  ;;  %v298_v51 = vpack.c.bf16 %v295_v49, %v294_v48 }
  0x33   :  { %v238_v32 = vmul.f32 %v2138_v29, %v237_v31  ;;  %v290_v31 = vld [vmem:[%s3210_s3] sm:$0x3] }
  0x34   :  { %212 = vmatpush.msra.mxu0 %v183_v5 }
  0x35   :  { %172 = vperm.xlu0 %2086, %v165_v6   ;;  %v187_v18 = vld [vmem:[%s3207_s1] sm:$0xff]  ;;  %v239_v33 = vadd.f32 %v2138_v29, %v238_v32  ;;  %s2425_s1 = smov 120   ;;  %v291_v32 = vsub.f32 1.0, %v290_v31 }
  0x36   :  { %213 = vmatpush.msra.mxu0 %v182_v7  ;;  %314 = vmatpush.bf16.msra.mxu1 %v298_v51  ;;  %v2117_v6 = vld [vmem:[%s3209_s22] ss:$0 sm:$0xff] }
  0x37   :  { %v2614_v34 = vsel %vm240_vm5, %v2138_v29, %v239_v33  ;;  %v2674_v33 = vmul.f32 -1e+09, %v291_v32 }
  0x38   :  { %214 = vmatpush.msra.mxu0 %v181_v8 }
  0x3a   :  { %215 = vmatpush.msra.mxu0 %v180_v9 }
  0x9f   :  { %v170_v12 = vpop.permute.xlu0 %169 }
  0xa0   :  { %vm174_vm2 = vcmp.eq.s32.totalorder %v167_v11, %v170_v12 }
  0xa1   :  { %v1984_v14 = vsel %vm174_vm2, 1.0, %v2420_v13 }
  0xa2   :  { %1987 = vmatmul.msk.f32.vlgmr.msra.gmra.mxu0 %vm189_vm1, %v1984_v14 }
  0xa7   :  { %v173_v15 = vpop.permute.xlu0 %172 }
  0xa8   :  { %vm175_vm3 = vcmp.eq.s32.totalorder %v167_v11, %v173_v15  ;;  %v2118_v11 = vld [vmem:[#allocation2] ss:$0 sm:$0xff] }
  0xa9   :  { %v1985_v16 = vsel %vm175_vm3, 1.0, %v2420_v13 }
  0xaa   :  { %1988 = vmatmul.msk.f32.gmra.mxu0 %vm189_vm1, %v1985_v16  ;;  %v2119_v16 = vld [vmem:[%s3169_s8] ss:$0 sm:$0xff] }
 0x11f   :  { %v217_v20 = vpop.f32.mrf.mxu0 }
 0x120   :  { %v218_v21 = vadd.f32 %v217_v20, %v187_v18 }
 0x122   :  { %v224_v22 = vadd.f32 %v223_v19, %v218_v21 }
 0x124   :  { %v229_v23 = vsel %vm228_vm4, %v224_v22, 0.0 }
 0x125   :  { %230 = vadd.xlane.f32.xlu1 %v229_v23 }
 0x127   :  { %v220_v24 = vpop.f32.mrf.mxu0 }
 0x128   :  { %v221_v25 = vadd.f32 %v220_v24, %v187_v18 }
 0x12a   :  { %v225_v26 = vadd.f32 %v223_v19, %v221_v25 }
 0x12c   :  { %v232_v27 = vsel %vm228_vm4, %v225_v26, 0.0 }
 0x12d   :  { %233 = vadd.xlane.f32.xlu1 %v232_v27 }
 0x198   :  { %v231_v35 = vpop.xlane.xlu1 %230 }
 0x199   :  { %v242_v36 = vmul.f32 %v2614_v34, %v231_v35  ;;  %v2677_v35 = vperm.slane %v2674_v33, 0 }
 0x19b   :  { %v244_v37 = vsub.f32 %v224_v22, %v242_v36 }
 0x19d   :  { %v246_v38 = vmul.f32 %v244_v37, %v244_v37 }
 0x19f   :  { %v248_v39 = vsel %vm228_vm4, %v246_v38, 0.0 }
 0x1a0   :  { %249 = vadd.xlane.f32.xlu2 %v248_v39  ;;  %v234_v40 = vpop.xlane.xlu1 %233 }
 0x1a1   :  { %v243_v41 = vmul.f32 %v2614_v34, %v234_v40 }
 0x1a3   :  { %v245_v42 = vsub.f32 %v225_v26, %v243_v41 }
 0x1a5   :  { %v247_v43 = vmul.f32 %v245_v42, %v245_v42 }
 0x1a7   :  { %v251_v44 = vsel %vm228_vm4, %v247_v43, 0.0 }
 0x1a8   :  { %252 = vadd.xlane.f32.xlu2 %v251_v44 }
 0x213   :  { %v250_v50 = vpop.xlane.xlu2 %249 }
 0x214   :  { %v254_v52 = vmul.f32 %v250_v50, %v2614_v34 }
 0x216   :  { %v256_v53 = vadd.f32 1e-12, %v254_v52 }
 0x218   :  { %2139 = vrsqrt.f32 %v256_v53  ;;  %vm264_vm7 = vweird.f32 %v256_v53 }
 0x21b   :  { %v253_v54 = vpop.xlane.xlu2 %252 }
 0x21c   :  { %v255_v55 = vmul.f32 %v253_v54, %v2614_v34 }
 0x21e   :  { %v2140_v56 = vpop.eup %2139  ;;  %v257_v57 = vadd.f32 1e-12, %v255_v55 }
 0x21f   :  { %v259_v58 = vmul.f32 %v2140_v56, %v256_v53  ;;  %vm265_vm6 = vweird.f32 %v2140_v56 }
 0x220   :  { %2141 = vrsqrt.f32 %v257_v57  ;;  %vm266_vm8 = vmor %vm264_vm7, %vm265_vm6  ;;  %vm274_vm10 = vweird.f32 %v257_v57 }
 0x221   :  { %v260_v59 = vmul.f32 %v2140_v56, %v259_v58 }
 0x223   :  { %v261_v60 = vmul.f32 0.5, %v260_v59 }
 0x225   :  { %v262_v61 = vsub.f32 1.5, %v261_v60 }
 0x226   :  { %v2142_v62 = vpop.eup %2141 }
 0x227   :  { %v263_v63 = vmul.f32 %v2140_v56, %v262_v61  ;;  %v269_v0 = vmul.f32 %v2142_v62, %v257_v57  ;;  %vm275_vm9 = vweird.f32 %v2142_v62 }
 0x228   :  { %vm276_vm11 = vmor %vm274_vm10, %vm275_vm9 }
 0x229   :  { %v270_v1 = vmul.f32 %v2142_v62, %v269_v0  ;;  %v267_v2 = vsel %vm266_vm8, %v2140_v56, %v263_v63 }
 0x22a   :  { %v278_v5 = vmul.f32 %v267_v2, %v244_v37 }
 0x22b   :  { %v271_v3 = vmul.f32 0.5, %v270_v1 }
 0x22c   :  { %v283_v10 = vmul.f32 %v2117_v6, %v278_v5 }
 0x22d   :  { %v272_v4 = vsub.f32 1.5, %v271_v3 }
 0x22e   :  { %v2637_v13 = vadd.f32 %v2118_v11, %v283_v10 }
 0x22f   :  { %v273_v7 = vmul.f32 %v2142_v62, %v272_v4 }
 0x231   :  { %v277_v8 = vsel %vm276_vm11, %v2142_v62, %v273_v7 }
 0x232   :  { %v279_v9 = vmul.f32 %v277_v8, %v245_v42 }
 0x234   :  { %v284_v12 = vmul.f32 %v2117_v6, %v279_v9 }
 0x236   :  { %v2639_v14 = vadd.f32 %v2118_v11, %v284_v12 }
 0x238   :  { %v293_v15 = vpack.c.bf16 %v2639_v14, %v2637_v13 }
 0x23a   :  { %1989 = vmatmul.msk.bf16.vlgmr.msra.gmra.mxu1 %vm228_vm4, %v293_v15  ;;  %v2719_v15 = vperm.slane %v2674_v33, 1 }
 0x2b7   :  { %v316_v17 = vpop.f32.mrf.mxu1 }
 0x2b8   :  { %v317_v18 = vadd.f32 %v2119_v16, %v316_v17 }
 0x2ba   :  { %v321_v19 = vpack.c.bf16 %v317_v18, %v317_v18 }
 0x2bc   :  { %v324_v20 = vunpack.c.l.b16 %v321_v19 }
 0x2be   :  { %v2647_v21 = vpack.c.b16 %v324_v20, %v324_v20 }
 0x2bf   :  { %v318_v22 = vpop.f32.mrf.mxu1 }
 0x2c0   :  { %326 = vrot.lane.b32.xlu0 %v2647_v21, %s2422_s25  ;;  %v319_v23 = vadd.f32 %v2119_v16, %v318_v22 }
 0x2c2   :  { %v2651_v24 = vpack.c.bf16 %v319_v23, %v319_v23 }
 0x2c4   :  { %v386_v25 = vunpack.c.l.b16 %v2651_v24 }
 0x2c6   :  { %v2656_v26 = vpack.c.b16 %v386_v25, %v386_v25 }
 0x2c8   :  { %363 = vrot.lane.b32.xlu0 %v2647_v21, %s2423_s24 }
 0x2d0   :  { %505 = vrot.lane.b32.xlu0 %v2656_v26, %s2424_s5 }
 0x2d8   :  { %445 = vrot.lane.b32.xlu0 %v2647_v21, %s2425_s1 }
 0x2e0   :  { %503 = vrot.lane.b32.xlu0 %v2656_v26, %s2425_s1 }
 0x2e8   :  { %561 = vrot.lane.b32.xlu0 %v2647_v21, %s2426_s26 }
 0x2f0   :  { %737 = vrot.lane.b32.xlu0 %v2656_v26, %s2427_s7 }
 0x332   :  { %v327_v27 = vpop.permute.xlu0 %326 }
 0x333   :  { %v333_v28 = vsel %vm328_vm12, %v327_v27, 0 }
 0x334   :  { %342 = vmatpush.bf16.xpose.msra.mxu2 %v333_v28 }
 0x33a   :  { %v364_v29 = vpop.permute.xlu0 %363 }
 0x33b   :  { %1990 = vmatmul.msk.bf16.vlgmr.msra.gmra.mxu2 %vm328_vm12, %v321_v19  ;;  %v370_v30 = vsel %vm368_vm13, %v364_v29, 0 }
 0x33c   :  { %379 = vmatpush.bf16.msra.mxu3 %v370_v30 }
 0x342   :  { %v506_v49 = vpop.permute.xlu0 %505 }
 0x343   :  { %v511_v57 = vsel %vm328_vm12, %v506_v49, 0 }
 0x34a   :  { %v446_v56 = vpop.permute.xlu0 %445 }
 0x352   :  { %v504_v62 = vpop.permute.xlu0 %503 }
 0x35a   :  { %v562_v0 = vpop.permute.xlu0 %561 }
 0x362   :  { %v738_v2 = vpop.permute.xlu0 %737 }
 0x363   :  { %v743_v3 = vsel %vm328_vm12, %v738_v2, 0 }
 0x3be   :  { %v344_v36 = vpop.f32.mrf.mxu2 }
 0x3bf   :  { %v348_v37 = vmul.f32 0.35355338, %v344_v36 }
 0x3c1   :  { %v350_v38 = vadd.f32 %v2677_v35, %v348_v37 }
 0x3c3   :  { %v351_v39 = vsel %vm328_vm12, %v350_v38, -inf }
 0x3c4   :  { %352 = vmax.xlane.f32.xlu1 %v351_v39 }
 0x3c6   :  { %v346_v40 = vpop.f32.mrf.mxu2 }
 0x3dd   :  { %388 = vrot.lane.b32.xlu1 %v2656_v26, %s2422_s25 }
 0x3e5   :  { %621 = vrot.lane.b32.xlu1 %v2656_v26, %s2428_s14 }
 0x3ed   :  { %679 = vrot.lane.b32.xlu1 %v2647_v21, %s2427_s7 }
 0x3f5   :  { %735 = vrot.lane.b32.xlu1 %v2656_v26, %s2429_s4 }
 0x437   :  { %v353_v41 = vpop.xlane.xlu1 %352 }
 0x438   :  { %v354_v42 = vsub.f32 %v350_v38, %v353_v41 }
 0x43a   :  { %v355_v43 = vmul.f32 1.442695, %v354_v42 }
 0x43c   :  { %2143 = vpow2.f32 %v355_v43 }
 0x442   :  { %v2144_v44 = vpop.eup %2143 }
 0x443   :  { %v357_v45 = vsel %vm328_vm12, %v2144_v44, 0.0 }
 0x444   :  { %358 = vadd.xlane.f32.xlu2 %v357_v45 }
 0x44f   :  { %v389_v46 = vpop.permute.xlu1 %388 }
 0x450   :  { %v394_v47 = vsel %vm328_vm12, %v389_v46, 0 }
 0x451   :  { %403 = vmatpush.bf16.xpose.msrb.mxu3 %v394_v47 }
 0x457   :  { %v622_v50 = vpop.permute.xlu1 %621 }
 0x458   :  { %v627_v63 = vsel %vm328_vm12, %v622_v50, 0 }
 0x45c   :  { %447 = vrot.lane.b32.xlu2 %v2647_v21, %s2424_s5 }
 0x45f   :  { %v680_v58 = vpop.permute.xlu1 %679 }
 0x460   :  { %v685_v61 = vsel %vm328_vm12, %v680_v58, 0 }
 0x464   :  { %563 = vrot.lane.b32.xlu2 %v2647_v21, %s2428_s14 }
 0x467   :  { %v736_v5 = vpop.permute.xlu1 %735 }
 0x46c   :  { %619 = vrot.lane.b32.xlu2 %v2656_v26, %s2426_s26 }
 0x474   :  { %677 = vrot.lane.b32.xlu2 %v2647_v21, %s2429_s4 }
 0x4b7   :  { %v359_v48 = vpop.xlane.xlu2 %358 }
 0x4b8   :  { %2145 = vrcp.f32 %v359_v48 }
 0x4be   :  { %v2146_v51 = vpop.eup %2145 }
 0x4bf   :  { %v448_v52 = vpop.permute.xlu2 %447  ;;  %v361_v53 = vmul.f32 %v2146_v51, %v2144_v44 }
 0x4c0   :  { %v453_v54 = vsel %vm328_vm12, %v448_v52, 0 }
 0x4c1   :  { %462 = vmatpush.bf16.xpose.msrb.mxu2 %v453_v54  ;;  %v362_v55 = vpack.c.bf16 %v361_v53, %v361_v53 }
 0x4c3   :  { %1991 = vmatmul.msk.bf16.vlgmr.msra.gmra.mxu3 %vm328_vm12, %v362_v55 }
 0x4c4   :  { %520 = vmatpush.bf16.xpose.msra.mxu3 %v511_v57 }
 0x4c7   :  { %v564_v59 = vpop.permute.xlu2 %563 }
 0x4c8   :  { %v569_v60 = vsel %vm328_vm12, %v564_v59, 0  ;;  %1994 = vmatmul.msk.bf16.vlgmr.msrb.gmra.mxu2 %vm328_vm12, %v446_v56 }
 0x4c9   :  { %578 = vmatpush.bf16.xpose.msra.mxu2 %v569_v60 }
 0x4cf   :  { %v620_v1 = vpop.permute.xlu2 %619 }
 0x4d1   :  { %694 = vmatpush.bf16.xpose.msrb.mxu2 %v685_v61 }
 0x4d3   :  { %1992 = vmatmul.msk.bf16.vlgmr.msrb.gmra.mxu3 %vm328_vm12, %v2651_v24 }
 0x4d4   :  { %636 = vmatpush.bf16.xpose.msrb.mxu3 %v627_v63 }
 0x4d7   :  { %v678_v4 = vpop.permute.xlu2 %677 }
 0x4d8   :  { %1998 = vmatmul.msk.bf16.vlgmr.msra.gmra.mxu2 %vm328_vm12, %v562_v0 }
 0x4e3   :  { %1996 = vmatmul.msk.bf16.vlgmr.msra.gmra.mxu3 %vm328_vm12, %v504_v62 }
 0x4e4   :  { %752 = vmatpush.bf16.xpose.msra.mxu3 %v743_v3 }
 0x4e8   :  { %2002 = vmatmul.msk.bf16.vlgmr.msrb.gmra.mxu2 %vm328_vm12, %v678_v4 }
 0x4f3   :  { %2000 = vmatmul.msk.bf16.vlgmr.msrb.gmra.mxu3 %vm328_vm12, %v620_v1 }
 0x503   :  { %2004 = vmatmul.msk.bf16.vlgmr.msra.gmra.mxu3 %vm328_vm12, %v736_v5 }
 0x546   :  { %v2714_v6 = vpop.f32.mrf.mxu3 }
 0x54b   :  { %v464_v7 = vpop.f32.mrf.mxu2 }
 0x54c   :  { %v468_v8 = vmul.f32 0.35355338, %v464_v7 }
 0x54e   :  { %v383_v9 = vpop.f32.mrf.mxu3  ;;  %v469_v10 = vadd.f32 %v468_v8, %v2677_v35 }
 0x550   :  { %v470_v11 = vsel %vm328_vm12, %v469_v10, -inf }
 0x551   :  { %471 = vmax.xlane.f32.xlu2 %v470_v11 }
 0x553   :  { %v466_v12 = vpop.f32.mrf.mxu2 }
 0x556   :  { %v405_v16 = vpop.f32.mrf.mxu3 }
 0x557   :  { %v409_v17 = vmul.f32 0.35355338, %v405_v16 }
 0x559   :  { %v411_v18 = vadd.f32 %v2719_v15, %v409_v17 }
 0x55b   :  { %v580_v19 = vpop.f32.mrf.mxu2  ;;  %v412_v20 = vsel %vm328_vm12, %v411_v18, -inf }
 0x55c   :  { %v584_v22 = vmul.f32 0.35355338, %v580_v19  ;;  %413 = vmax.xlane.f32.xlu0 %v412_v20 }
 0x55e   :  { %v407_v23 = vpop.f32.mrf.mxu3  ;;  %v585_v24 = vadd.f32 %v584_v22, %v2677_v35 }
 0x560   :  { %v586_v25 = vsel %vm328_vm12, %v585_v24, -inf }
 0x561   :  { %587 = vmax.xlane.f32.xlu2 %v586_v25 }
 0x563   :  { %v582_v27 = vpop.f32.mrf.mxu2 }
 0x566   :  { %v522_v28 = vpop.f32.mrf.mxu3 }
 0x567   :  { %v526_v33 = vmul.f32 0.35355338, %v522_v28 }
 0x569   :  { %v527_v38 = vadd.f32 %v526_v33, %v2719_v15 }
 0x56b   :  { %v696_v29 = vpop.f32.mrf.mxu2  ;;  %v528_v41 = vsel %vm328_vm12, %v527_v38, -inf }
 0x56c   :  { %v700_v30 = vmul.f32 0.35355338, %v696_v29 }
 0x56e   :  { %v524_v31 = vpop.f32.mrf.mxu3  ;;  %v2726_v32 = vadd.f32 %v700_v30, %v2677_v35 }
 0x570   :  { %v702_v36 = vsel %vm328_vm12, %v2726_v32, -inf }
 0x571   :  { %703 = vmax.xlane.f32.xlu1 %v702_v36 }
 0x573   :  { %v698_v37 = vpop.f32.mrf.mxu2 }
 0x576   :  { %v638_v39 = vpop.f32.mrf.mxu3 }
 0x577   :  { %v642_v40 = vmul.f32 0.35355338, %v638_v39 }
 0x579   :  { %529 = vmax.xlane.f32.xlu1 %v528_v41  ;;  %v643_v42 = vadd.f32 %v642_v40, %v2719_v15 }
 0x57b   :  { %v644_v43 = vsel %vm328_vm12, %v643_v42, -inf }
 0x57c   :  { %645 = vmax.xlane.f32.xlu0 %v644_v43 }
 0x57e   :  { %v640_v44 = vpop.f32.mrf.mxu3 }
 0x586   :  { %v754_v45 = vpop.f32.mrf.mxu3 }
 0x587   :  { %v758_v17 = vmul.f32 0.35355338, %v754_v45 }
 0x58e   :  { %v756_v46 = vpop.f32.mrf.mxu3 }
 0x590   :  { %540 = vrot.lane.b32.xlu0 %v2656_v26, %s2430_s30 }
 0x592   :  { %424 = vrot.lane.b32.xlu1 %v2656_v26, %s2423_s24 }
 0x5c4   :  { %v472_v47 = vpop.xlane.xlu2 %471 }
 0x5c5   :  { %v473_v48 = vsub.f32 %v469_v10, %v472_v47 }
 0x5c7   :  { %v474_v49 = vmul.f32 1.442695, %v473_v48 }
 0x5c9   :  { %2147 = vpow2.f32 %v474_v49 }
 0x5cf   :  { %v2148_v50 = vpop.eup %2147  ;;  %v414_v51 = vpop.xlane.xlu0 %413 }
 0x5d0   :  { %v415_v52 = vsub.f32 %v411_v18, %v414_v51  ;;  %v476_v53 = vsel %vm328_vm12, %v2148_v50, 0.0  ;;  %v759_v18 = vadd.f32 %v758_v17, %v2719_v15 }
 0x5d1   :  { %477 = vadd.xlane.f32.xlu2 %v476_v53 }
 0x5d2   :  { %v416_v54 = vmul.f32 1.442695, %v415_v52  ;;  %v760_v19 = vsel %vm328_vm12, %v759_v18, -inf }
 0x5d4   :  { %2149 = vpow2.f32 %v416_v54  ;;  %v588_v55 = vpop.xlane.xlu2 %587 }
 0x5d5   :  { %v589_v56 = vsub.f32 %v585_v24, %v588_v55 }
 0x5d7   :  { %v590_v57 = vmul.f32 1.442695, %v589_v56 }
 0x5d9   :  { %2151 = vpow2.f32 %v590_v57 }
 0x5da   :  { %v2150_v58 = vpop.eup %2149 }
 0x5db   :  { %v418_v59 = vsel %vm328_vm12, %v2150_v58, 0.0 }
 0x5dc   :  { %419 = vadd.xlane.f32.xlu0 %v418_v59 }
 0x5df   :  { %v2152_v60 = vpop.eup %2151 }
 0x5e0   :  { %v592_v61 = vsel %vm328_vm12, %v2152_v60, 0.0 }
 0x5e1   :  { %593 = vadd.xlane.f32.xlu1 %v592_v61 }
 0x5e4   :  { %v704_v62 = vpop.xlane.xlu1 %703 }
 0x5e5   :  { %v705_v22 = vsub.f32 %v2726_v32, %v704_v62 }
 0x5e7   :  { %v706_v27 = vmul.f32 1.442695, %v705_v22  ;;  %v828_v22 = vld [vmem:[%s3170_s9 + $0x10] sm:$0xff] }
 0x5e9   :  { %482 = vrot.lane.b32.xlu2 %v2647_v21, %s2430_s30 }
 0x5ec   :  { %v530_v63 = vpop.xlane.xlu1 %529 }
 0x5ed   :  { %v531_v0 = vsub.f32 %v527_v38, %v530_v63 }
 0x5ef   :  { %v532_v1 = vmul.f32 1.442695, %v531_v0  ;;  %v646_v2 = vpop.xlane.xlu0 %645 }
 0x5f0   :  { %v647_v3 = vsub.f32 %v643_v42, %v646_v2 }
 0x5f1   :  { %2153 = vpow2.f32 %v532_v1  ;;  %598 = vrot.lane.b32.xlu2 %v2647_v21, %s2431_s20 }
 0x5f2   :  { %v648_v4 = vmul.f32 1.442695, %v647_v3 }
 0x5f4   :  { %2155 = vpow2.f32 %v648_v4 }
 0x5f7   :  { %v2154_v5 = vpop.eup %2153 }
 0x5f8   :  { %v534_v7 = vsel %vm328_vm12, %v2154_v5, 0.0 }
 0x5f9   :  { %535 = vadd.xlane.f32.xlu0 %v534_v7 }
 0x5fa   :  { %v2156_v8 = vpop.eup %2155 }
 0x5fb   :  { %v650_v9 = vsel %vm328_vm12, %v2156_v8, 0.0 }
 0x601   :  { %651 = vadd.xlane.f32.xlu0 %v650_v9 }
 0x602   :  { %v541_v10 = vpop.permute.xlu0 %540 }
 0x603   :  { %v546_v16 = vsel %vm368_vm13, %v541_v10, 0 }
 0x604   :  { %v425_v11 = vpop.permute.xlu1 %424 }
 0x605   :  { %v430_v12 = vsel %vm368_vm13, %v425_v11, 0 }
 0x606   :  { %439 = vmatpush.bf16.msrb.mxu1 %v430_v12 }
 0x60a   :  { %555 = vmatpush.bf16.msra.mxu1 %v546_v16 }
 0x615   :  { %772 = vrot.lane.b32.xlu0 %v2656_v26, %s3192_s21 }
 0x61a   :  { %761 = vmax.xlane.f32.xlu2 %v760_v19 }
 0x632   :  { %656 = vrot.lane.b32.xlu2 %v2656_v26, %s2431_s20 }
 0x644   :  { %v478_v20 = vpop.xlane.xlu2 %477 }
 0x645   :  { %2157 = vrcp.f32 %v478_v20 }
 0x64b   :  { %v2158_v23 = vpop.eup %2157 }
 0x64c   :  { %v480_v24 = vmul.f32 %v2158_v23, %v2148_v50  ;;  %v483_v25 = vpop.permute.xlu2 %482  ;;  %v829_v23 = vld [vmem:[%s3170_s9 + $0x18] sm:$0xff] }
 0x64d   :  { %v488_v28 = vsel %vm368_vm13, %v483_v25, 0 }
 0x64e   :  { %497 = vmatpush.bf16.msrb.mxu0 %v488_v28  ;;  %v481_v29 = vpack.c.bf16 %v480_v24, %v480_v24  ;;  %v831_v24 = vpack.c.bf16 %v829_v23, %v828_v22 }
 0x64f   :  { %v420_v30 = vpop.xlane.xlu0 %419 }
 0x650   :  { %2159 = vrcp.f32 %v420_v30  ;;  %845 = vmatpush.bf16.msra.mxu2 %v831_v24 }
 0x651   :  { %2161 = vpow2.f32 %v706_v27  ;;  %1995 = vmatmul.msk.bf16.vlgmr.msrb.gmra.mxu0 %vm328_vm12, %v481_v29 }
 0x654   :  { %v599_v31 = vpop.permute.xlu2 %598  ;;  %v594_v33 = vpop.xlane.xlu1 %593 }
 0x655   :  { %v604_v26 = vsel %vm368_vm13, %v599_v31, 0  ;;  %2163 = vrcp.f32 %v594_v33  ;;  %v826_v31 = vld [vmem:[%s3170_s9] sm:$0xff]  ;;  %v827_v33 = vld [vmem:[%s3170_s9 + $0x8] sm:$0xff] }
 0x656   :  { %v2160_v36 = vpop.eup %2159  ;;  %613 = vmatpush.bf16.msra.mxu0 %v604_v26  ;;  %v830_v26 = vpack.c.bf16 %v827_v33, %v826_v31  ;;  %v2121_v33 = vld [vmem:[%s3172_s11] ss:$0 sm:$0xff] }
 0x657   :  { %v2162_v32 = vpop.eup %2161  ;;  %v422_v37 = vmul.f32 %v2160_v36, %v2150_v58 }
 0x658   :  { %v708_v39 = vsel %vm328_vm12, %v2162_v32, 0.0  ;;  %846 = vmatpush.bf16.msra.mxu2 %v830_v26 }
 0x659   :  { %v423_v38 = vpack.c.bf16 %v422_v37, %v422_v37 }
 0x65b   :  { %v2164_v40 = vpop.eup %2163  ;;  %709 = vadd.xlane.f32.xlu2 %v708_v39  ;;  %1993 = vmatmul.msk.bf16.vlgmr.msrb.gmra.mxu1 %vm328_vm12, %v423_v38 }
 0x65c   :  { %v596_v41 = vmul.f32 %v2164_v40, %v2152_v60 }
 0x65e   :  { %v597_v42 = vpack.c.bf16 %v596_v41, %v596_v41 }
 0x661   :  { %1999 = vmatmul.msk.bf16.vlgmr.msra.gmra.mxu0 %vm328_vm12, %v597_v42 }
 0x66c   :  { %v536_v43 = vpop.xlane.xlu0 %535 }
 0x66d   :  { %2165 = vrcp.f32 %v536_v43 }
 0x673   :  { %v2166_v44 = vpop.eup %2165 }
 0x674   :  { %v538_v45 = vmul.f32 %v2166_v44, %v2154_v5  ;;  %v652_v47 = vpop.xlane.xlu0 %651 }
 0x675   :  { %2167 = vrcp.f32 %v652_v47 }
 0x676   :  { %v539_v46 = vpack.c.bf16 %v538_v45, %v538_v45 }
 0x678   :  { %1997 = vmatmul.msk.bf16.vlgmr.msra.gmra.mxu1 %vm328_vm12, %v539_v46 }
 0x67b   :  { %v2168_v51 = vpop.eup %2167 }
 0x67c   :  { %v654_v52 = vmul.f32 %v2168_v51, %v2156_v8  ;;  %v2120_v51 = vld [vmem:[%s3171_s10] ss:$0 sm:$0xff] }
 0x67e   :  { %v655_v58 = vpack.c.bf16 %v654_v52, %v654_v52 }
 0x687   :  { %v773_v53 = vpop.permute.xlu0 %772 }
 0x688   :  { %v778_v56 = vsel %vm368_vm13, %v773_v53, 0 }
 0x68d   :  { %v762_v48 = vpop.xlane.xlu2 %761 }
 0x68e   :  { %v763_v49 = vsub.f32 %v759_v18, %v762_v48 }
 0x690   :  { %v764_v50 = vmul.f32 1.442695, %v763_v49 }
 0x692   :  { %2169 = vpow2.f32 %v764_v50 }
 0x695   :  { %v657_v54 = vpop.permute.xlu2 %656 }
 0x696   :  { %v662_v55 = vsel %vm368_vm13, %v657_v54, 0 }
 0x697   :  { %671 = vmatpush.bf16.msrb.mxu1 %v662_v55 }
 0x698   :  { %v2170_v57 = vpop.eup %2169 }
 0x699   :  { %v766_v59 = vsel %vm328_vm12, %v2170_v57, 0.0 }
 0x69a   :  { %767 = vadd.xlane.f32.xlu1 %v766_v59  ;;  %2001 = vmatmul.msk.bf16.vlgmr.msrb.gmra.mxu1 %vm328_vm12, %v655_v58 }
 0x69b   :  { %787 = vmatpush.bf16.msra.mxu1 %v778_v56 }
 0x6b3   :  { %714 = vrot.lane.b32.xlu1 %v2647_v21, %s3192_s21 }
 0x6ce   :  { %v499_v60 = vpop.f32.mrf.mxu0  ;;  %v710_v11 = vpop.xlane.xlu2 %709 }
 0x6d6   :  { %v501_v61 = vpop.f32.mrf.mxu0 }
 0x6d8   :  { %v441_v62 = vpop.f32.mrf.mxu1 }
 0x6de   :  { %v615_v63 = vpop.f32.mrf.mxu0 }
 0x6e0   :  { %v443_v0 = vpop.f32.mrf.mxu1 }
 0x6e6   :  { %v617_v1 = vpop.f32.mrf.mxu0 }
 0x6f5   :  { %v557_v2 = vpop.f32.mrf.mxu1 }
 0x6f6   :  { %v2087_v3 = vpack.i.bf16 %v557_v2, %v499_v60 }
 0x6f8   :  { %2088 = vrot.lane.b32.xlu2 %v2087_v3, %s3190_s0 }
 0x6fd   :  { %v559_v4 = vpop.f32.mrf.mxu1 }
 0x6fe   :  { %v915_v4 = vld [vmem:[%s3174_s13 + $0x18] sm:$0xff] }
 0x70d   :  { %v768_v5 = vpop.xlane.xlu1 %767 }
 0x70e   :  { %2171 = vrcp.f32 %v768_v5 }
 0x70f   :  { %2173 = vrcp.f32 %v710_v11 }
 0x714   :  { %v2172_v7 = vpop.eup %2171 }
 0x715   :  { %v770_v8 = vmul.f32 %v2172_v7, %v2170_v57  ;;  %v2174_v16 = vpop.eup %2173 }
 0x716   :  { %v712_v17 = vmul.f32 %v2174_v16, %v2162_v32 }
 0x717   :  { %v771_v9 = vpack.c.bf16 %v770_v8, %v770_v8  ;;  %v673_v10 = vpop.f32.mrf.mxu1 }
 0x718   :  { %v2092_v12 = vpack.i.bf16 %v673_v10, %v615_v63  ;;  %v713_v20 = vpack.c.bf16 %v712_v17, %v712_v17  ;;  %v913_v10 = vld [vmem:[%s3174_s13 + $0x8] sm:$0xff] }
 0x719   :  { %2005 = vmatmul.msk.bf16.vlgmr.msra.gmra.mxu1 %vm328_vm12, %v771_v9  ;;  %v912_v9 = vld [vmem:[%s3174_s13] sm:$0xff] }
 0x71a   :  { %2093 = vrot.lane.b32.xlu0 %v2092_v12, %s3203_s29  ;;  %v916_v12 = vpack.c.bf16 %v913_v10, %v912_v9 }
 0x71f   :  { %v675_v21 = vpop.f32.mrf.mxu1 }
 0x725   :  { %v715_v18 = vpop.permute.xlu1 %714 }
 0x726   :  { %v720_v19 = vsel %vm368_vm13, %v715_v18, 0 }
 0x727   :  { %729 = vmatpush.bf16.msrb.mxu0 %v720_v19 }
 0x72a   :  { %2003 = vmatmul.msk.bf16.vlgmr.msrb.gmra.mxu0 %vm328_vm12, %v713_v20 }
 0x752   :  { %v2089_v36 = vpop.permute.xlu2 %2088 }
 0x753   :  { %v2091_v37 = vunpack.i.h.bf16 %v2089_v36  ;;  %v2090_v38 = vunpack.i.l.bf16 %v2089_v36 }
 0x755   :  { %v818_v42 = vsel %vm328_vm12, %v441_v62, %v2091_v37  ;;  %v817_v43 = vsel %vm328_vm12, %v2714_v6, %v2090_v38  ;;  %v2122_v37 = vld [vmem:[%s3173_s12] ss:$0 sm:$0xff] }
 0x78c   :  { %v2094_v32 = vpop.permute.xlu0 %2093 }
 0x78d   :  { %v2096_v39 = vunpack.i.h.bf16 %v2094_v32  ;;  %v2095_v40 = vunpack.i.l.bf16 %v2094_v32 }
 0x78f   :  { %v821_v46 = vsel %vm819_vm14, %v818_v42, %v2096_v39  ;;  %v820_v47 = vsel %vm819_vm14, %v817_v43, %v2095_v40 }
 0x796   :  { %v789_v25 = vpop.f32.mrf.mxu1 }
 0x79e   :  { %v791_v27 = vpop.f32.mrf.mxu1 }
 0x7a7   :  { %v731_v28 = vpop.f32.mrf.mxu0 }
 0x7a8   :  { %v2097_v29 = vpack.i.bf16 %v789_v25, %v731_v28 }
 0x7aa   :  { %2098 = vrot.lane.b32.xlu1 %v2097_v29, %s3191_s16 }
 0x7af   :  { %v733_v30 = vpop.f32.mrf.mxu0 }
 0x81c   :  { %v2099_v41 = vpop.permute.xlu1 %2098 }
 0x81d   :  { %v2101_v44 = vunpack.i.h.bf16 %v2099_v41  ;;  %v2100_v45 = vunpack.i.l.bf16 %v2099_v41 }
 0x81f   :  { %v823_v48 = vsel %vm822_vm15, %v820_v47, %v2100_v45  ;;  %v824_v49 = vsel %vm822_vm15, %v821_v46, %v2101_v44  ;;  %v2123_v44 = vld [vmem:[#allocation5] ss:$0 sm:$0xff] }
 0x820   :  { %v825_v50 = vpack.c.bf16 %v824_v49, %v823_v48 }
 0x822   :  { %2006 = vmatmul.msk.bf16.vlgmr.msra.gmra.mxu2 %vm228_vm4, %v825_v50 }
 0x8a5   :  { %v848_v52 = vpop.f32.mrf.mxu2 }
 0x8a6   :  { %v849_v53 = vadd.f32 %v2120_v51, %v848_v52 }
 0x8a8   :  { %v853_v6 = vadd.f32 %v849_v53, %v2637_v13 }
 0x8aa   :  { %v857_v54 = vsel %vm228_vm4, %v853_v6, 0.0 }
 0x8ab   :  { %858 = vadd.xlane.f32.xlu0 %v857_v54 }
 0x8ad   :  { %v850_v55 = vpop.f32.mrf.mxu2 }
 0x8ae   :  { %v851_v56 = vadd.f32 %v2120_v51, %v850_v55 }
 0x8b0   :  { %v854_v57 = vadd.f32 %v851_v56, %v2639_v14  ;;  %v914_v14 = vld [vmem:[%s3174_s13 + $0x10] sm:$0xff] }
 0x8b1   :  { %v917_v5 = vpack.c.bf16 %v915_v4, %v914_v14 }
 0x8b2   :  { %v860_v58 = vsel %vm228_vm4, %v854_v57, 0.0 }
 0x8b3   :  { %861 = vadd.xlane.f32.xlu1 %v860_v58  ;;  %931 = vmatpush.bf16.msra.mxu0 %v917_v5  ;;  %v1032_v5 = vld [vmem:[%s3176_s15 + $0x20] sm:$0xff] }
 0x8b7   :  { %932 = vmatpush.bf16.msra.mxu0 %v916_v12 }
 0x91e   :  { %v859_v59 = vpop.xlane.xlu0 %858 }
 0x91f   :  { %v863_v60 = vmul.f32 %v859_v59, %v2614_v34 }
 0x921   :  { %v865_v61 = vsub.f32 %v853_v6, %v863_v60 }
 0x923   :  { %v867_v62 = vmul.f32 %v865_v61, %v865_v61 }
 0x925   :  { %v869_v63 = vsel %vm228_vm4, %v867_v62, 0.0  ;;  %v1035_v62 = vld [vmem:[%s3176_s15 + $0x38] sm:$0xff] }
 0x926   :  { %v862_v0 = vpop.xlane.xlu1 %861  ;;  %870 = vadd.xlane.f32.xlu2 %v869_v63 }
 0x927   :  { %v864_v13 = vmul.f32 %v862_v0, %v2614_v34 }
 0x929   :  { %v866_v1 = vsub.f32 %v854_v57, %v864_v13 }
 0x92b   :  { %v868_v2 = vmul.f32 %v866_v1, %v866_v1 }
 0x92d   :  { %v872_v3 = vsel %vm228_vm4, %v868_v2, 0.0 }
 0x92e   :  { %873 = vadd.xlane.f32.xlu0 %v872_v3 }
 0x999   :  { %v871_v7 = vpop.xlane.xlu2 %870 }
 0x99a   :  { %v875_v8 = vmul.f32 %v871_v7, %v2614_v34  ;;  %v1033_v7 = vld [vmem:[%s3176_s15 + $0x28] sm:$0xff] }
 0x99b   :  { %v1038_v9 = vpack.c.bf16 %v1033_v7, %v1032_v5 }
 0x99c   :  { %v877_v11 = vadd.f32 1e-12, %v875_v8 }
 0x99e   :  { %2175 = vrsqrt.f32 %v877_v11  ;;  %vm885_vm2 = vweird.f32 %v877_v11 }
 0x9a1   :  { %v874_v21 = vpop.xlane.xlu0 %873 }
 0x9a2   :  { %v876_v16 = vmul.f32 %v874_v21, %v2614_v34 }
 0x9a4   :  { %v2176_v17 = vpop.eup %2175  ;;  %v878_v18 = vadd.f32 1e-12, %v876_v16 }
 0x9a5   :  { %v880_v19 = vmul.f32 %v2176_v17, %v877_v11  ;;  %vm886_vm1 = vweird.f32 %v2176_v17 }
 0x9a6   :  { %2177 = vrsqrt.f32 %v878_v18  ;;  %vm887_vm3 = vmor %vm885_vm2, %vm886_vm1  ;;  %vm895_vm6 = vweird.f32 %v878_v18 }
 0x9a7   :  { %v881_v20 = vmul.f32 %v2176_v17, %v880_v19  ;;  %v1031_v19 = vld [vmem:[%s3176_s15 + $0x18] sm:$0xff] }
 0x9a9   :  { %v882_v22 = vmul.f32 0.5, %v881_v20 }
 0x9ab   :  { %v883_v23 = vsub.f32 1.5, %v882_v22 }
 0x9ac   :  { %v2178_v24 = vpop.eup %2177 }
 0x9ad   :  { %v884_v25 = vmul.f32 %v2176_v17, %v883_v23  ;;  %v890_v27 = vmul.f32 %v2178_v24, %v878_v18  ;;  %vm896_vm5 = vweird.f32 %v2178_v24  ;;  %v1030_v18 = vld [vmem:[%s3176_s15 + $0x10] sm:$0xff] }
 0x9ae   :  { %vm897_vm7 = vmor %vm895_vm6, %vm896_vm5  ;;  %v1037_v22 = vpack.c.bf16 %v1031_v19, %v1030_v18  ;;  %vm1044_vm6 = vcmask 523264  }
 0x9af   :  { %v891_v28 = vmul.f32 %v2178_v24, %v890_v27  ;;  %v888_v29 = vsel %vm887_vm3, %v2176_v17, %v884_v25 }
 0x9b0   :  { %v899_v26 = vmul.f32 %v888_v29, %v865_v61  ;;  %v1034_v61 = vld [vmem:[%s3176_s15 + $0x30] sm:$0xff]  ;;  %v1028_v29 = vld [vmem:[%s3176_s15] sm:$0xff] }
 0x9b1   :  { %v892_v30 = vmul.f32 0.5, %v891_v28  ;;  %v1039_v0 = vpack.c.bf16 %v1035_v62, %v1034_v61 }
 0x9b2   :  { %v904_v38 = vmul.f32 %v2121_v33, %v899_v26 }
 0x9b3   :  { %v893_v31 = vsub.f32 1.5, %v892_v30  ;;  %1052 = vmatpush.bf16.msrb.mxu3 %v1039_v0  ;;  %v1029_v30 = vld [vmem:[%s3176_s15 + $0x8] sm:$0xff] }
 0x9b4   :  { %v2826_v41 = vadd.f32 %v2122_v37, %v904_v38 }
 0x9b5   :  { %v894_v36 = vmul.f32 %v2178_v24, %v893_v31 }
 0x9b7   :  { %v898_v32 = vsel %vm897_vm7, %v2178_v24, %v894_v36  ;;  %1053 = vmatpush.bf16.msrb.mxu3 %v1038_v9 }
 0x9b8   :  { %v900_v39 = vmul.f32 %v898_v32, %v866_v1 }
 0x9ba   :  { %v905_v40 = vmul.f32 %v2121_v33, %v900_v39  ;;  %v1036_v33 = vpack.c.bf16 %v1029_v30, %v1028_v29 }
 0x9bb   :  { %1054 = vmatpush.bf16.msrb.mxu3 %v1037_v22 }
 0x9bc   :  { %v2828_v42 = vadd.f32 %v2122_v37, %v905_v40 }
 0x9be   :  { %v911_v43 = vpack.c.bf16 %v2828_v42, %v2826_v41 }
 0x9bf   :  { %1055 = vmatpush.bf16.msrb.mxu3 %v1036_v33 }
 0x9c0   :  { %2007 = vmatmul.msk.bf16.vlgmr.msra.gmra.mxu0 %vm228_vm4, %v911_v43 }
 0xa3d   :  { %v934_v45 = vpop.f32.mrf.mxu0 }
 0xa3e   :  { %v2833_v46 = vadd.f32 %v2123_v44, %v934_v45 }
 0xa40   :  { %v2836_v47 = vmul.f32 0.70710677, %v2833_v46 }
 0xa42   :  { %v943_v48 = vmul.f32 %v2836_v47, %v2836_v47 }
 0xa44   :  { %v944_v49 = vmin.f32 %v943_v48, 16.0 }
 0xa45   :  { %v936_v50 = vpop.f32.mrf.mxu0 }
 0xa46   :  { %v945_v51 = vmul.f32 2.1237322e-06, %v944_v49  ;;  %v956_v52 = vmul.f32 3.8918573e-05, %v944_v49  ;;  %v2840_v53 = vadd.f32 %v2123_v44, %v936_v50 }
 0xa48   :  { %v946_v6 = vadd.f32 0.00028619796, %v945_v51  ;;  %v957_v54 = vadd.f32 0.001143296, %v956_v52  ;;  %v2843_v55 = vmul.f32 0.70710677, %v2840_v53 }
 0xa4a   :  { %v958_v56 = vmul.f32 %v957_v54, %v944_v49  ;;  %v983_v57 = vmul.f32 %v2843_v55, %v2843_v55  ;;  %v947_v58 = vmul.f32 %v946_v6, %v944_v49 }
 0xa4c   :  { %v959_v59 = vadd.f32 0.014752088, %v958_v56  ;;  %v2847_v60 = vmin.f32 %v983_v57, 16.0  ;;  %v948_v2 = vadd.f32 0.0036580483, %v947_v58 }
 0xa4e   :  { %v960_v63 = vmul.f32 %v959_v59, %v944_v49  ;;  %v985_v13 = vmul.f32 2.1237322e-06, %v2847_v60  ;;  %v996_v1 = vmul.f32 3.8918573e-05, %v2847_v60  ;;  %v949_v12 = vmul.f32 %v948_v2, %v944_v49 }
 0xa50   :  { %v961_v3 = vadd.f32 0.112945676, %v960_v63  ;;  %v986_v14 = vadd.f32 0.00028619796, %v985_v13  ;;  %v997_v4 = vadd.f32 0.001143296, %v996_v1 }
 0xa51   :  { %v950_v24 = vadd.f32 0.05243302, %v949_v12  ;;  %v939_v12 = vmul.f32 0.5, %v2833_v46 }
 0xa52   :  { %v962_v8 = vmul.f32 %v961_v3, %v944_v49  ;;  %v987_v10 = vmul.f32 %v986_v14, %v2847_v60  ;;  %v998_v11 = vmul.f32 %v997_v4, %v2847_v60 }
 0xa53   :  { %v951_v26 = vmul.f32 %v950_v24, %v944_v49 }
 0xa54   :  { %v963_v21 = vadd.f32 0.4994258, %v962_v8  ;;  %v988_v16 = vadd.f32 0.0036580483, %v987_v10  ;;  %v999_v17 = vadd.f32 0.014752088, %v998_v11 }
 0xa55   :  { %v952_v39 = vadd.f32 0.18741608, %v951_v26 }
 0xa56   :  { %v964_v20 = vmul.f32 %v963_v21, %v944_v49  ;;  %v1000_v23 = vmul.f32 %v999_v17, %v2847_v60  ;;  %v989_v27 = vmul.f32 %v988_v16, %v2847_v60  ;;  %v940_v21 = vmul.f32 0.5, %v2840_v53 }
 0xa57   :  { %v953_v48 = vmul.f32 %v952_v39, %v944_v49 }
 0xa58   :  { %v965_v25 = vadd.f32 1.0, %v964_v20  ;;  %v1001_v28 = vadd.f32 0.112945676, %v1000_v23  ;;  %v990_v36 = vadd.f32 0.05243302, %v989_v27 }
 0xa59   :  { %v954_v56 = vadd.f32 1.1283791, %v953_v48  ;;  %v2124_v20 = vld [vmem:[#allocation7] ss:$0 sm:$0xff] }
 0xa5a   :  { %2179 = vrcp.f32 %v965_v25  ;;  %v1002_v31 = vmul.f32 %v1001_v28, %v2847_v60  ;;  %v991_v43 = vmul.f32 %v990_v36, %v2847_v60  ;;  %v977_v51 = vand.u32 2147483648, %v965_v25 }
 0xa5b   :  { %v975_v6 = vand.u32 2147483647, %v965_v25  ;;  %vm971_vm9 = vweird.f32 %v965_v25  ;;  %v955_v0 = vmul.f32 %v954_v56, %v2836_v47 }
 0xa5c   :  { %v1003_v32 = vadd.f32 0.4994258, %v1002_v31  ;;  %v992_v52 = vadd.f32 0.18741608, %v991_v43  ;;  %v978_v59 = vor.u32 1.1754944e-38, %v977_v51 }
 0xa5d   :  { %vm976_vm11 = vcmp.eq.f32.partialorder %v975_v6, 8.507059e+37 }
 0xa5e   :  { %v1004_v37 = vmul.f32 %v1003_v32, %v2847_v60  ;;  %v993_v61 = vmul.f32 %v992_v52, %v2847_v60 }
 0xa60   :  { %v2180_v38 = vpop.eup %2179  ;;  %v1005_v44 = vadd.f32 1.0, %v1004_v37  ;;  %v994_v13 = vadd.f32 1.1283791, %v993_v61 }
 0xa61   :  { %v967_v40 = vmul.f32 %v2180_v38, %v965_v25  ;;  %vm972_vm8 = vweird.f32 %v2180_v38 }
 0xa62   :  { %2181 = vrcp.f32 %v1005_v44  ;;  %vm973_vm10 = vmor %vm971_vm9, %vm972_vm8  ;;  %v1017_v1 = vand.u32 2147483648, %v1005_v44  ;;  %v1015_v14 = vand.u32 2147483647, %v1005_v44  ;;  %vm1011_vm2 = vweird.f32 %v1005_v44 }
 0xa63   :  { %v968_v45 = vsub.f32 1.0, %v967_v40  ;;  %v995_v8 = vmul.f32 %v994_v13, %v2843_v55 }
 0xa64   :  { %v1018_v5 = vor.u32 1.1754944e-38, %v1017_v1  ;;  %vm1016_vm5 = vcmp.eq.f32.partialorder %v1015_v14, 8.507059e+37 }
 0xa65   :  { %v969_v50 = vmul.f32 %v2180_v38, %v968_v45  ;;  %v2012_v45 = vld [vmem:[%s3208_s2 + $0x28] sm:$0xff] }
 0xa67   :  { %v970_v54 = vadd.f32 %v2180_v38, %v969_v50 }
 0xa68   :  { %v2182_v57 = vpop.eup %2181 }
 0xa69   :  { %v974_v58 = vsel %vm973_vm10, %v2180_v38, %v970_v54  ;;  %v1007_v62 = vmul.f32 %v2182_v57, %v1005_v44  ;;  %vm1012_vm1 = vweird.f32 %v2182_v57  ;;  %v2014_v38 = vld [vmem:[%s3208_s2 + $0x38] sm:$0xff]  ;;  %v2011_v44 = vld [vmem:[%s3208_s2 + $0x20] sm:$0xff] }
 0xa6a   :  { %v979_v63 = vsel %vm976_vm11, %v978_v59, %v974_v58  ;;  %vm1013_vm3 = vmor %vm1011_vm2, %vm1012_vm1  ;;  %v1126_v50 = vpack.c.bf16 %v2012_v45, %v2011_v44 }
 0xa6b   :  { %v1008_v49 = vsub.f32 1.0, %v1007_v62  ;;  %v980_v2 = vmul.f32 %v979_v63, %v955_v0 }
 0xa6d   :  { %v1009_v3 = vmul.f32 %v2182_v57, %v1008_v49  ;;  %v2008_v7 = vclamps-f32 %v980_v2, 1.0  ;;  %v2125_v2 = vld [vmem:[%s3178_s17] ss:$0 sm:$0xff] }
 0xa6f   :  { %v1010_v4 = vadd.f32 %v2182_v57, %v1009_v3  ;;  %v1023_v11 = vadd.f32 1.0, %v2008_v7 }
 0xa71   :  { %v1014_v60 = vsel %vm1013_vm3, %v2182_v57, %v1010_v4  ;;  %v1025_v17 = vmul.f32 %v1023_v11, %v939_v12 }
 0xa72   :  { %v1019_v9 = vsel %vm1016_vm5, %v1018_v5, %v1014_v60  ;;  %v2126_v5 = vld [vmem:[%s3179_s18] ss:$0 sm:$0xff] }
 0xa73   :  { %v1020_v10 = vmul.f32 %v1019_v9, %v995_v8 }
 0xa75   :  { %v2009_v47 = vclamps-f32 %v1020_v10, 1.0 }
 0xa77   :  { %v1024_v16 = vadd.f32 1.0, %v2009_v47  ;;  %v2127_v47 = vld [vmem:[%s3169_s8 + $0x1] ss:$0 sm:$0xff]  ;;  %s3211_s8 = smov 40  }
 0xa79   :  { %v1026_v18 = vmul.f32 %v1024_v16, %v940_v21 }
 0xa7b   :  { %v1027_v19 = vpack.c.bf16 %v1026_v18, %v1025_v17 }
 0xa7d   :  { %2010 = vmatmul.msk.bf16.vlgmr.msrb.gmra.mxu3 %vm1044_vm6, %v1027_v19 }
 0xb00   :  { %v1057_v22 = vpop.f32.mrf.mxu3 }
 0xb01   :  { %v1058_v55 = vadd.f32 %v2124_v20, %v1057_v22 }
 0xb03   :  { %v1062_v23 = vadd.f32 %v1058_v55, %v2826_v41 }
 0xb05   :  { %v1066_v24 = vsel %vm228_vm4, %v1062_v23, 0.0 }
 0xb06   :  { %1067 = vadd.xlane.f32.xlu1 %v1066_v24 }
 0xb08   :  { %v1059_v25 = vpop.f32.mrf.mxu3 }
 0xb09   :  { %v1060_v27 = vadd.f32 %v2124_v20, %v1059_v25 }
 0xb0b   :  { %v1063_v46 = vadd.f32 %v1060_v27, %v2828_v42  ;;  %v2013_v42 = vld [vmem:[%s3208_s2 + $0x30] sm:$0xff] }
 0xb0c   :  { %v1127_v39 = vpack.c.bf16 %v2014_v38, %v2013_v42 }
 0xb0d   :  { %v1069_v53 = vsel %vm228_vm4, %v1063_v46, 0.0 }
 0xb0e   :  { %1070 = vadd.xlane.f32.xlu0 %v1069_v53  ;;  %1142 = vmatpush.bf16.msrb.mxu1 %v1127_v39 }
 0xb12   :  { %1143 = vmatpush.bf16.msrb.mxu1 %v1126_v50 }
 0xb79   :  { %v1068_v28 = vpop.xlane.xlu1 %1067 }
 0xb7a   :  { %v1072_v29 = vmul.f32 %v1068_v28, %v2614_v34 }
 0xb7c   :  { %v1074_v30 = vsub.f32 %v1062_v23, %v1072_v29 }
 0xb7e   :  { %v1076_v31 = vmul.f32 %v1074_v30, %v1074_v30 }
 0xb80   :  { %v1078_v33 = vsel %vm228_vm4, %v1076_v31, 0.0 }
 0xb81   :  { %v1071_v26 = vpop.xlane.xlu0 %1070  ;;  %1079 = vadd.xlane.f32.xlu1 %v1078_v33 }
 0xb82   :  { %v1073_v41 = vmul.f32 %v1071_v26, %v2614_v34 }
 0xb84   :  { %v1075_v36 = vsub.f32 %v1063_v46, %v1073_v41 }
 0xb86   :  { %v1077_v32 = vmul.f32 %v1075_v36, %v1075_v36 }
 0xb88   :  { %v1081_v37 = vsel %vm228_vm4, %v1077_v32, 0.0 }
 0xb89   :  { %1082 = vadd.xlane.f32.xlu2 %v1081_v37 }
 0xbf4   :  { %v1080_v40 = vpop.xlane.xlu1 %1079 }
 0xbf5   :  { %v1084_v43 = vmul.f32 %v1080_v40, %v2614_v34 }
 0xbf7   :  { %v1086_v48 = vadd.f32 1e-12, %v1084_v43 }
 0xbf9   :  { %2183 = vrsqrt.f32 %v1086_v48  ;;  %vm1094_vm8 = vweird.f32 %v1086_v48 }
 0xbfc   :  { %v1083_v51 = vpop.xlane.xlu2 %1082 }
 0xbfd   :  { %v1085_v52 = vmul.f32 %v1083_v51, %v2614_v34 }
 0xbff   :  { %v2184_v6 = vpop.eup %2183  ;;  %v1087_v54 = vadd.f32 1e-12, %v1085_v52 }
 0xc00   :  { %v1089_v56 = vmul.f32 %v2184_v6, %v1086_v48  ;;  %vm1095_vm7 = vweird.f32 %v2184_v6 }
 0xc01   :  { %2185 = vrsqrt.f32 %v1087_v54  ;;  %vm1096_vm9 = vmor %vm1094_vm8, %vm1095_vm7  ;;  %vm1104_vm11 = vweird.f32 %v1087_v54  ;;  %vm1741_vm7 = vcmask 1040384  }
 0xc02   :  { %v1090_v57 = vmul.f32 %v2184_v6, %v1089_v56 }
 0xc04   :  { %v1091_v58 = vmul.f32 0.5, %v1090_v57 }
 0xc06   :  { %v1092_v59 = vsub.f32 1.5, %v1091_v58 }
 0xc07   :  { %v2186_v61 = vpop.eup %2185 }
 0xc08   :  { %v1093_v62 = vmul.f32 %v2184_v6, %v1092_v59  ;;  %v1099_v63 = vmul.f32 %v2186_v61, %v1087_v54  ;;  %vm1105_vm10 = vweird.f32 %v2186_v61 }
 0xc09   :  { %vm1106_vm1 = vmor %vm1104_vm11, %vm1105_vm10 }
 0xc0a   :  { %v1100_v0 = vmul.f32 %v2186_v61, %v1099_v63  ;;  %v1097_v49 = vsel %vm1096_vm9, %v2184_v6, %v1093_v62 }
 0xc0b   :  { %v1108_v3 = vmul.f32 %v1097_v49, %v1074_v30 }
 0xc0c   :  { %v1101_v13 = vmul.f32 0.5, %v1100_v0 }
 0xc0d   :  { %v1113_v7 = vmul.f32 %v2125_v2, %v1108_v3 }
 0xc0e   :  { %v1102_v1 = vsub.f32 1.5, %v1101_v13 }
 0xc0f   :  { %v2916_v9 = vadd.f32 %v2126_v5, %v1113_v7 }
 0xc10   :  { %v1103_v14 = vmul.f32 %v2186_v61, %v1102_v1 }
 0xc12   :  { %v1107_v4 = vsel %vm1106_vm1, %v2186_v61, %v1103_v14  ;;  %vm1856_vm1 = vcmask 254976  }
 0xc13   :  { %v1109_v8 = vmul.f32 %v1107_v4, %v1075_v36 }
 0xc15   :  { %v1114_v60 = vmul.f32 %v2125_v2, %v1109_v8 }
 0xc17   :  { %v2918_v10 = vadd.f32 %v2126_v5, %v1114_v60 }
 0xc19   :  { %v1120_v11 = vpack.c.bf16 %v2918_v10, %v2916_v9 }
 0xc1b   :  { %2016 = vmatmul.msk.bf16.vlgmr.msrb.gmra.mxu1 %vm228_vm4, %v1120_v11 }
 0xc98   :  { %v1145_v12 = vpop.f32.mrf.mxu1 }
 0xc99   :  { %v1146_v21 = vadd.f32 %v2127_v47, %v1145_v12 }
 0xc9b   :  { %v1150_v16 = vpack.c.bf16 %v1146_v21, %v1146_v21 }
 0xc9d   :  { %v1153_v17 = vunpack.c.l.b16 %v1150_v16 }
 0xc9f   :  { %v2926_v18 = vpack.c.b16 %v1153_v17, %v1153_v17 }
 0xca0   :  { %v1147_v19 = vpop.f32.mrf.mxu1 }
 0xca1   :  { %v1148_v20 = vadd.f32 %v2127_v47, %v1147_v19  ;;  %1272 = vrot.lane.b32.xlu2 %v2926_v18, %s2424_s5  ;;  %1155 = vrot.lane.b32.xlu0 %v2926_v18, %s2422_s25 }
 0xca3   :  { %v1151_v22 = vpack.c.bf16 %v1148_v20, %v1148_v20 }
 0xca5   :  { %v1212_v55 = vunpack.c.l.b16 %v1151_v22 }
 0xca7   :  { %v2932_v23 = vpack.c.b16 %v1212_v55, %v1212_v55 }
 0xca9   :  { %1214 = vrot.lane.b32.xlu1 %v2932_v23, %s2422_s25  ;;  %1388 = vrot.lane.b32.xlu2 %v2926_v18, %s2428_s14  ;;  %s3212_s25 = smov 8  }
 0xcaa   :  { %1330 = vrot.lane.b32.xlu0 %v2932_v23, %s2424_s5 }
 0xcb1   :  { %1328 = vrot.lane.b32.xlu1 %v2932_v23, %s2425_s1  ;;  %1444 = vrot.lane.b32.xlu2 %v2932_v23, %s2426_s26 }
 0xcb2   :  { %1270 = vrot.lane.b32.xlu0 %v2926_v18, %s2425_s1 }
 0xcb9   :  { %1386 = vrot.lane.b32.xlu1 %v2926_v18, %s2426_s26  ;;  %1502 = vrot.lane.b32.xlu2 %v2926_v18, %s2429_s4 }
 0xcba   :  { %1446 = vrot.lane.b32.xlu0 %v2932_v23, %s2428_s14 }
 0xcc1   :  { %1562 = vrot.lane.b32.xlu1 %v2932_v23, %s2427_s7  ;;  %1190 = vrot.lane.b32.xlu2 %v2926_v18, %s2423_s24 }
 0xcc2   :  { %1504 = vrot.lane.b32.xlu0 %v2926_v18, %s2427_s7 }
 0xcca   :  { %1560 = vrot.lane.b32.xlu0 %v2932_v23, %s2429_s4 }
 0xcfb   :  { %v1273_v24 = vpop.permute.xlu2 %1272 }
 0xcfc   :  { %v1278_v29 = vsel %vm328_vm12, %v1273_v24, 0 }
 0xd03   :  { %v1389_v25 = vpop.permute.xlu2 %1388 }
 0xd04   :  { %v1394_v36 = vsel %vm328_vm12, %v1389_v25, 0 }
 0xd0b   :  { %v1445_v27 = vpop.permute.xlu2 %1444 }
 0xd13   :  { %v1503_v46 = vpop.permute.xlu2 %1502  ;;  %v1156_v53 = vpop.permute.xlu0 %1155 }
 0xd14   :  { %v1161_v28 = vsel %vm328_vm12, %v1156_v53, 0 }
 0xd15   :  { %1170 = vmatpush.bf16.xpose.msrb.mxu2 %v1161_v28 }
 0xd1b   :  { %v1215_v30 = vpop.permute.xlu1 %1214  ;;  %v1191_v31 = vpop.permute.xlu2 %1190 }
 0xd1c   :  { %v1220_v33 = vsel %vm328_vm12, %v1215_v30, 0  ;;  %v1196_v26 = vsel %vm368_vm13, %v1191_v31, 0  ;;  %v1331_v41 = vpop.permute.xlu0 %1330  ;;  %2017 = vmatmul.msk.bf16.vlgmr.msrb.gmra.mxu2 %vm328_vm12, %v1150_v16 }
 0xd1d   :  { %1287 = vmatpush.bf16.xpose.msra.mxu2 %v1278_v29  ;;  %v1336_v32 = vsel %vm328_vm12, %v1331_v41, 0  ;;  %1205 = vmatpush.bf16.msrb.mxu0 %v1196_v26 }
 0xd1e   :  { %1229 = vmatpush.bf16.xpose.msra.mxu3 %v1220_v33 }
 0xd23   :  { %v1329_v37 = vpop.permute.xlu1 %1328 }
 0xd24   :  { %v1271_v42 = vpop.permute.xlu0 %1270 }
 0xd25   :  { %1403 = vmatpush.bf16.xpose.msrb.mxu2 %v1394_v36  ;;  %2019 = vmatmul.msk.bf16.vlgmr.msra.gmra.mxu3 %vm328_vm12, %v1151_v22 }
 0xd26   :  { %1345 = vmatpush.bf16.xpose.msrb.mxu3 %v1336_v32 }
 0xd2b   :  { %v1387_v38 = vpop.permute.xlu1 %1386 }
 0xd2c   :  { %v1447_v39 = vpop.permute.xlu0 %1446  ;;  %2021 = vmatmul.msk.bf16.vlgmr.msra.gmra.mxu2 %vm328_vm12, %v1271_v42 }
 0xd2d   :  { %v1452_v40 = vsel %vm328_vm12, %v1447_v39, 0 }
 0xd2e   :  { %1461 = vmatpush.bf16.xpose.msra.mxu3 %v1452_v40 }
 0xd33   :  { %v1563_v43 = vpop.permute.xlu1 %1562 }
 0xd34   :  { %v1568_v44 = vsel %vm328_vm12, %v1563_v43, 0  ;;  %v1505_v45 = vpop.permute.xlu0 %1504 }
 0xd35   :  { %2023 = vmatmul.msk.bf16.vlgmr.msrb.gmra.mxu3 %vm328_vm12, %v1329_v37  ;;  %v1510_v48 = vsel %vm328_vm12, %v1505_v45, 0 }
 0xd36   :  { %1577 = vmatpush.bf16.xpose.msrb.mxu3 %v1568_v44  ;;  %1519 = vmatpush.bf16.xpose.msra.mxu2 %v1510_v48 }
 0xd3c   :  { %2025 = vmatmul.msk.bf16.vlgmr.msrb.gmra.mxu2 %vm328_vm12, %v1387_v38  ;;  %v1561_v50 = vpop.permute.xlu0 %1560 }
 0xd45   :  { %2027 = vmatmul.msk.bf16.vlgmr.msra.gmra.mxu3 %vm328_vm12, %v1445_v27 }
 0xd4c   :  { %2029 = vmatmul.msk.bf16.vlgmr.msra.gmra.mxu2 %vm328_vm12, %v1503_v46 }
 0xd55   :  { %2031 = vmatmul.msk.bf16.vlgmr.msrb.gmra.mxu3 %vm328_vm12, %v1561_v50 }
 0xd9f   :  { %v1172_v51 = vpop.f32.mrf.mxu2 }
 0xda0   :  { %v1176_v52 = vmul.f32 0.35355338, %v1172_v51 }
 0xda2   :  { %v1177_v6 = vadd.f32 %v1176_v52, %v2677_v35 }
 0xda4   :  { %v1178_v54 = vsel %vm328_vm12, %v1177_v6, -inf }
 0xda5   :  { %1179 = vmax.xlane.f32.xlu1 %v1178_v54 }
 0xda7   :  { %v1174_v56 = vpop.f32.mrf.mxu2 }
 0xda8   :  { %v1231_v57 = vpop.f32.mrf.mxu3 }
 0xda9   :  { %v1235_v58 = vmul.f32 0.35355338, %v1231_v57 }
 0xdab   :  { %v1236_v59 = vadd.f32 %v1235_v58, %v2719_v15 }
 0xdad   :  { %v1237_v61 = vsel %vm328_vm12, %v1236_v59, -inf }
 0xdae   :  { %1238 = vmax.xlane.f32.xlu2 %v1237_v61 }
 0xdaf   :  { %v1289_v63 = vpop.f32.mrf.mxu2 }
 0xdb0   :  { %v1233_v62 = vpop.f32.mrf.mxu3  ;;  %v1293_v0 = vmul.f32 0.35355338, %v1289_v63 }
 0xdb2   :  { %v1294_v49 = vadd.f32 %v1293_v0, %v2677_v35 }
 0xdb4   :  { %v1295_v13 = vsel %vm328_vm12, %v1294_v49, -inf }
 0xdb5   :  { %1296 = vmax.xlane.f32.xlu0 %v1295_v13 }
 0xdb7   :  { %v1291_v1 = vpop.f32.mrf.mxu2 }
 0xdb8   :  { %v1347_v2 = vpop.f32.mrf.mxu3 }
 0xdb9   :  { %v1351_v3 = vmul.f32 0.35355338, %v1347_v2 }
 0xdbb   :  { %v1352_v14 = vadd.f32 %v1351_v3, %v2719_v15 }
 0xdbd   :  { %v1353_v4 = vsel %vm328_vm12, %v1352_v14, -inf }
 0xdbe   :  { %1354 = vmax.xlane.f32.xlu1 %v1353_v4 }
 0xdbf   :  { %v1405_v7 = vpop.f32.mrf.mxu2 }
 0xdc0   :  { %v1349_v5 = vpop.f32.mrf.mxu3  ;;  %v1409_v8 = vmul.f32 0.35355338, %v1405_v7 }
 0xdc2   :  { %v1410_v60 = vadd.f32 %v1409_v8, %v2677_v35 }
 0xdc4   :  { %v1411_v11 = vsel %vm328_vm12, %v1410_v60, -inf }
 0xdc5   :  { %1412 = vmax.xlane.f32.xlu2 %v1411_v11 }
 0xdc7   :  { %v1407_v47 = vpop.f32.mrf.mxu2 }
 0xdc8   :  { %v1463_v12 = vpop.f32.mrf.mxu3 }
 0xdc9   :  { %v1467_v21 = vmul.f32 0.35355338, %v1463_v12 }
 0xdcb   :  { %v1468_v16 = vadd.f32 %v1467_v21, %v2719_v15 }
 0xdcd   :  { %v1469_v17 = vsel %vm328_vm12, %v1468_v16, -inf }
 0xdce   :  { %1470 = vmax.xlane.f32.xlu0 %v1469_v17 }
 0xdcf   :  { %v1521_v20 = vpop.f32.mrf.mxu2 }
 0xdd0   :  { %v1465_v19 = vpop.f32.mrf.mxu3  ;;  %v1525_v53 = vmul.f32 0.35355338, %v1521_v20 }
 0xdd2   :  { %v2998_v28 = vadd.f32 %v1525_v53, %v2677_v35 }
 0xdd4   :  { %v1527_v29 = vsel %vm328_vm12, %v2998_v28, -inf }
 0xdd7   :  { %1307 = vrot.lane.b32.xlu1 %v2926_v18, %s2430_s30  ;;  %v1523_v22 = vpop.f32.mrf.mxu2 }
 0xdd8   :  { %v1579_v55 = vpop.f32.mrf.mxu3 }
 0xdd9   :  { %v1583_v24 = vmul.f32 0.35355338, %v1579_v55 }
 0xddb   :  { %v1584_v25 = vadd.f32 %v1583_v24, %v2719_v15 }
 0xddd   :  { %v1585_v27 = vsel %vm328_vm12, %v1584_v25, -inf }
 0xdde   :  { %1586 = vmax.xlane.f32.xlu2 %v1585_v27 }
 0xde0   :  { %v1581_v46 = vpop.f32.mrf.mxu3 }
 0xde2   :  { %1249 = vrot.lane.b32.xlu0 %v2932_v23, %s2423_s24  ;;  %s3213_s24 = smov 24  }
 0xdf6   :  { %1365 = vrot.lane.b32.xlu2 %v2932_v23, %s2430_s30 }
 0xe01   :  { %1528 = vmax.xlane.f32.xlu1 %v1527_v29 }
 0xe18   :  { %v1180_v30 = vpop.xlane.xlu1 %1179 }
 0xe19   :  { %v1181_v15 = vsub.f32 %v1177_v6, %v1180_v30 }
 0xe1a   :  { %1423 = vrot.lane.b32.xlu1 %v2926_v18, %s2431_s20 }
 0xe1b   :  { %v1182_v31 = vmul.f32 1.442695, %v1181_v15 }
 0xe1d   :  { %2187 = vpow2.f32 %v1182_v31 }
 0xe21   :  { %v1239_v41 = vpop.xlane.xlu2 %1238 }
 0xe22   :  { %v1240_v35 = vsub.f32 %v1236_v59, %v1239_v41 }
 0xe23   :  { %v3004_v33 = vpop.eup %2187 }
 0xe24   :  { %v1184_v26 = vsel %vm328_vm12, %v3004_v33, 0.0  ;;  %v1241_v36 = vmul.f32 1.442695, %v1240_v35 }
 0xe25   :  { %1185 = vadd.xlane.f32.xlu0 %v1184_v26 }
 0xe26   :  { %2189 = vpow2.f32 %v1241_v36 }
 0xe28   :  { %v1297_v32 = vpop.xlane.xlu0 %1296 }
 0xe29   :  { %v1298_v42 = vsub.f32 %v1294_v49, %v1297_v32 }
 0xe2b   :  { %v1299_v40 = vmul.f32 1.442695, %v1298_v42 }
 0xe2c   :  { %v2190_v44 = vpop.eup %2189 }
 0xe2d   :  { %v1243_v51 = vsel %vm328_vm12, %v2190_v44, 0.0 }
 0xe31   :  { %v1355_v43 = vpop.xlane.xlu1 %1354 }
 0xe32   :  { %v1356_v48 = vsub.f32 %v1352_v14, %v1355_v43 }
 0xe34   :  { %v1357_v56 = vmul.f32 1.442695, %v1356_v48 }
 0xe38   :  { %v1413_v37 = vpop.xlane.xlu2 %1412 }
 0xe39   :  { %v1414_v38 = vsub.f32 %v1410_v60, %v1413_v37 }
 0xe3b   :  { %v1415_v39 = vmul.f32 1.442695, %v1414_v38 }
 0xe3d   :  { %2191 = vpow2.f32 %v1415_v39 }
 0xe3e   :  { %2193 = vpow2.f32 %v1299_v40 }
 0xe41   :  { %v1471_v45 = vpop.xlane.xlu0 %1470 }
 0xe42   :  { %v1472_v50 = vsub.f32 %v1468_v16, %v1471_v45 }
 0xe43   :  { %v3009_v52 = vpop.eup %2191 }
 0xe44   :  { %v1473_v6 = vmul.f32 1.442695, %v1472_v50  ;;  %1244 = vadd.xlane.f32.xlu1 %v1243_v51  ;;  %v1417_v54 = vsel %vm328_vm12, %v3009_v52, 0.0  ;;  %v2194_v57 = vpop.eup %2193 }
 0xe45   :  { %1418 = vadd.xlane.f32.xlu0 %v1417_v54  ;;  %v1301_v61 = vsel %vm328_vm12, %v2194_v57, 0.0 }
 0xe46   :  { %2195 = vpow2.f32 %v1473_v6 }
 0xe47   :  { %2197 = vpow2.f32 %v1357_v56 }
 0xe49   :  { %v1308_v58 = vpop.permute.xlu1 %1307 }
 0xe4a   :  { %v1313_v59 = vsel %vm368_vm13, %v1308_v58, 0 }
 0xe4b   :  { %1322 = vmatpush.bf16.msra.mxu0 %v1313_v59 }
 0xe4c   :  { %v3015_v62 = vpop.eup %2195  ;;  %1302 = vadd.xlane.f32.xlu1 %v1301_v61 }
 0xe4d   :  { %v1475_v63 = vsel %vm328_vm12, %v3015_v62, 0.0  ;;  %v2198_v0 = vpop.eup %2197 }
 0xe4e   :  { %1476 = vadd.xlane.f32.xlu2 %v1475_v63  ;;  %v1359_v1 = vsel %vm328_vm12, %v2198_v0, 0.0 }
 0xe51   :  { %v1587_v49 = vpop.xlane.xlu2 %1586 }
 0xe52   :  { %v1588_v13 = vsub.f32 %v1584_v25, %v1587_v49 }
 0xe54   :  { %v1589_v2 = vmul.f32 1.442695, %v1588_v13  ;;  %1360 = vadd.xlane.f32.xlu1 %v1359_v1  ;;  %v1250_v3 = vpop.permute.xlu0 %1249 }
 0xe55   :  { %v1255_v14 = vsel %vm368_vm13, %v1250_v3, 0 }
 0xe56   :  { %2199 = vpow2.f32 %v1589_v2  ;;  %1264 = vmatpush.bf16.msra.mxu1 %v1255_v14 }
 0xe59   :  { %v1366_v4 = vpop.permute.xlu2 %1365 }
 0xe5a   :  { %v1371_v5 = vsel %vm368_vm13, %v1366_v4, 0 }
 0xe5b   :  { %1380 = vmatpush.bf16.msrb.mxu1 %v1371_v5 }
 0xe5c   :  { %v3022_v7 = vpop.eup %2199 }
 0xe5d   :  { %v1591_v8 = vsel %vm328_vm12, %v3022_v7, 0.0 }
 0xe5e   :  { %1592 = vadd.xlane.f32.xlu0 %v1591_v8 }
 0xe66   :  { %1539 = vrot.lane.b32.xlu2 %v2926_v18, %s3211_s8 }
 0xe6d   :  { %1481 = vrot.lane.b32.xlu1 %v2932_v23, %s2431_s20 }
 0xe72   :  { %1597 = vrot.lane.b32.xlu0 %v2932_v23, %s3211_s8 }
 0xe74   :  { %v1529_v60 = vpop.xlane.xlu1 %1528 }
 0xe75   :  { %v1530_v11 = vsub.f32 %v2998_v28, %v1529_v60 }
 0xe77   :  { %v1531_v47 = vmul.f32 1.442695, %v1530_v11 }
 0xe79   :  { %2201 = vpow2.f32 %v1531_v47 }
 0xe7f   :  { %v2202_v12 = vpop.eup %2201 }
 0xe80   :  { %v1533_v21 = vsel %vm328_vm12, %v2202_v12, 0.0 }
 0xe8c   :  { %v1424_v19 = vpop.permute.xlu1 %1423 }
 0xe8d   :  { %v1429_v22 = vsel %vm368_vm13, %v1424_v19, 0 }
 0xe97   :  { %1534 = vadd.xlane.f32.xlu1 %v1533_v21  ;;  %v2036_v21 = vld [vmem:[%s3170_s9 + $0x38] sm:$0xff] }
 0xe98   :  { %v1186_v16 = vpop.xlane.xlu0 %1185 }
 0xe99   :  { %2203 = vrcp.f32 %v1186_v16 }
 0xe9f   :  { %v2204_v17 = vpop.eup %2203 }
 0xea0   :  { %v1188_v18 = vmul.f32 %v2204_v17, %v3004_v33  ;;  %v2033_v17 = vld [vmem:[%s3170_s9 + $0x20] sm:$0xff] }
 0xea2   :  { %v1189_v20 = vpack.c.bf16 %v1188_v18, %v1188_v18  ;;  %v2034_v18 = vld [vmem:[%s3170_s9 + $0x28] sm:$0xff] }
 0xea3   :  { %v1654_v19 = vpack.c.bf16 %v2034_v18, %v2033_v17  ;;  %v2129_v17 = vld [vmem:[%s3172_s11 + $0x1] ss:$0 sm:$0xff] }
 0xea4   :  { %2018 = vmatmul.msk.bf16.vlgmr.msrb.gmra.mxu0 %vm328_vm12, %v1189_v20 }
 0xea5   :  { %1438 = vmatpush.bf16.msrb.mxu0 %v1429_v22 }
 0xeb7   :  { %v1245_v23 = vpop.xlane.xlu1 %1244 }
 0xeb8   :  { %2205 = vrcp.f32 %v1245_v23  ;;  %v1419_v30 = vpop.xlane.xlu0 %1418 }
 0xebe   :  { %v2206_v55 = vpop.eup %2205 }
 0xebf   :  { %v1247_v24 = vmul.f32 %v2206_v55, %v2190_v44  ;;  %v1303_v25 = vpop.xlane.xlu1 %1302 }
 0xec0   :  { %2207 = vrcp.f32 %v1303_v25 }
 0xec1   :  { %v1248_v27 = vpack.c.bf16 %v1247_v24, %v1247_v24  ;;  %v1477_v46 = vpop.xlane.xlu2 %1476 }
 0xec3   :  { %2020 = vmatmul.msk.bf16.vlgmr.msra.gmra.mxu1 %vm328_vm12, %v1248_v27 }
 0xec6   :  { %v2208_v53 = vpop.eup %2207 }
 0xec7   :  { %v1305_v28 = vmul.f32 %v2208_v53, %v2194_v57  ;;  %v1361_v29 = vpop.xlane.xlu1 %1360 }
 0xec8   :  { %2209 = vrcp.f32 %v1361_v29 }
 0xec9   :  { %v1306_v15 = vpack.c.bf16 %v1305_v28, %v1305_v28  ;;  %v1540_v31 = vpop.permute.xlu2 %1539  ;;  %2211 = vrcp.f32 %v1419_v30 }
 0xeca   :  { %v1545_v33 = vsel %vm368_vm13, %v1540_v31, 0  ;;  %2213 = vrcp.f32 %v1477_v46 }
 0xecb   :  { %2022 = vmatmul.msk.bf16.vlgmr.msra.gmra.mxu0 %vm328_vm12, %v1306_v15 }
 0xecc   :  { %1554 = vmatpush.bf16.msra.mxu0 %v1545_v33 }
 0xece   :  { %v2210_v26 = vpop.eup %2209 }
 0xecf   :  { %v1363_v41 = vmul.f32 %v2210_v26, %v2198_v0  ;;  %v2212_v36 = vpop.eup %2211 }
 0xed0   :  { %v1421_v32 = vmul.f32 %v2212_v36, %v3009_v52  ;;  %v2214_v42 = vpop.eup %2213 }
 0xed1   :  { %v1364_v35 = vpack.c.bf16 %v1363_v41, %v1363_v41  ;;  %v1593_v38 = vpop.xlane.xlu0 %1592  ;;  %v1479_v39 = vmul.f32 %v2214_v42, %v3015_v62  ;;  %v2128_v41 = vld [vmem:[%s3171_s10 + $0x1] ss:$0 sm:$0xff] }
 0xed2   :  { %v1422_v37 = vpack.c.bf16 %v1421_v32, %v1421_v32  ;;  %2215 = vrcp.f32 %v1593_v38 }
 0xed3   :  { %2024 = vmatmul.msk.bf16.vlgmr.msrb.gmra.mxu1 %vm328_vm12, %v1364_v35  ;;  %v1480_v44 = vpack.c.bf16 %v1479_v39, %v1479_v39 }
 0xed8   :  { %v2216_v50 = vpop.eup %2215 }
 0xed9   :  { %v1595_v51 = vmul.f32 %v2216_v50, %v3022_v7 }
 0xedb   :  { %2026 = vmatmul.msk.bf16.vlgmr.msrb.gmra.mxu0 %vm328_vm12, %v1422_v37  ;;  %v1596_v52 = vpack.c.bf16 %v1595_v51, %v1595_v51 }
 0xedf   :  { %v1482_v40 = vpop.permute.xlu1 %1481 }
 0xee0   :  { %v1487_v43 = vsel %vm368_vm13, %v1482_v40, 0 }
 0xee1   :  { %1496 = vmatpush.bf16.msra.mxu1 %v1487_v43 }
 0xee4   :  { %2028 = vmatmul.msk.bf16.vlgmr.msra.gmra.mxu1 %vm328_vm12, %v1480_v44  ;;  %v1598_v45 = vpop.permute.xlu0 %1597 }
 0xee5   :  { %v1603_v48 = vsel %vm368_vm13, %v1598_v45, 0 }
 0xee6   :  { %1612 = vmatpush.bf16.msrb.mxu1 %v1603_v48 }
 0xef4   :  { %2032 = vmatmul.msk.bf16.vlgmr.msrb.gmra.mxu1 %vm328_vm12, %v1596_v52 }
 0xf0a   :  { %v1535_v6 = vpop.xlane.xlu1 %1534 }
 0xf0b   :  { %2217 = vrcp.f32 %v1535_v6 }
 0xf11   :  { %v2218_v54 = vpop.eup %2217 }
 0xf12   :  { %v1537_v56 = vmul.f32 %v2218_v54, %v2202_v12  ;;  %v2035_v12 = vld [vmem:[%s3170_s9 + $0x30] sm:$0xff] }
 0xf13   :  { %v1655_v16 = vpack.c.bf16 %v2036_v21, %v2035_v12 }
 0xf14   :  { %v1538_v57 = vpack.c.bf16 %v1537_v56, %v1537_v56 }
 0xf15   :  { %1670 = vmatpush.bf16.msrb.mxu2 %v1655_v16 }
 0xf16   :  { %2030 = vmatmul.msk.bf16.vlgmr.msra.gmra.mxu0 %vm328_vm12, %v1538_v57  ;;  %v2043_v57 = vld [vmem:[%s3174_s13 + $0x30] sm:$0xff] }
 0xf19   :  { %1671 = vmatpush.bf16.msrb.mxu2 %v1654_v19 }
 0xf21   :  { %v1207_v58 = vpop.f32.mrf.mxu0 }
 0xf29   :  { %v1209_v59 = vpop.f32.mrf.mxu0 }
 0xf40   :  { %v1266_v61 = vpop.f32.mrf.mxu1 }
 0xf48   :  { %v1268_v62 = vpop.f32.mrf.mxu1  ;;  %v1324_v63 = vpop.f32.mrf.mxu0 }
 0xf49   :  { %v2041_v62 = vld [vmem:[%s3174_s13 + $0x20] sm:$0xff] }
 0xf50   :  { %v1326_v0 = vpop.f32.mrf.mxu0  ;;  %v1382_v49 = vpop.f32.mrf.mxu1 }
 0xf51   :  { %v2102_v13 = vpack.i.bf16 %v1382_v49, %v1324_v63  ;;  %v2042_v63 = vld [vmem:[%s3174_s13 + $0x28] sm:$0xff] }
 0xf52   :  { %v1749_v0 = vpack.c.bf16 %v2042_v63, %v2041_v62 }
 0xf53   :  { %2103 = vrot.lane.b32.xlu2 %v2102_v13, %s3212_s25  ;;  %s1971_s25 = sshll.u32 %s3184_s23, 4  ;;  %s1972_s25 = int_to_ptr.hbm [resolvable:$true] %s1971_s25 }
 0xf58   :  { %v1384_v1 = vpop.f32.mrf.mxu1  ;;  %v1440_v2 = vpop.f32.mrf.mxu0 }
 0xf60   :  { %v1442_v3 = vpop.f32.mrf.mxu0 }
 0xf61   :  { %v1498_v14 = vpop.f32.mrf.mxu1 }
 0xf62   :  { %v2107_v4 = vpack.i.bf16 %v1498_v14, %v1440_v2 }
 0xf64   :  { %2108 = vrot.lane.b32.xlu0 %v2107_v4, %s3203_s29 }
 0xf69   :  { %v1500_v5 = vpop.f32.mrf.mxu1 }
 0xf71   :  { %v1614_v7 = vpop.f32.mrf.mxu1 }
 0xf79   :  { %v1616_v8 = vpop.f32.mrf.mxu1 }
 0xf93   :  { %v1556_v60 = vpop.f32.mrf.mxu0 }
 0xf94   :  { %v2112_v11 = vpack.i.bf16 %v1614_v7, %v1556_v60 }
 0xf96   :  { %2113 = vrot.lane.b32.xlu2 %v2112_v11, %s3213_s24 }
 0xf9b   :  { %v1558_v47 = vpop.f32.mrf.mxu0 }
 0xfad   :  { %v2104_v20 = vpop.permute.xlu2 %2103 }
 0xfae   :  { %v2106_v23 = vunpack.i.h.bf16 %v2104_v20  ;;  %v2105_v55 = vunpack.i.l.bf16 %v2104_v20 }
 0xfb0   :  { %v1643_v46 = vsel %vm328_vm12, %v1266_v61, %v2106_v23  ;;  %v1642_v53 = vsel %vm328_vm12, %v1207_v58, %v2105_v55  ;;  %v2044_v58 = vld [vmem:[%s3174_s13 + $0x38] sm:$0xff] }
 0xfb1   :  { %v1750_v59 = vpack.c.bf16 %v2044_v58, %v2043_v57 }
 0xfb3   :  { %1765 = vmatpush.bf16.msrb.mxu0 %v1750_v59 }
 0xfb7   :  { %1766 = vmatpush.bf16.msrb.mxu0 %v1749_v0 }
 0xfd6   :  { %v2109_v22 = vpop.permute.xlu0 %2108 }
 0xfd7   :  { %v2111_v24 = vunpack.i.h.bf16 %v2109_v22  ;;  %v2110_v25 = vunpack.i.l.bf16 %v2109_v22  ;;  %v2130_v22 = vld [vmem:[%s3173_s12 + $0x1] ss:$0 sm:$0xff] }
 0xfd9   :  { %v1645_v30 = vsel %vm819_vm14, %v1643_v46, %v2111_v24  ;;  %v1644_v15 = vsel %vm819_vm14, %v1642_v53, %v2110_v25 }
 0xff0   :  { %v2114_v27 = vpop.permute.xlu2 %2113 }
 0xff1   :  { %v2116_v28 = vunpack.i.h.bf16 %v2114_v27  ;;  %v2115_v29 = vunpack.i.l.bf16 %v2114_v27 }
 0xff3   :  { %v1646_v31 = vsel %vm822_vm15, %v1644_v15, %v2115_v29  ;;  %v1647_v33 = vsel %vm822_vm15, %v1645_v30, %v2116_v28  ;;  %v2131_v28 = vld [vmem:[#allocation5 + $0x1] ss:$0 sm:$0xff] }
 0xff4   :  { %v1648_v26 = vpack.c.bf16 %v1647_v33, %v1646_v31 }
 0xff6   :  { %2038 = vmatmul.msk.bf16.vlgmr.msrb.gmra.mxu2 %vm228_vm4, %v1648_v26  ;;  %v2053_v26 = vld [vmem:[%s3176_s15 + $0x70] sm:$0xff] }
0x1079   :  { %v1673_v35 = vpop.f32.mrf.mxu2 }
0x107a   :  { %v1674_v36 = vadd.f32 %v2128_v41, %v1673_v35 }
0x107c   :  { %v1678_v32 = vadd.f32 %v1674_v36, %v2916_v9 }
0x107e   :  { %v1684_v37 = vsel %vm228_vm4, %v1678_v32, 0.0 }
0x107f   :  { %1685 = vadd.xlane.f32.xlu1 %v1684_v37 }
0x1081   :  { %v1675_v42 = vpop.f32.mrf.mxu2 }
0x1082   :  { %v1676_v38 = vadd.f32 %v2128_v41, %v1675_v42  ;;  %v2054_v41 = vld [vmem:[%s3176_s15 + $0x78] sm:$0xff] }
0x1083   :  { %v1829_v36 = vpack.c.bf16 %v2054_v41, %v2053_v26  ;;  %v1890_v26 = vld [vmem:[%s3180_s19 + $0x18] sm:$0xff] }
0x1084   :  { %v1679_v39 = vadd.f32 %v1676_v38, %v2918_v10 }
0x1085   :  { %1842 = vmatpush.bf16.msra.mxu3 %v1829_v36 }
0x1086   :  { %v1687_v40 = vsel %vm228_vm4, %v1679_v39, 0.0 }
0x1087   :  { %1688 = vadd.xlane.f32.xlu0 %v1687_v40  ;;  %v2052_v40 = vld [vmem:[%s3176_s15 + $0x68] sm:$0xff] }
0x10f2   :  { %v1686_v43 = vpop.xlane.xlu1 %1685 }
0x10f3   :  { %v1690_v44 = vmul.f32 %v1686_v43, %v2614_v34 }
0x10f5   :  { %v1692_v45 = vsub.f32 %v1678_v32, %v1690_v44 }
0x10f7   :  { %v1694_v48 = vmul.f32 %v1692_v45, %v1692_v45 }
0x10f9   :  { %v1696_v50 = vsel %vm228_vm4, %v1694_v48, 0.0 }
0x10fa   :  { %v1689_v51 = vpop.xlane.xlu0 %1688  ;;  %1697 = vadd.xlane.f32.xlu1 %v1696_v50  ;;  %v2049_v50 = vld [vmem:[%s3176_s15 + $0x50] sm:$0xff] }
0x10fb   :  { %v1691_v9 = vmul.f32 %v1689_v51, %v2614_v34  ;;  %v2050_v51 = vld [vmem:[%s3176_s15 + $0x58] sm:$0xff] }
0x10fd   :  { %v1693_v52 = vsub.f32 %v1679_v39, %v1691_v9  ;;  %v2051_v39 = vld [vmem:[%s3176_s15 + $0x60] sm:$0xff] }
0x10fe   :  { %v1828_v43 = vpack.c.bf16 %v2052_v40, %v2051_v39 }
0x10ff   :  { %v1695_v6 = vmul.f32 %v1693_v52, %v1693_v52 }
0x1100   :  { %1843 = vmatpush.bf16.msra.mxu3 %v1828_v43 }
0x1101   :  { %v1699_v54 = vsel %vm228_vm4, %v1695_v6, 0.0 }
0x1102   :  { %1700 = vadd.xlane.f32.xlu2 %v1699_v54 }
0x116d   :  { %v1698_v10 = vpop.xlane.xlu1 %1697 }
0x116e   :  { %v1702_v56 = vmul.f32 %v1698_v10, %v2614_v34  ;;  %v2047_v10 = vld [vmem:[%s3176_s15 + $0x40] sm:$0xff] }
0x1170   :  { %v1704_v61 = vadd.f32 1e-12, %v1702_v56  ;;  %v2048_v56 = vld [vmem:[%s3176_s15 + $0x48] sm:$0xff] }
0x1171   :  { %v1826_v58 = vpack.c.bf16 %v2048_v56, %v2047_v10  ;;  %v1916_v10 = vld [vmem:[#allocation10 + $0x8] sm:$0xff] }
0x1172   :  { %2219 = vrsqrt.f32 %v1704_v61  ;;  %vm1712_vm13 = vweird.f32 %v1704_v61 }
0x1175   :  { %v1701_v49 = vpop.xlane.xlu2 %1700 }
0x1176   :  { %v1703_v13 = vmul.f32 %v1701_v49, %v2614_v34 }
0x1178   :  { %v2220_v1 = vpop.eup %2219  ;;  %v1705_v2 = vadd.f32 1e-12, %v1703_v13 }
0x1179   :  { %v1707_v3 = vmul.f32 %v2220_v1, %v1704_v61  ;;  %vm1713_vm12 = vweird.f32 %v2220_v1 }
0x117a   :  { %2221 = vrsqrt.f32 %v1705_v2  ;;  %vm1714_vm15 = vmor %vm1712_vm13, %vm1713_vm12  ;;  %vm1722_vm3 = vweird.f32 %v1705_v2 }
0x117b   :  { %v1708_v14 = vmul.f32 %v2220_v1, %v1707_v3 }
0x117d   :  { %v1709_v4 = vmul.f32 0.5, %v1708_v14 }
0x117f   :  { %v1710_v5 = vsub.f32 1.5, %v1709_v4 }
0x1180   :  { %v2222_v7 = vpop.eup %2221 }
0x1181   :  { %v1717_v8 = vmul.f32 %v2222_v7, %v1705_v2  ;;  %v1711_v60 = vmul.f32 %v2220_v1, %v1710_v5  ;;  %vm1723_vm2 = vweird.f32 %v2222_v7 }
0x1182   :  { %vm1724_vm5 = vmor %vm1722_vm3, %vm1723_vm2 }
0x1183   :  { %v1718_v11 = vmul.f32 %v2222_v7, %v1717_v8  ;;  %v1715_v12 = vsel %vm1714_vm15, %v2220_v1, %v1711_v60 }
0x1184   :  { %v1726_v18 = vmul.f32 %v1715_v12, %v1692_v45 }
0x1185   :  { %v1719_v47 = vmul.f32 0.5, %v1718_v11 }
0x1186   :  { %v1731_v23 = vmul.f32 %v2129_v17, %v1726_v18 }
0x1187   :  { %v1720_v21 = vsub.f32 1.5, %v1719_v47 }
0x1188   :  { %v1736_v25 = vadd.f32 %v2130_v22, %v1731_v23  ;;  %v2132_v23 = vld [vmem:[#allocation7 + $0x1] ss:$0 sm:$0xff] }
0x1189   :  { %v1721_v16 = vmul.f32 %v2222_v7, %v1720_v21 }
0x118b   :  { %v1725_v19 = vsel %vm1724_vm5, %v2222_v7, %v1721_v16 }
0x118c   :  { %v1727_v20 = vmul.f32 %v1725_v19, %v1693_v52  ;;  %v1827_v52 = vpack.c.bf16 %v2050_v51, %v2049_v50 }
0x118e   :  { %v1732_v55 = vmul.f32 %v2129_v17, %v1727_v20  ;;  %1844 = vmatpush.bf16.msra.mxu3 %v1827_v52 }
0x1190   :  { %v1737_v24 = vadd.f32 %v2130_v22, %v1732_v55 }
0x1192   :  { %v1739_v27 = vrot.slane %v1737_v24, 7  ;;  %1845 = vmatpush.bf16.msra.mxu3 %v1826_v58 }
0x1194   :  { %v3103_v46 = vsel %vm1741_vm7, %v1736_v25, %v1739_v27 }
0x1195   :  { %v1743_v53 = vpack.c.bf16 %v3103_v46, %v3103_v46 }
0x1197   :  { %2045 = vmatmul.msk.bf16.vlgmr.msrb.gmra.mxu0 %vm228_vm4, %v1743_v53 }
0x1214   :  { %v1768_v29 = vpop.f32.mrf.mxu0 }
0x1215   :  { %v1769_v30 = vadd.f32 %v2131_v28, %v1768_v29 }
0x1217   :  { %v1773_v15 = vmul.f32 0.70710677, %v1769_v30  ;;  %v1772_v18 = vmul.f32 0.5, %v1769_v30 }
0x1219   :  { %v1774_v31 = vmul.f32 %v1773_v15, %v1773_v15 }
0x121b   :  { %v1775_v33 = vmin.f32 %v1774_v31, 16.0 }
0x121c   :  { %v1770_v35 = vpop.f32.mrf.mxu0 }
0x121d   :  { %v1776_v32 = vmul.f32 2.1237322e-06, %v1775_v33  ;;  %v1787_v37 = vmul.f32 3.8918573e-05, %v1775_v33  ;;  %v1888_v35 = vld [vmem:[%s3180_s19 + $0x8] sm:$0xff] }
0x121f   :  { %v1777_v42 = vadd.f32 0.00028619796, %v1776_v32  ;;  %v1788_v38 = vadd.f32 0.001143296, %v1787_v37 }
0x1221   :  { %v1778_v44 = vmul.f32 %v1777_v42, %v1775_v33  ;;  %v1789_v45 = vmul.f32 %v1788_v38, %v1775_v33 }
0x1223   :  { %v1790_v48 = vadd.f32 0.014752088, %v1789_v45  ;;  %v1779_v9 = vadd.f32 0.0036580483, %v1778_v44 }
0x1225   :  { %v1791_v6 = vmul.f32 %v1790_v48, %v1775_v33  ;;  %v1780_v57 = vmul.f32 %v1779_v9, %v1775_v33  ;;  %v2133_v48 = vld [vmem:[%s3178_s17 + $0x1] ss:$0 sm:$0xff]  ;;  %s2434_s17 = smov [#allocation13]  }
0x1227   :  { %v1792_v54 = vadd.f32 0.112945676, %v1791_v6  ;;  %v1781_v62 = vadd.f32 0.05243302, %v1780_v57  ;;  %v2135_v57 = vld [vmem:[#allocation8] ss:$0 sm:$0xff] }
0x1229   :  { %v1793_v59 = vmul.f32 %v1792_v54, %v1775_v33  ;;  %v1782_v49 = vmul.f32 %v1781_v62, %v1775_v33  ;;  %v1915_v54 = vld [vmem:[#allocation10] sm:$0xff] }
0x122a   :  { %v1919_v56 = vpack.c.bf16 %v1916_v10, %v1915_v54 }
0x122b   :  { %v1794_v61 = vadd.f32 0.4994258, %v1793_v59  ;;  %v1783_v13 = vadd.f32 0.18741608, %v1782_v49 }
0x122c   :  { %1933 = vmatpush.bf16.msra.mxu2 %v1919_v56 }
0x122d   :  { %v1795_v63 = vmul.f32 %v1794_v61, %v1775_v33  ;;  %v1784_v2 = vmul.f32 %v1783_v13, %v1775_v33  ;;  %v1889_v33 = vld [vmem:[%s3180_s19 + $0x10] sm:$0xff] }
0x122e   :  { %v1894_v41 = vpack.c.bf16 %v1890_v26, %v1889_v33 }
0x122f   :  { %v1796_v0 = vadd.f32 1.0, %v1795_v63  ;;  %v1785_v5 = vadd.f32 1.1283791, %v1784_v2 }
0x1230   :  { %1907 = vmatpush.bf16.msra.mxu1 %v1894_v41 }
0x1231   :  { %2223 = vrcp.f32 %v1796_v0  ;;  %v1808_v4 = vand.u32 2147483648, %v1796_v0  ;;  %v1806_v8 = vand.u32 2147483647, %v1796_v0  ;;  %vm1802_vm9 = vweird.f32 %v1796_v0 }
0x1232   :  { %v1786_v47 = vmul.f32 %v1785_v5, %v1773_v15 }
0x1233   :  { %v1809_v11 = vor.u32 1.1754944e-38, %v1808_v4  ;;  %vm1807_vm11 = vcmp.eq.f32.partialorder %v1806_v8, 8.507059e+37 }
0x1237   :  { %v2224_v1 = vpop.eup %2223 }
0x1238   :  { %v1798_v3 = vmul.f32 %v2224_v1, %v1796_v0  ;;  %vm1803_vm8 = vweird.f32 %v2224_v1  ;;  %v2136_v0 = vld [vmem:[#allocation11] ss:$0 sm:$0xff] }
0x1239   :  { %vm1804_vm10 = vmor %vm1802_vm9, %vm1803_vm8 }
0x123a   :  { %v1799_v14 = vsub.f32 1.0, %v1798_v3 }
0x123c   :  { %v1800_v7 = vmul.f32 %v2224_v1, %v1799_v14 }
0x123e   :  { %v1801_v60 = vadd.f32 %v2224_v1, %v1800_v7 }
0x1240   :  { %v1805_v12 = vsel %vm1804_vm10, %v2224_v1, %v1801_v60 }
0x1241   :  { %v1810_v21 = vsel %vm1807_vm11, %v1809_v11, %v1805_v12 }
0x1242   :  { %v1811_v16 = vmul.f32 %v1810_v21, %v1786_v47 }
0x1244   :  { %v2046_v17 = vclamps-f32 %v1811_v16, 1.0 }
0x1246   :  { %v1814_v19 = vadd.f32 1.0, %v2046_v17 }
0x1248   :  { %v1815_v20 = vmul.f32 %v1814_v19, %v1772_v18 }
0x124a   :  { %v1816_v22 = vpack.c.bf16 %v1815_v20, %v1815_v20 }
0x124c   :  { %2055 = vmatmul.msk.bf16.vlgmr.msra.gmra.mxu3 %vm1044_vm6, %v1816_v22 }
0x12cf   :  { %v1847_v55 = vpop.f32.mrf.mxu3 }
0x12d0   :  { %v1848_v24 = vadd.f32 %v2132_v23, %v1847_v55 }
0x12d2   :  { %v1851_v25 = vadd.f32 %v1848_v24, %v3103_v46  ;;  %v1887_v46 = vld [vmem:[%s3180_s19] sm:$0xff] }
0x12d3   :  { %v1893_v36 = vpack.c.bf16 %v1888_v35, %v1887_v46 }
0x12d4   :  { %v1857_v27 = vsel %vm1856_vm1, %v1851_v25, 0.0 }
0x12d5   :  { %1858 = vadd.xlane.f32.xlu1 %v1857_v27  ;;  %1908 = vmatpush.bf16.msra.mxu1 %v1893_v36 }
0x12d7   :  { %v1849_v53 = vpop.f32.mrf.mxu3 }
0x1348   :  { %v1859_v28 = vpop.xlane.xlu1 %1858 }
0x1349   :  { %v1860_v29 = vmul.f32 %v1859_v28, %v2614_v34 }
0x134b   :  { %v1861_v15 = vsub.f32 %v1851_v25, %v1860_v29 }
0x134d   :  { %v1862_v31 = vmul.f32 %v1861_v15, %v1861_v15 }
0x134f   :  { %v1863_v30 = vsel %vm1856_vm1, %v1862_v31, 0.0 }
0x1350   :  { %1864 = vadd.xlane.f32.xlu1 %v1863_v30 }
0x13c3   :  { %v1865_v32 = vpop.xlane.xlu1 %1864 }
0x13c4   :  { %v1866_v37 = vmul.f32 %v1865_v32, %v2614_v34  ;;  %v2134_v34 = vld [vmem:[%s3179_s18 + $0x1] ss:$0 sm:$0xff]  ;;  %s1969_s18 = sshll.u32 %s2434_s17, 4  ;;  %s1970_s18 = int_to_ptr.vmem [resolvable:$true] %s1969_s18 }
0x13c6   :  { %v1867_v42 = vadd.f32 1e-12, %v1866_v37 }
0x13c8   :  { %2225 = vrsqrt.f32 %v1867_v42  ;;  %vm1874_vm12 = vweird.f32 %v1867_v42 }
0x13ce   :  { %v2226_v38 = vpop.eup %2225 }
0x13cf   :  { %v1869_v39 = vmul.f32 %v2226_v38, %v1867_v42  ;;  %vm1875_vm6 = vweird.f32 %v2226_v38 }
0x13d0   :  { %vm1876_vm13 = vmor %vm1874_vm12, %vm1875_vm6 }
0x13d1   :  { %v1870_v40 = vmul.f32 %v2226_v38, %v1869_v39 }
0x13d3   :  { %v1871_v43 = vmul.f32 0.5, %v1870_v40 }
0x13d5   :  { %v1872_v44 = vsub.f32 1.5, %v1871_v43 }
0x13d7   :  { %v1873_v45 = vmul.f32 %v2226_v38, %v1872_v44 }
0x13d9   :  { %v1877_v50 = vsel %vm1876_vm13, %v2226_v38, %v1873_v45 }
0x13da   :  { %v1878_v51 = vmul.f32 %v1877_v50, %v1861_v15 }
0x13dc   :  { %v1882_v9 = vmul.f32 %v2133_v48, %v1878_v51 }
0x13de   :  { %v1886_v52 = vadd.f32 %v2134_v34, %v1882_v9 }
0x13e0   :  { %v1892_v6 = vpack.c.bf16 %v1886_v52, %v1886_v52 }
0x13e2   :  { %2058 = vmatmul.msk.bf16.vlgmr.msra.gmra.mxu1 %vm228_vm4, %v1892_v6 }
0x145f   :  { %v1910_v58 = vpop.f32.mrf.mxu1 }
0x1460   :  { %v1911_v59 = vadd.f32 %v2135_v57, %v1910_v58 }
0x1462   :  { %v1914_v61 = vmax.f32 %v1911_v59, 0.0 }
0x1464   :  { %v1918_v62 = vpack.c.bf16 %v1914_v61, %v1914_v61 }
0x1466   :  { %2059 = vmatmul.msk.bf16.vlgmr.msra.gmra.mxu2 %vm819_vm14, %v1918_v62 }
0x1467   :  { %v1912_v63 = vpop.f32.mrf.mxu1 }
0x14e9   :  { %v1935_v49 = vpop.f32.mrf.mxu2 }
0x14ea   :  { %v1936_v13 = vadd.f32 %v2136_v0, %v1935_v49 }
0x14ec   :  { %v1939_v1 = vsel %vm196_vm0, %v1936_v13, -inf }
0x14ed   :  { %1940 = vmax.xlane.f32.xlu1 %v1939_v1 }
0x14f1   :  { %v1937_v2 = vpop.f32.mrf.mxu2 }
0x1560   :  { %v1941_v3 = vpop.xlane.xlu1 %1940 }
0x1561   :  { %v1942_v14 = vsub.f32 %v1936_v13, %v1941_v3 }
0x1563   :  { %v1943_v4 = vmul.f32 1.442695, %v1942_v14 }
0x1565   :  { %2227 = vpow2.f32 %v1943_v4 }
0x156b   :  { %v2228_v5 = vpop.eup %2227 }
0x156c   :  { %v1945_v7 = vsel %vm196_vm0, %v2228_v5, 0.0 }
0x156d   :  { %1946 = vadd.xlane.f32.xlu1 %v1945_v7 }
0x15e0   :  { %v1947_v8 = vpop.xlane.xlu1 %1946 }
0x15e1   :  { %2229 = vrcp.f32 %v1947_v8  ;;  %v1959_v12 = vand.u32 2147483648, %v1947_v8  ;;  %v1957_v16 = vand.u32 2147483647, %v1947_v8  ;;  %vm1953_vm14 = vweird.f32 %v1947_v8 }
0x15e3   :  { %v1960_v18 = vor.u32 1.1754944e-38, %v1959_v12  ;;  %vm1958_vm0 = vcmp.eq.f32.partialorder %v1957_v16, 8.507059e+37 }
0x15e7   :  { %v2230_v60 = vpop.eup %2229 }
0x15e8   :  { %v1949_v11 = vmul.f32 %v2230_v60, %v1947_v8  ;;  %vm1954_vm4 = vweird.f32 %v2230_v60 }
0x15e9   :  { %vm1955_vm15 = vmor %vm1953_vm14, %vm1954_vm4 }
0x15ea   :  { %v1950_v47 = vsub.f32 1.0, %v1949_v11 }
0x15ec   :  { %v1951_v21 = vmul.f32 %v2230_v60, %v1950_v47 }
0x15ee   :  { %v1952_v17 = vadd.f32 %v2230_v60, %v1951_v21 }
0x15f0   :  { %v1956_v19 = vsel %vm1955_vm15, %v2230_v60, %v1952_v17 }
0x15f1   :  { %v1961_v20 = vsel %vm1958_vm0, %v1960_v18, %v1956_v19 }
0x15f2   :  { %v1962_v22 = vmul.f32 %v2228_v5, %v1961_v20 }
0x15f4   :  { %1963 = vst [vmem:[#allocation13] sm:$0x3] %v1962_v22 }
0x15f5   :  { %1974 = dma.vmem_to_hbm [thread:$0]  %s1970_s18, 32, %s1972_s25, [#allocation4]  }
0x15f6   :  { %2407 = dma.done.wait [#allocation4], 32  }
0x15f7   :  { %2408 = vsyncadd [#allocation4], 4294967264 }
0x15f8   :  { %1979 = vsyncpa [#allocation3], 1 }
0x15f9   :  { %1980 = vsyncpa [#allocation6], 1 }
0x15fa   :  { %1981 = vsyncpa [#allocation9], 1 }
0x15fb   :  { %1982 = vsyncpa [#allocation12], 1 }
0x15fc   :  { %1983 = vsyncpa [#allocation4], 1 }

</bundles_post_ra>
